<compile_context>
chip_gen: v7x
topology: tpu7x:2x2x1
jax: 0.10.0
libtpu: 0.0.40
codegen_flags: <defaults>
</compile_context>

<pallas_src>
import math
from functools import partial

import numpy as np
import jax
import jax.numpy as jnp
from jax.experimental import pallas as pl
from jax.experimental.pallas import tpu as pltpu


NUM_GROUPS = 32          # latent-diffusion Normalize(num_groups=32, eps=1e-6)
GN_EPS = 1e-6
STEM_CIN = 32            # RGB padded to an MXU-friendly contraction width

_COMPILER_PARAMS = pltpu.CompilerParams(
    dimension_semantics=("parallel",),
    vmem_limit_bytes=32 * 1024 * 1024,   # largest layer uses ~12 MiB; safe on v5e/v6e/v7x
)


def _round_up(x, m):
    return (x + m - 1) // m * m


# ----------------------------------------------------------------------------
# Resident padded wide-row layout helpers
#   pixel (h, w) lives at flat index (h+1)*Wp8 + (w+1); everything outside the
#   valid image (pad ring + alignment columns) is kept exactly zero by the
#   kernels, so the next conv can use it directly as its 'same' padding.
# ----------------------------------------------------------------------------
def _layout(hw):
    H, W = hw
    Wp8 = _round_up(W + 2, 8)
    Hp = H + 2
    Npad = Hp * Wp8
    off = Wp8 + 1                       # flat index of pixel (0, 0)
    L = (H - 1) * Wp8 + W               # contiguous wide-row output slab
    return Hp, Wp8, Npad, off, L


def _valid_mask(hw):
    H, W = hw
    Hp, Wp8, Npad, _, _ = _layout(hw)
    m = np.zeros((Hp, Wp8), np.float32)
    m[1:H + 1, 1:W + 1] = 1.0
    return m.reshape(Npad, 1)


def to_padded(x_nhwc):
    B, H, W, C = x_nhwc.shape
    Wp8 = _round_up(W + 2, 8)
    xp = jnp.pad(x_nhwc, ((0, 0), (1, 1), (1, Wp8 - W - 1), (0, 0)))
    return xp.reshape(B, (H + 2) * Wp8, C)


def from_padded(x_pad, hw):
    H, W = hw
    B, Npad, C = x_pad.shape
    Wp8 = _round_up(W + 2, 8)
    return x_pad.reshape(B, H + 2, Wp8, C)[:, 1:H + 1, 1:W + 1, :]


# ----------------------------------------------------------------------------
# Fused conv kernel: [GN affine (+SiLU)] -> conv -> +bias [+residual] [stats]
# ----------------------------------------------------------------------------
def _make_fused_conv_kernel(tap_starts, off, L, Npad, npix, chunk,
                            has_pro, silu, has_res, emit_stats):
    """Ref order: x[1,Npad,Cin], w[T,Cin,Cout], cbias[1,Cout],
       (pscale[1,1,Cin], pbias[1,1,Cin], vmask[Npad,1])?, (residual[1,Npad,Cout])?,
       omask[L,1], out y[1,Npad,Cout], (stats[1,2,Cout])?."""
    inv_npix = 1.0 / float(npix)
    n_chunks = -(-L // chunk)

    def kernel(*refs):
        it = iter(refs)
        x_ref = next(it)
        w_ref = next(it)
        cb_ref = next(it)
        if has_pro:
            ps_ref = next(it)
            pb_ref = next(it)
            vm_ref = next(it)
        r_ref = next(it) if has_res else None
        om_ref = next(it)
        o_ref = next(it)
        st_ref = next(it) if emit_stats else None

        cout = w_ref.shape[2]

        if has_pro:
            # folded GroupNorm affine (+ swish), single f32->bf16 cast, re-zero ring
            xf = x_ref[0].astype(jnp.float32) * ps_ref[0] + pb_ref[0]
            if silu:
                xf = xf * jax.nn.sigmoid(xf)
            xb = (xf * vm_ref[...]).astype(jnp.bfloat16)

            def tap(s, c0, n):
                return xb[s + c0:s + c0 + n, :]
        else:
            def tap(s, c0, n):
                return x_ref[0, s + c0:s + c0 + n, :]

        cbias = cb_ref[...]
        msum = jnp.zeros((1, cout), jnp.float32)
        qsum = jnp.zeros((1, cout), jnp.float32)

        # keep the pad ring of the output zero (layout invariant for next layer)
        o_ref[0, 0:off, :] = jnp.zeros((off, cout), o_ref.dtype)
        o_ref[0, off + L:Npad, :] = jnp.zeros((Npad - off - L, cout), o_ref.dtype)

        for c in range(n_chunks):               # M-chunks: the f32 accumulator
            c0 = c * chunk                      # stays register-resident across
            n = min(chunk, L - c0)              # all kh*kw taps, stored once
            acc = jnp.zeros((n, cout), jnp.float32)
            for t, s in enumerate(tap_starts):
                acc = acc + jnp.dot(tap(s, c0, n), w_ref[t],
                                    preferred_element_type=jnp.float32)
            acc = acc + cbias
            if has_res:
                acc = acc + r_ref[0, off + c0:off + c0 + n, :].astype(jnp.float32)
            acc = acc * om_ref[c0:c0 + n, :]    # zero garbage cols / bias ring
            if emit_stats:                      # moments for the NEXT GroupNorm
                msum = msum + jnp.sum(acc, axis=0, keepdims=True)
                qsum = qsum + jnp.sum(acc * acc, axis=0, keepdims=True)
            o_ref[0, off + c0:off + c0 + n, :] = acc.astype(o_ref.dtype)

        if emit_stats:                          # packed into ONE tiny output
            st_ref[0, 0:1, :] = msum * inv_npix
            st_ref[0, 1:2, :] = qsum * inv_npix

    return kernel


def fused_conv(x_pad, hw, w, cbias, *, ksize, prologue=None, silu=False,
               residual=None, emit_stats=False):
    """One fused layer on the resident padded layout.

    x_pad    [B, Npad, Cin] bf16 (padded wide-row layout, zero ring)
    w        [ksize*ksize, Cin, Cout] bf16 (tap-major)
    cbias    [Cout] f32
    prologue (scale, bias) each [B, Cin] f32 (per-sample folded GroupNorm)
    residual [B, Npad, Cout] bf16 (same layout)
    returns  y_pad [B, Npad, Cout] bf16 (+ stats [B, 2, Cout] f32 = mean, mean^2)
    """
    H, W = hw
    B, Npad, Cin = x_pad.shape
    Hp, Wp8, Npad_, off, L = _layout(hw)
    assert Npad == Npad_
    T = ksize * ksize
    Cout = w.shape[2]
    assert w.shape[:2] == (T, Cin)
    npix = H * W
    if ksize == 3:
        tap_starts = tuple(ki * Wp8 + kj for ki in range(3) for kj in range(3))
    else:
        tap_starts = (off,)

    # chunk rows sized so the f32 accumulator chunk is ~128 KiB
    chunk = min(L, max(8, min(256, (32768 // Cout) // 8 * 8)))

    has_pro = prologue is not None
    has_res = residual is not None

    vmask = _valid_mask(hw)
    omask = jnp.asarray(vmask[off:off + L, :])

    args = [x_pad, w, cbias.reshape(1, Cout).astype(jnp.float32)]
    in_specs = [
        pl.BlockSpec((1, Npad, Cin), lambda b: (b, 0, 0)),
        pl.BlockSpec((T, Cin, Cout), lambda b: (0, 0, 0)),   # weights resident
        pl.BlockSpec((1, Cout), lambda b: (0, 0)),
    ]
    if has_pro:
        ps, pb = prologue
        args += [ps.reshape(B, 1, Cin).astype(jnp.float32),
                 pb.reshape(B, 1, Cin).astype(jnp.float32),
                 jnp.asarray(vmask)]
        in_specs += [pl.BlockSpec((1, 1, Cin), lambda b: (b, 0, 0)),
                     pl.BlockSpec((1, 1, Cin), lambda b: (b, 0, 0)),
                     pl.BlockSpec((Npad, 1), lambda b: (0, 0))]
    if has_res:
        args.append(residual)
        in_specs.append(pl.BlockSpec((1, Npad, Cout), lambda b: (b, 0, 0)))
    args.append(omask)
    in_specs.append(pl.BlockSpec((L, 1), lambda b: (0, 0)))

    out_shape = [jax.ShapeDtypeStruct((B, Npad, Cout), jnp.bfloat16)]
    out_specs = [pl.BlockSpec((1, Npad, Cout), lambda b: (b, 0, 0))]
    if emit_stats:
        out_shape.append(jax.ShapeDtypeStruct((B, 2, Cout), jnp.float32))
        out_specs.append(pl.BlockSpec((1, 2, Cout), lambda b: (b, 0, 0)))

    kernel = _make_fused_conv_kernel(tap_starts, off, L, Npad, npix, chunk,
                                     has_pro, silu, has_res, emit_stats)
    outs = pl.pallas_call(
        kernel,
        grid=(B,),
        in_specs=in_specs,
        out_specs=out_specs,
        out_shape=out_shape,
        compiler_params=_COMPILER_PARAMS,
    )(*args)
    if emit_stats:
        return outs[0], outs[1]
    return outs[0]


def downsample_conv(h_pad, hw, w9, cbias):
    """LDM Downsample: F.pad (0,1,0,1) + 3x3 stride-2 conv.

    Implemented as 9 strided views channel-concatenated (only 3x per network,
    spatial shrinks 4x) feeding a single-tap fused conv in the new layout."""
    H, W = hw
    B, Npad, C = h_pad.shape
    Hp, Wp8, _, _, _ = _layout(hw)
    Ho, Wo = H // 2, W // 2
    x4 = h_pad.reshape(B, Hp, Wp8, C)
    taps = []
    for ki in range(3):
        for kj in range(3):
            taps.append(jax.lax.slice(
                x4, (0, 1 + ki, 1 + kj, 0),
                (B, 2 + ki + 2 * (Ho - 1), 2 + kj + 2 * (Wo - 1), C),
                (1, 2, 2, 1)))
    xcat = jnp.concatenate(taps, axis=-1)            # [B, Ho, Wo, 9C]
    return fused_conv(to_padded(xcat), (Ho, Wo), w9, cbias, ksize=1,
                      emit_stats=True)


# ----------------------------------------------------------------------------
# Spatial self-attention kernel (mid AttnBlock), runs on the padded layout
# ----------------------------------------------------------------------------
def _make_attn_kernel(C):
    scale = 1.0 / math.sqrt(C)

    def kernel(qkv_ref, kb_ref, vm_ref, o_ref):
        qkv = qkv_ref[0]                                  # [Npad, 3C] bf16
        q, k, v = qkv[:, :C], qkv[:, C:2 * C], qkv[:, 2 * C:]
        s = jax.lax.dot_general(q, k, (((1,), (1,)), ((), ())),
                                preferred_element_type=jnp.float32)
        s = s * scale + kb_ref[...]                       # -1e30 at pad keys
        s = s - jnp.max(s, axis=-1, keepdims=True)
        p = jnp.exp(s)
        p = p * pl.reciprocal(jnp.sum(p, axis=-1, keepdims=True), approx=True)
        o = jnp.dot(p.astype(jnp.bfloat16), v,
                    preferred_element_type=jnp.float32)
        o_ref[0] = (o * vm_ref[...]).astype(o_ref.dtype)  # re-zero pad ring

    return kernel


def spatial_attention(qkv_pad, hw):
    """softmax(q k^T / sqrt(C)) v over the valid pixels of the padded layout."""
    B, Npad, C3 = qkv_pad.shape
    C = C3 // 3
    vm = _valid_mask(hw)
    kbias = jnp.asarray(((vm.reshape(1, Npad) - 1.0) * 1e30).astype(np.float32))
    return pl.pallas_call(
        _make_attn_kernel(C),
        grid=(B,),
        in_specs=[pl.BlockSpec((1, Npad, C3), lambda b: (b, 0, 0)),
                  pl.BlockSpec((1, Npad), lambda b: (0, 0)),
                  pl.BlockSpec((Npad, 1), lambda b: (0, 0))],
        out_specs=pl.BlockSpec((1, Npad, C), lambda b: (b, 0, 0)),
        out_shape=jax.ShapeDtypeStruct((B, Npad, C), jnp.bfloat16),
        compiler_params=_COMPILER_PARAMS,
    )(qkv_pad, kbias, jnp.asarray(vm))


# ----------------------------------------------------------------------------
# GroupNorm folding (uses the packed moments emitted by the previous kernel)
# ----------------------------------------------------------------------------
def groupnorm_fold(stats, gamma, beta, num_groups=NUM_GROUPS, eps=GN_EPS):
    mean_c, msq_c = stats[:, 0, :], stats[:, 1, :]
    B, C = mean_c.shape
    gs = C // num_groups
    mu = mean_c.reshape(B, num_groups, gs).mean(axis=2)
    ex2 = msq_c.reshape(B, num_groups, gs).mean(axis=2)
    var = jnp.maximum(ex2 - mu * mu, 0.0)
    inv = jax.lax.rsqrt(var + eps)
    mu = jnp.repeat(mu, gs, axis=1)
    inv = jnp.repeat(inv, gs, axis=1)
    scale = gamma[None, :] * inv
    bias = beta[None, :] - mu * scale
    return scale, bias


# ----------------------------------------------------------------------------
# Encoder blocks
# ----------------------------------------------------------------------------
def resnet_block(x, hw, stats, bp):
    cin, cout = x.shape[-1], bp["w1"].shape[-1]
    s1, b1 = groupnorm_fold(stats, *bp["gn1"])
    h, st1 = fused_conv(x, hw, bp["w1"], bp["b1"], ksize=3,
                        prologue=(s1, b1), silu=True, emit_stats=True)
    s2, b2 = groupnorm_fold(st1, *bp["gn2"])
    shortcut = x if cin == cout else fused_conv(x, hw, bp["wsc"], bp["bsc"],
                                                ksize=1)
    y, st2 = fused_conv(h, hw, bp["w2"], bp["b2"], ksize=3,
                        prologue=(s2, b2), silu=True,
                        residual=shortcut, emit_stats=True)
    return y, st2


def attn_block(x, hw, stats, ap):
    s, b = groupnorm_fold(stats, *ap["gn"])
    qkv = fused_conv(x, hw, ap["wqkv"], ap["bqkv"], ksize=1,
                     prologue=(s, b), silu=False)       # norm only, no swish
    h = spatial_attention(qkv, hw)
    y, st = fused_conv(h, hw, ap["wproj"], ap["bproj"], ksize=1,
                       residual=x, emit_stats=True)
    return y, st


def encoder_forward(x_pad, hw, p):
    h, stats = fused_conv(x_pad, hw, p["conv_in_w"], p["conv_in_b"], ksize=3,
                          emit_stats=True)
    for level in p["down"]:
        for bp in level["blocks"]:
            h, stats = resnet_block(h, hw, stats, bp)
        if "down_w" in level:
            h, stats = downsample_conv(h, hw, level["down_w"], level["down_b"])
            hw = (hw[0] // 2, hw[1] // 2)
    h, stats = resnet_block(h, hw, stats, p["mid_block1"])
    h, stats = attn_block(h, hw, stats, p["mid_attn"])
    h, stats = resnet_block(h, hw, stats, p["mid_block2"])
    s, b = groupnorm_fold(stats, *p["gn_out"])
    # conv_out (3x3 -> 2*z) with quant_conv (1x1) composed in, Cout padded to
    # 128 so the final kernel's stores stay lane-dense.
    moments = fused_conv(h, hw, p["tail_w"], p["tail_b"], ksize=3,
                         prologue=(s, b), silu=True)
    return moments, hw


def ae_encoder_forward(x_nchw, params, embed_dim):
    """AE_Encoder.forward, 'kl' type: encoder -> quant_conv -> posterior.mode()."""
    x = jnp.transpose(x_nchw, (0, 2, 3, 1)).astype(jnp.float32)   # NCHW -> NHWC
    B, H, W, C = x.shape
    x = jnp.pad(x, ((0, 0), (0, 0), (0, 0), (0, STEM_CIN - C)))
    x_pad = to_padded(x.astype(jnp.bfloat16))
    moments, hw_lat = encoder_forward(x_pad, (H, W), params)
    mode = from_padded(moments, hw_lat)[..., :embed_dim]   # DiagonalGaussian.mode()
    return jnp.transpose(mode, (0, 3, 1, 2)).astype(jnp.float32)  # back to NCHW


# ----------------------------------------------------------------------------
# Random parameters with the kl-f8 encoder architecture
# ----------------------------------------------------------------------------
def _conv_w(key, cin, cout, k):
    w = jax.random.normal(key, (k * k, cin, cout), jnp.float32)
    return (w * math.sqrt(2.0 / (cin * k * k))).astype(jnp.bfloat16)


def _conv_b(key, cout):
    return 0.01 * jax.random.normal(key, (cout,), jnp.float32)


def _gn_p(key, c):
    k1, k2 = jax.random.split(key)
    return (1.0 + 0.1 * jax.random.normal(k1, (c,), jnp.float32),
            0.05 * jax.random.normal(k2, (c,), jnp.float32))


def _resblock_p(keys, cin, cout):
    bp = {"gn1": _gn_p(next(keys), cin),
          "w1": _conv_w(next(keys), cin, cout, 3), "b1": _conv_b(next(keys), cout),
          "gn2": _gn_p(next(keys), cout),
          "w2": _conv_w(next(keys), cout, cout, 3), "b2": _conv_b(next(keys), cout)}
    if cin != cout:
        bp["wsc"] = _conv_w(next(keys), cin, cout, 1)
        bp["bsc"] = _conv_b(next(keys), cout)
    return bp


def _attn_p(keys, c):
    wq = [_conv_w(next(keys), c, c, 1) for _ in range(3)]
    bq = [_conv_b(next(keys), c) for _ in range(3)]
    return {"gn": _gn_p(next(keys), c),
            "wqkv": jnp.concatenate(wq, axis=-1),      # q|k|v fused along Cout
            "bqkv": jnp.concatenate(bq),
            "wproj": _conv_w(next(keys), c, c, 1),
            "bproj": _conv_b(next(keys), c)}


def init_encoder_params(key, *, in_ch=3, ch=128, ch_mult=(1, 2, 4, 4),
                        num_res_blocks=2, z_channels=4, embed_dim=4):
    keys = iter(jax.random.split(key, 256))
    p = {}
    w_in = jax.random.normal(next(keys), (9, in_ch, ch), jnp.float32)
    w_in = w_in * math.sqrt(2.0 / (in_ch * 9))
    w_pad = jnp.zeros((9, STEM_CIN, ch), jnp.float32).at[:, :in_ch, :].set(w_in)
    p["conv_in_w"] = w_pad.astype(jnp.bfloat16)
    p["conv_in_b"] = _conv_b(next(keys), ch)

    downs, block_in = [], ch
    for li, mult in enumerate(ch_mult):
        block_out = ch * mult
        level = {"blocks": []}
        for _ in range(num_res_blocks):
            level["blocks"].append(_resblock_p(keys, block_in, block_out))
            block_in = block_out
        if li != len(ch_mult) - 1:
            # stride-2 conv stored as a single tap over the (tap, cin) concat
            wd = _conv_w(next(keys), block_in, block_in, 3)
            level["down_w"] = wd.reshape(1, 9 * block_in, block_in)
            level["down_b"] = _conv_b(next(keys), block_in)
        downs.append(level)
    p["down"] = downs

    p["mid_block1"] = _resblock_p(keys, block_in, block_in)
    p["mid_attn"] = _attn_p(keys, block_in)
    p["mid_block2"] = _resblock_p(keys, block_in, block_in)
    p["gn_out"] = _gn_p(next(keys), block_in)

    # conv_out (3x3 -> 2*z_channels) composed with quant_conv (1x1 -> 2*embed),
    # output channels zero-padded to 128 for lane-dense stores.
    zc = 2 * z_channels
    w_out = jax.random.normal(next(keys), (9, block_in, zc), jnp.float32)
    w_out = w_out * math.sqrt(2.0 / (block_in * 9))
    b_out = 0.01 * jax.random.normal(next(keys), (zc,), jnp.float32)
    w_q = jax.random.normal(next(keys), (zc, 2 * embed_dim), jnp.float32)
    w_q = w_q * math.sqrt(2.0 / zc)
    b_q = 0.01 * jax.random.normal(next(keys), (2 * embed_dim,), jnp.float32)
    tail_w = jnp.einsum("tcz,zd->tcd", w_out, w_q)
    tail_b = b_out @ w_q + b_q
    p["tail_w"] = (jnp.zeros((9, block_in, 128), jnp.float32)
                   .at[:, :, :2 * embed_dim].set(tail_w)).astype(jnp.bfloat16)
    p["tail_b"] = jnp.zeros((128,), jnp.float32).at[:2 * embed_dim].set(tail_b)
    return p


# ----------------------------------------------------------------------------
def _selfcheck():
    """Fused conv (prologue+SiLU+residual+stats, multi-chunk path) vs lax.conv."""
    k1, k2, k3, k4, k5 = jax.random.split(jax.random.PRNGKey(42), 5)
    B, H, W, Cin, Cout = 2, 16, 16, 128, 128
    x = jax.random.normal(k1, (B, H, W, Cin), jnp.float32).astype(jnp.bfloat16)
    w = (0.05 * jax.random.normal(k2, (9, Cin, Cout), jnp.float32)).astype(jnp.bfloat16)
    b = 0.1 * jax.random.normal(k3, (Cout,), jnp.float32)
    sc = 1.0 + 0.1 * jax.random.normal(k4, (B, Cin), jnp.float32)
    sb = 0.1 * jax.random.normal(k5, (B, Cin), jnp.float32)
    res = jax.random.normal(k2, (B, H, W, Cout), jnp.float32).astype(jnp.bfloat16)

    y_pad, st = fused_conv(to_padded(x), (H, W), w, b, ksize=3,
                           prologue=(sc, sb), silu=True,
                           residual=to_padded(res), emit_stats=True)
    y = from_padded(y_pad, (H, W)).astype(jnp.float32)

    a = x.astype(jnp.float32) * sc[:, None, None, :] + sb[:, None, None, :]
    a = a * jax.nn.sigmoid(a)
    a = a.astype(jnp.bfloat16).astype(jnp.float32)
    ref = jax.lax.conv_general_dilated(
        a, w.reshape(3, 3, Cin, Cout).astype(jnp.float32), (1, 1), "SAME",
        dimension_numbers=("NHWC", "HWIO", "NHWC"))
    ref = ref + b[None, None, None, :] + res.astype(jnp.float32)
    np.testing.assert_allclose(np.asarray(y), np.asarray(ref), rtol=2e-2, atol=2e-2)
    np.testing.assert_allclose(np.asarray(st[:, 0, :]),
                               np.asarray(ref.mean(axis=(1, 2))),
                               rtol=2e-2, atol=2e-2)
    np.testing.assert_allclose(np.asarray(st[:, 1, :]),
                               np.asarray((ref * ref).mean(axis=(1, 2))),
                               rtol=2e-2, atol=2e-2)


if __name__ == "__main__":
    key = jax.random.PRNGKey(0)
    k_x, k_p = jax.random.split(key)

    _selfcheck()   # cheap runtime sanity check of the fused conv kernel

    # kl-f8 channel config (ch=128, ch_mult=(1,2,4,4)), small 32x32 RGB input:
    # batch=2 x 3 x 32 x 32  ->  latent mode of shape batch x 4 x 4 x 4.
    EMBED_DIM = 4
    batch, hw = 2, 32
    x = jax.random.normal(k_x, (batch, 3, hw, hw), jnp.float32)
    params = init_encoder_params(k_p, in_ch=3, ch=128, ch_mult=(1, 2, 4, 4),
                                 num_res_blocks=2, z_channels=4,
                                 embed_dim=EMBED_DIM)

    fwd = jax.jit(partial(ae_encoder_forward, embed_dim=EMBED_DIM))
    out = jax.block_until_ready(fwd(x, params))

    assert out.shape == (batch, EMBED_DIM, hw // 8, hw // 8), out.shape
    assert bool(jnp.all(jnp.isfinite(out)))
    print("KERNEL_OK")
</pallas_src>

<mosaic_0001>
module attributes {stable_mosaic.version = 11 : i64} {
  func.func @kernel(%arg0: i32, %arg1: memref<1x432x128xbf16, #tpu.memory_space<vmem>>, %arg2: memref<9x128x128xbf16, #tpu.memory_space<vmem>>, %arg3: memref<1x128xf32, #tpu.memory_space<vmem>>, %arg4: memref<1x1x128xf32, #tpu.memory_space<vmem>>, %arg5: memref<1x1x128xf32, #tpu.memory_space<vmem>>, %arg6: memref<432x1xf32, #tpu.memory_space<vmem>>, %arg7: memref<1x432x128xbf16, #tpu.memory_space<vmem>>, %arg8: memref<376x1xf32, #tpu.memory_space<vmem>>, %arg9: memref<1x432x128xbf16, #tpu.memory_space<vmem>>, %arg10: memref<1x2x128xf32, #tpu.memory_space<vmem>>) attributes {dimension_semantics = [#tpu.dimension_semantics<parallel>], iteration_bounds = array<i64: 2>, scalar_prefetch = 0 : i64, scratch_operands = 0 : i64, tpu.core_type = #tpu.core_type<tc>, window_params = [{transform_indices = @transform_0, window_bounds = array<i64: 1, 432, 128>}, {pipeline_mode = #tpu.pipeline_mode<synchronous>, transform_indices = @transform_1, window_bounds = array<i64: 9, 128, 128>}, {pipeline_mode = #tpu.pipeline_mode<synchronous>, transform_indices = @transform_2, window_bounds = array<i64: 1, 128>}, {transform_indices = @transform_3, window_bounds = array<i64: 1, 1, 128>}, {transform_indices = @transform_4, window_bounds = array<i64: 1, 1, 128>}, {pipeline_mode = #tpu.pipeline_mode<synchronous>, transform_indices = @transform_5, window_bounds = array<i64: 432, 1>}, {transform_indices = @transform_6, window_bounds = array<i64: 1, 432, 128>}, {pipeline_mode = #tpu.pipeline_mode<synchronous>, transform_indices = @transform_7, window_bounds = array<i64: 376, 1>}, {transform_indices = @transform_8, window_bounds = array<i64: 1, 432, 128>}, {transform_indices = @transform_9, window_bounds = array<i64: 1, 2, 128>}]} {
    %c0 = arith.constant 0 : index
    %c0_0 = arith.constant 0 : index
    %c0_1 = arith.constant 0 : index
    %0 = vector.load %arg1[%c0, %c0_0, %c0_1] : memref<1x432x128xbf16, #tpu.memory_space<vmem>>, vector<1x432x128xbf16>
    %1 = vector.shape_cast %0 : vector<1x432x128xbf16> to vector<432x128xbf16>
    %2 = arith.extf %1 : vector<432x128xbf16> to vector<432x128xf32>
    %c0_2 = arith.constant 0 : index
    %c0_3 = arith.constant 0 : index
    %c0_4 = arith.constant 0 : index
    %3 = vector.load %arg4[%c0_2, %c0_3, %c0_4] : memref<1x1x128xf32, #tpu.memory_space<vmem>>, vector<1x1x128xf32>
    %4 = vector.shape_cast %3 : vector<1x1x128xf32> to vector<1x128xf32>
    %5 = vector.broadcast %4 : vector<1x128xf32> to vector<432x128xf32>
    %6 = arith.mulf %2, %5 : vector<432x128xf32>
    %c0_5 = arith.constant 0 : index
    %c0_6 = arith.constant 0 : index
    %c0_7 = arith.constant 0 : index
    %7 = vector.load %arg5[%c0_5, %c0_6, %c0_7] : memref<1x1x128xf32, #tpu.memory_space<vmem>>, vector<1x1x128xf32>
    %8 = vector.shape_cast %7 : vector<1x1x128xf32> to vector<1x128xf32>
    %9 = vector.broadcast %8 : vector<1x128xf32> to vector<432x128xf32>
    %10 = arith.addf %6, %9 : vector<432x128xf32>
    %11 = arith.negf %10 : vector<432x128xf32>
    %12 = math.exp %11 : vector<432x128xf32>
    %cst = arith.constant 1.000000e+00 : f32
    %13 = vector.broadcast %cst : f32 to vector<432x128xf32>
    %14 = arith.addf %13, %12 : vector<432x128xf32>
    %15 = arith.divf %13, %14 : vector<432x128xf32>
    %16 = arith.mulf %10, %15 : vector<432x128xf32>
    %c0_8 = arith.constant 0 : index
    %c0_9 = arith.constant 0 : index
    %17 = vector.load %arg6[%c0_8, %c0_9] : memref<432x1xf32, #tpu.memory_space<vmem>>, vector<432x1xf32>
    %18 = vector.broadcast %17 : vector<432x1xf32> to vector<432x128xf32>
    %19 = arith.mulf %16, %18 : vector<432x128xf32>
    %20 = arith.truncf %19 : vector<432x128xf32> to vector<432x128xbf16>
    %c0_10 = arith.constant 0 : index
    %c0_11 = arith.constant 0 : index
    %21 = vector.load %arg3[%c0_10, %c0_11] : memref<1x128xf32, #tpu.memory_space<vmem>>, vector<1x128xf32>
    %cst_12 = arith.constant 0.000000e+00 : f32
    %22 = vector.broadcast %cst_12 : f32 to vector<1x128xf32>
    %cst_13 = arith.constant 0.000000e+00 : f32
    %23 = vector.broadcast %cst_13 : f32 to vector<1x128xf32>
    %cst_14 = arith.constant 0.000000e+00 : bf16
    %24 = vector.broadcast %cst_14 : bf16 to vector<25x128xbf16>
    %c0_15 = arith.constant 0 : index
    %c0_16 = arith.constant 0 : index
    %c0_17 = arith.constant 0 : index
    %25 = vector.load %arg9[%c0_15, %c0_16, %c0_17] : memref<1x432x128xbf16, #tpu.memory_space<vmem>>, vector<1x25x128xbf16>
    %26 = vector.shape_cast %25 : vector<1x25x128xbf16> to vector<25x128xbf16>
    %27 = vector.shape_cast %24 : vector<25x128xbf16> to vector<1x25x128xbf16>
    tpu.vector_store %arg9[%c0_15, %c0_16, %c0_17], %27 {strides = array<i32>} : memref<1x432x128xbf16, #tpu.memory_space<vmem>>, vector<1x25x128xbf16>,
    %cst_18 = arith.constant 0.000000e+00 : bf16
    %28 = vector.broadcast %cst_18 : bf16 to vector<31x128xbf16>
    %c0_19 = arith.constant 0 : index
    %c401 = arith.constant 401 : index
    %c0_20 = arith.constant 0 : index
    %29 = vector.load %arg9[%c0_19, %c401, %c0_20] : memref<1x432x128xbf16, #tpu.memory_space<vmem>>, vector<1x31x128xbf16>
    %30 = vector.shape_cast %29 : vector<1x31x128xbf16> to vector<31x128xbf16>
    %31 = vector.shape_cast %28 : vector<31x128xbf16> to vector<1x31x128xbf16>
    tpu.vector_store %arg9[%c0_19, %c401, %c0_20], %31 {strides = array<i32>} : memref<1x432x128xbf16, #tpu.memory_space<vmem>>, vector<1x31x128xbf16>,
    %cst_21 = arith.constant 0.000000e+00 : f32
    %32 = vector.broadcast %cst_21 : f32 to vector<256x128xf32>
    %33 = vector.extract_strided_slice %20 {offsets = [0, 0], sizes = [256, 128], strides = [1, 1]} : vector<432x128xbf16> to vector<256x128xbf16>
    %c0_22 = arith.constant 0 : index
    %c0_23 = arith.constant 0 : index
    %c0_24 = arith.constant 0 : index
    %34 = vector.load %arg2[%c0_22, %c0_23, %c0_24] : memref<9x128x128xbf16, #tpu.memory_space<vmem>>, vector<1x128x128xbf16>
    %35 = vector.shape_cast %34 : vector<1x128x128xbf16> to vector<128x128xbf16>
    %cst_25 = arith.constant dense<0.000000e+00> : vector<256x128xf32>
    %36 = tpu.matmul %33, %35, %cst_25 {dimension_numbers = #tpu.dot_dimension_numbers<[1], [0], [0], [1], [0, 0, 1, 1], [], []>} : vector<256x128xbf16>, vector<128x128xbf16>, vector<256x128xf32> -> vector<256x128xf32>
    %37 = arith.addf %32, %36 : vector<256x128xf32>
    %38 = vector.extract_strided_slice %20 {offsets = [1, 0], sizes = [256, 128], strides = [1, 1]} : vector<432x128xbf16> to vector<256x128xbf16>
    %c1 = arith.constant 1 : index
    %c0_26 = arith.constant 0 : index
    %c0_27 = arith.constant 0 : index
    %39 = vector.load %arg2[%c1, %c0_26, %c0_27] : memref<9x128x128xbf16, #tpu.memory_space<vmem>>, vector<1x128x128xbf16>
    %40 = vector.shape_cast %39 : vector<1x128x128xbf16> to vector<128x128xbf16>
    %cst_28 = arith.constant dense<0.000000e+00> : vector<256x128xf32>
    %41 = tpu.matmul %38, %40, %cst_28 {dimension_numbers = #tpu.dot_dimension_numbers<[1], [0], [0], [1], [0, 0, 1, 1], [], []>} : vector<256x128xbf16>, vector<128x128xbf16>, vector<256x128xf32> -> vector<256x128xf32>
    %42 = arith.addf %37, %41 : vector<256x128xf32>
    %43 = vector.extract_strided_slice %20 {offsets = [2, 0], sizes = [256, 128], strides = [1, 1]} : vector<432x128xbf16> to vector<256x128xbf16>
    %c2 = arith.constant 2 : index
    %c0_29 = arith.constant 0 : index
    %c0_30 = arith.constant 0 : index
    %44 = vector.load %arg2[%c2, %c0_29, %c0_30] : memref<9x128x128xbf16, #tpu.memory_space<vmem>>, vector<1x128x128xbf16>
    %45 = vector.shape_cast %44 : vector<1x128x128xbf16> to vector<128x128xbf16>
    %cst_31 = arith.constant dense<0.000000e+00> : vector<256x128xf32>
    %46 = tpu.matmul %43, %45, %cst_31 {dimension_numbers = #tpu.dot_dimension_numbers<[1], [0], [0], [1], [0, 0, 1, 1], [], []>} : vector<256x128xbf16>, vector<128x128xbf16>, vector<256x128xf32> -> vector<256x128xf32>
    %47 = arith.addf %42, %46 : vector<256x128xf32>
    %48 = vector.extract_strided_slice %20 {offsets = [24, 0], sizes = [256, 128], strides = [1, 1]} : vector<432x128xbf16> to vector<256x128xbf16>
    %c3 = arith.constant 3 : index
    %c0_32 = arith.constant 0 : index
    %c0_33 = arith.constant 0 : index
    %49 = vector.load %arg2[%c3, %c0_32, %c0_33] : memref<9x128x128xbf16, #tpu.memory_space<vmem>>, vector<1x128x128xbf16>
    %50 = vector.shape_cast %49 : vector<1x128x128xbf16> to vector<128x128xbf16>
    %cst_34 = arith.constant dense<0.000000e+00> : vector<256x128xf32>
    %51 = tpu.matmul %48, %50, %cst_34 {dimension_numbers = #tpu.dot_dimension_numbers<[1], [0], [0], [1], [0, 0, 1, 1], [], []>} : vector<256x128xbf16>, vector<128x128xbf16>, vector<256x128xf32> -> vector<256x128xf32>
    %52 = arith.addf %47, %51 : vector<256x128xf32>
    %53 = vector.extract_strided_slice %20 {offsets = [25, 0], sizes = [256, 128], strides = [1, 1]} : vector<432x128xbf16> to vector<256x128xbf16>
    %c4 = arith.constant 4 : index
    %c0_35 = arith.constant 0 : index
    %c0_36 = arith.constant 0 : index
    %54 = vector.load %arg2[%c4, %c0_35, %c0_36] : memref<9x128x128xbf16, #tpu.memory_space<vmem>>, vector<1x128x128xbf16>
    %55 = vector.shape_cast %54 : vector<1x128x128xbf16> to vector<128x128xbf16>
    %cst_37 = arith.constant dense<0.000000e+00> : vector<256x128xf32>
    %56 = tpu.matmul %53, %55, %cst_37 {dimension_numbers = #tpu.dot_dimension_numbers<[1], [0], [0], [1], [0, 0, 1, 1], [], []>} : vector<256x128xbf16>, vector<128x128xbf16>, vector<256x128xf32> -> vector<256x128xf32>
    %57 = arith.addf %52, %56 : vector<256x128xf32>
    %58 = vector.extract_strided_slice %20 {offsets = [26, 0], sizes = [256, 128], strides = [1, 1]} : vector<432x128xbf16> to vector<256x128xbf16>
    %c5 = arith.constant 5 : index
    %c0_38 = arith.constant 0 : index
    %c0_39 = arith.constant 0 : index
    %59 = vector.load %arg2[%c5, %c0_38, %c0_39] : memref<9x128x128xbf16, #tpu.memory_space<vmem>>, vector<1x128x128xbf16>
    %60 = vector.shape_cast %59 : vector<1x128x128xbf16> to vector<128x128xbf16>
    %cst_40 = arith.constant dense<0.000000e+00> : vector<256x128xf32>
    %61 = tpu.matmul %58, %60, %cst_40 {dimension_numbers = #tpu.dot_dimension_numbers<[1], [0], [0], [1], [0, 0, 1, 1], [], []>} : vector<256x128xbf16>, vector<128x128xbf16>, vector<256x128xf32> -> vector<256x128xf32>
    %62 = arith.addf %57, %61 : vector<256x128xf32>
    %63 = vector.extract_strided_slice %20 {offsets = [48, 0], sizes = [256, 128], strides = [1, 1]} : vector<432x128xbf16> to vector<256x128xbf16>
    %c6 = arith.constant 6 : index
    %c0_41 = arith.constant 0 : index
    %c0_42 = arith.constant 0 : index
    %64 = vector.load %arg2[%c6, %c0_41, %c0_42] : memref<9x128x128xbf16, #tpu.memory_space<vmem>>, vector<1x128x128xbf16>
    %65 = vector.shape_cast %64 : vector<1x128x128xbf16> to vector<128x128xbf16>
    %cst_43 = arith.constant dense<0.000000e+00> : vector<256x128xf32>
    %66 = tpu.matmul %63, %65, %cst_43 {dimension_numbers = #tpu.dot_dimension_numbers<[1], [0], [0], [1], [0, 0, 1, 1], [], []>} : vector<256x128xbf16>, vector<128x128xbf16>, vector<256x128xf32> -> vector<256x128xf32>
    %67 = arith.addf %62, %66 : vector<256x128xf32>
    %68 = vector.extract_strided_slice %20 {offsets = [49, 0], sizes = [256, 128], strides = [1, 1]} : vector<432x128xbf16> to vector<256x128xbf16>
    %c7 = arith.constant 7 : index
    %c0_44 = arith.constant 0 : index
    %c0_45 = arith.constant 0 : index
    %69 = vector.load %arg2[%c7, %c0_44, %c0_45] : memref<9x128x128xbf16, #tpu.memory_space<vmem>>, vector<1x128x128xbf16>
    %70 = vector.shape_cast %69 : vector<1x128x128xbf16> to vector<128x128xbf16>
    %cst_46 = arith.constant dense<0.000000e+00> : vector<256x128xf32>
    %71 = tpu.matmul %68, %70, %cst_46 {dimension_numbers = #tpu.dot_dimension_numbers<[1], [0], [0], [1], [0, 0, 1, 1], [], []>} : vector<256x128xbf16>, vector<128x128xbf16>, vector<256x128xf32> -> vector<256x128xf32>
    %72 = arith.addf %67, %71 : vector<256x128xf32>
    %73 = vector.extract_strided_slice %20 {offsets = [50, 0], sizes = [256, 128], strides = [1, 1]} : vector<432x128xbf16> to vector<256x128xbf16>
    %c8 = arith.constant 8 : index
    %c0_47 = arith.constant 0 : index
    %c0_48 = arith.constant 0 : index
    %74 = vector.load %arg2[%c8, %c0_47, %c0_48] : memref<9x128x128xbf16, #tpu.memory_space<vmem>>, vector<1x128x128xbf16>
    %75 = vector.shape_cast %74 : vector<1x128x128xbf16> to vector<128x128xbf16>
    %cst_49 = arith.constant dense<0.000000e+00> : vector<256x128xf32>
    %76 = tpu.matmul %73, %75, %cst_49 {dimension_numbers = #tpu.dot_dimension_numbers<[1], [0], [0], [1], [0, 0, 1, 1], [], []>} : vector<256x128xbf16>, vector<128x128xbf16>, vector<256x128xf32> -> vector<256x128xf32>
    %77 = arith.addf %72, %76 : vector<256x128xf32>
    %78 = vector.broadcast %21 : vector<1x128xf32> to vector<256x128xf32>
    %79 = arith.addf %77, %78 : vector<256x128xf32>
    %c0_50 = arith.constant 0 : index
    %c25 = arith.constant 25 : index
    %c0_51 = arith.constant 0 : index
    %80 = vector.load %arg7[%c0_50, %c25, %c0_51] : memref<1x432x128xbf16, #tpu.memory_space<vmem>>, vector<1x256x128xbf16>
    %81 = vector.shape_cast %80 : vector<1x256x128xbf16> to vector<256x128xbf16>
    %82 = arith.extf %81 : vector<256x128xbf16> to vector<256x128xf32>
    %83 = arith.addf %79, %82 : vector<256x128xf32>
    %c0_52 = arith.constant 0 : index
    %c0_53 = arith.constant 0 : index
    %84 = vector.load %arg8[%c0_52, %c0_53] : memref<376x1xf32, #tpu.memory_space<vmem>>, vector<256x1xf32>
    %85 = vector.broadcast %84 : vector<256x1xf32> to vector<256x128xf32>
    %86 = arith.mulf %83, %85 : vector<256x128xf32>
    %cst_54 = arith.constant dense<0.000000e+00> : vector<128xf32>
    %87 = vector.multi_reduction <add>, %86, %cst_54 [0] : vector<256x128xf32> to vector<128xf32>
    %88 = vector.shape_cast %87 : vector<128xf32> to vector<1x128xf32>
    %89 = arith.addf %22, %88 : vector<1x128xf32>
    %90 = arith.mulf %86, %86 : vector<256x128xf32>
    %cst_55 = arith.constant dense<0.000000e+00> : vector<128xf32>
    %91 = vector.multi_reduction <add>, %90, %cst_55 [0] : vector<256x128xf32> to vector<128xf32>
    %92 = vector.shape_cast %91 : vector<128xf32> to vector<1x128xf32>
    %93 = arith.addf %23, %92 : vector<1x128xf32>
    %94 = arith.truncf %86 : vector<256x128xf32> to vector<256x128xbf16>
    %c0_56 = arith.constant 0 : index
    %c25_57 = arith.constant 25 : index
    %c0_58 = arith.constant 0 : index
    %95 = vector.load %arg9[%c0_56, %c25_57, %c0_58] : memref<1x432x128xbf16, #tpu.memory_space<vmem>>, vector<1x256x128xbf16>
    %96 = vector.shape_cast %95 : vector<1x256x128xbf16> to vector<256x128xbf16>
    %97 = vector.shape_cast %94 : vector<256x128xbf16> to vector<1x256x128xbf16>
    tpu.vector_store %arg9[%c0_56, %c25_57, %c0_58], %97 {strides = array<i32>} : memref<1x432x128xbf16, #tpu.memory_space<vmem>>, vector<1x256x128xbf16>,
    %cst_59 = arith.constant 0.000000e+00 : f32
    %98 = vector.broadcast %cst_59 : f32 to vector<120x128xf32>
    %99 = vector.extract_strided_slice %20 {offsets = [256, 0], sizes = [120, 128], strides = [1, 1]} : vector<432x128xbf16> to vector<120x128xbf16>
    %c0_60 = arith.constant 0 : index
    %c0_61 = arith.constant 0 : index
    %c0_62 = arith.constant 0 : index
    %100 = vector.load %arg2[%c0_60, %c0_61, %c0_62] : memref<9x128x128xbf16, #tpu.memory_space<vmem>>, vector<1x128x128xbf16>
    %101 = vector.shape_cast %100 : vector<1x128x128xbf16> to vector<128x128xbf16>
    %cst_63 = arith.constant dense<0.000000e+00> : vector<120x128xf32>
    %102 = tpu.matmul %99, %101, %cst_63 {dimension_numbers = #tpu.dot_dimension_numbers<[1], [0], [0], [1], [0, 0, 1, 1], [], []>} : vector<120x128xbf16>, vector<128x128xbf16>, vector<120x128xf32> -> vector<120x128xf32>
    %103 = arith.addf %98, %102 : vector<120x128xf32>
    %104 = vector.extract_strided_slice %20 {offsets = [257, 0], sizes = [120, 128], strides = [1, 1]} : vector<432x128xbf16> to vector<120x128xbf16>
    %c1_64 = arith.constant 1 : index
    %c0_65 = arith.constant 0 : index
    %c0_66 = arith.constant 0 : index
    %105 = vector.load %arg2[%c1_64, %c0_65, %c0_66] : memref<9x128x128xbf16, #tpu.memory_space<vmem>>, vector<1x128x128xbf16>
    %106 = vector.shape_cast %105 : vector<1x128x128xbf16> to vector<128x128xbf16>
    %cst_67 = arith.constant dense<0.000000e+00> : vector<120x128xf32>
    %107 = tpu.matmul %104, %106, %cst_67 {dimension_numbers = #tpu.dot_dimension_numbers<[1], [0], [0], [1], [0, 0, 1, 1], [], []>} : vector<120x128xbf16>, vector<128x128xbf16>, vector<120x128xf32> -> vector<120x128xf32>
    %108 = arith.addf %103, %107 : vector<120x128xf32>
    %109 = vector.extract_strided_slice %20 {offsets = [258, 0], sizes = [120, 128], strides = [1, 1]} : vector<432x128xbf16> to vector<120x128xbf16>
    %c2_68 = arith.constant 2 : index
    %c0_69 = arith.constant 0 : index
    %c0_70 = arith.constant 0 : index
    %110 = vector.load %arg2[%c2_68, %c0_69, %c0_70] : memref<9x128x128xbf16, #tpu.memory_space<vmem>>, vector<1x128x128xbf16>
    %111 = vector.shape_cast %110 : vector<1x128x128xbf16> to vector<128x128xbf16>
    %cst_71 = arith.constant dense<0.000000e+00> : vector<120x128xf32>
    %112 = tpu.matmul %109, %111, %cst_71 {dimension_numbers = #tpu.dot_dimension_numbers<[1], [0], [0], [1], [0, 0, 1, 1], [], []>} : vector<120x128xbf16>, vector<128x128xbf16>, vector<120x128xf32> -> vector<120x128xf32>
    %113 = arith.addf %108, %112 : vector<120x128xf32>
    %114 = vector.extract_strided_slice %20 {offsets = [280, 0], sizes = [120, 128], strides = [1, 1]} : vector<432x128xbf16> to vector<120x128xbf16>
    %c3_72 = arith.constant 3 : index
    %c0_73 = arith.constant 0 : index
    %c0_74 = arith.constant 0 : index
    %115 = vector.load %arg2[%c3_72, %c0_73, %c0_74] : memref<9x128x128xbf16, #tpu.memory_space<vmem>>, vector<1x128x128xbf16>
    %116 = vector.shape_cast %115 : vector<1x128x128xbf16> to vector<128x128xbf16>
    %cst_75 = arith.constant dense<0.000000e+00> : vector<120x128xf32>
    %117 = tpu.matmul %114, %116, %cst_75 {dimension_numbers = #tpu.dot_dimension_numbers<[1], [0], [0], [1], [0, 0, 1, 1], [], []>} : vector<120x128xbf16>, vector<128x128xbf16>, vector<120x128xf32> -> vector<120x128xf32>
    %118 = arith.addf %113, %117 : vector<120x128xf32>
    %119 = vector.extract_strided_slice %20 {offsets = [281, 0], sizes = [120, 128], strides = [1, 1]} : vector<432x128xbf16> to vector<120x128xbf16>
    %c4_76 = arith.constant 4 : index
    %c0_77 = arith.constant 0 : index
    %c0_78 = arith.constant 0 : index
    %120 = vector.load %arg2[%c4_76, %c0_77, %c0_78] : memref<9x128x128xbf16, #tpu.memory_space<vmem>>, vector<1x128x128xbf16>
    %121 = vector.shape_cast %120 : vector<1x128x128xbf16> to vector<128x128xbf16>
    %cst_79 = arith.constant dense<0.000000e+00> : vector<120x128xf32>
    %122 = tpu.matmul %119, %121, %cst_79 {dimension_numbers = #tpu.dot_dimension_numbers<[1], [0], [0], [1], [0, 0, 1, 1], [], []>} : vector<120x128xbf16>, vector<128x128xbf16>, vector<120x128xf32> -> vector<120x128xf32>
    %123 = arith.addf %118, %122 : vector<120x128xf32>
    %124 = vector.extract_strided_slice %20 {offsets = [282, 0], sizes = [120, 128], strides = [1, 1]} : vector<432x128xbf16> to vector<120x128xbf16>
    %c5_80 = arith.constant 5 : index
    %c0_81 = arith.constant 0 : index
    %c0_82 = arith.constant 0 : index
    %125 = vector.load %arg2[%c5_80, %c0_81, %c0_82] : memref<9x128x128xbf16, #tpu.memory_space<vmem>>, vector<1x128x128xbf16>
    %126 = vector.shape_cast %125 : vector<1x128x128xbf16> to vector<128x128xbf16>
    %cst_83 = arith.constant dense<0.000000e+00> : vector<120x128xf32>
    %127 = tpu.matmul %124, %126, %cst_83 {dimension_numbers = #tpu.dot_dimension_numbers<[1], [0], [0], [1], [0, 0, 1, 1], [], []>} : vector<120x128xbf16>, vector<128x128xbf16>, vector<120x128xf32> -> vector<120x128xf32>
    %128 = arith.addf %123, %127 : vector<120x128xf32>
    %129 = vector.extract_strided_slice %20 {offsets = [304, 0], sizes = [120, 128], strides = [1, 1]} : vector<432x128xbf16> to vector<120x128xbf16>
    %c6_84 = arith.constant 6 : index
    %c0_85 = arith.constant 0 : index
    %c0_86 = arith.constant 0 : index
    %130 = vector.load %arg2[%c6_84, %c0_85, %c0_86] : memref<9x128x128xbf16, #tpu.memory_space<vmem>>, vector<1x128x128xbf16>
    %131 = vector.shape_cast %130 : vector<1x128x128xbf16> to vector<128x128xbf16>
    %cst_87 = arith.constant dense<0.000000e+00> : vector<120x128xf32>
    %132 = tpu.matmul %129, %131, %cst_87 {dimension_numbers = #tpu.dot_dimension_numbers<[1], [0], [0], [1], [0, 0, 1, 1], [], []>} : vector<120x128xbf16>, vector<128x128xbf16>, vector<120x128xf32> -> vector<120x128xf32>
    %133 = arith.addf %128, %132 : vector<120x128xf32>
    %134 = vector.extract_strided_slice %20 {offsets = [305, 0], sizes = [120, 128], strides = [1, 1]} : vector<432x128xbf16> to vector<120x128xbf16>
    %c7_88 = arith.constant 7 : index
    %c0_89 = arith.constant 0 : index
    %c0_90 = arith.constant 0 : index
    %135 = vector.load %arg2[%c7_88, %c0_89, %c0_90] : memref<9x128x128xbf16, #tpu.memory_space<vmem>>, vector<1x128x128xbf16>
    %136 = vector.shape_cast %135 : vector<1x128x128xbf16> to vector<128x128xbf16>
    %cst_91 = arith.constant dense<0.000000e+00> : vector<120x128xf32>
    %137 = tpu.matmul %134, %136, %cst_91 {dimension_numbers = #tpu.dot_dimension_numbers<[1], [0], [0], [1], [0, 0, 1, 1], [], []>} : vector<120x128xbf16>, vector<128x128xbf16>, vector<120x128xf32> -> vector<120x128xf32>
    %138 = arith.addf %133, %137 : vector<120x128xf32>
    %139 = vector.extract_strided_slice %20 {offsets = [306, 0], sizes = [120, 128], strides = [1, 1]} : vector<432x128xbf16> to vector<120x128xbf16>
    %c8_92 = arith.constant 8 : index
    %c0_93 = arith.constant 0 : index
    %c0_94 = arith.constant 0 : index
    %140 = vector.load %arg2[%c8_92, %c0_93, %c0_94] : memref<9x128x128xbf16, #tpu.memory_space<vmem>>, vector<1x128x128xbf16>
    %141 = vector.shape_cast %140 : vector<1x128x128xbf16> to vector<128x128xbf16>
    %cst_95 = arith.constant dense<0.000000e+00> : vector<120x128xf32>
    %142 = tpu.matmul %139, %141, %cst_95 {dimension_numbers = #tpu.dot_dimension_numbers<[1], [0], [0], [1], [0, 0, 1, 1], [], []>} : vector<120x128xbf16>, vector<128x128xbf16>, vector<120x128xf32> -> vector<120x128xf32>
    %143 = arith.addf %138, %142 : vector<120x128xf32>
    %144 = vector.broadcast %21 : vector<1x128xf32> to vector<120x128xf32>
    %145 = arith.addf %143, %144 : vector<120x128xf32>
    %c0_96 = arith.constant 0 : index
    %c281 = arith.constant 281 : index
    %c0_97 = arith.constant 0 : index
    %146 = vector.load %arg7[%c0_96, %c281, %c0_97] : memref<1x432x128xbf16, #tpu.memory_space<vmem>>, vector<1x120x128xbf16>
    %147 = vector.shape_cast %146 : vector<1x120x128xbf16> to vector<120x128xbf16>
    %148 = arith.extf %147 : vector<120x128xbf16> to vector<120x128xf32>
    %149 = arith.addf %145, %148 : vector<120x128xf32>
    %c256 = arith.constant 256 : index
    %c0_98 = arith.constant 0 : index
    %150 = vector.load %arg8[%c256, %c0_98] : memref<376x1xf32, #tpu.memory_space<vmem>>, vector<120x1xf32>
    %151 = vector.broadcast %150 : vector<120x1xf32> to vector<120x128xf32>
    %152 = arith.mulf %149, %151 : vector<120x128xf32>
    %cst_99 = arith.constant dense<0.000000e+00> : vector<128xf32>
    %153 = vector.multi_reduction <add>, %152, %cst_99 [0] : vector<120x128xf32> to vector<128xf32>
    %154 = vector.shape_cast %153 : vector<128xf32> to vector<1x128xf32>
    %155 = arith.addf %89, %154 : vector<1x128xf32>
    %156 = arith.mulf %152, %152 : vector<120x128xf32>
    %cst_100 = arith.constant dense<0.000000e+00> : vector<128xf32>
    %157 = vector.multi_reduction <add>, %156, %cst_100 [0] : vector<120x128xf32> to vector<128xf32>
    %158 = vector.shape_cast %157 : vector<128xf32> to vector<1x128xf32>
    %159 = arith.addf %93, %158 : vector<1x128xf32>
    %160 = arith.truncf %152 : vector<120x128xf32> to vector<120x128xbf16>
    %c0_101 = arith.constant 0 : index
    %c281_102 = arith.constant 281 : index
    %c0_103 = arith.constant 0 : index
    %161 = vector.load %arg9[%c0_101, %c281_102, %c0_103] : memref<1x432x128xbf16, #tpu.memory_space<vmem>>, vector<1x120x128xbf16>
    %162 = vector.shape_cast %161 : vector<1x120x128xbf16> to vector<120x128xbf16>
    %163 = vector.shape_cast %160 : vector<120x128xbf16> to vector<1x120x128xbf16>
    tpu.vector_store %arg9[%c0_101, %c281_102, %c0_103], %163 {strides = array<i32>} : memref<1x432x128xbf16, #tpu.memory_space<vmem>>, vector<1x120x128xbf16>,
    %cst_104 = arith.constant 3.906250e-03 : f32
    %164 = vector.broadcast %cst_104 : f32 to vector<1x128xf32>
    %165 = arith.mulf %155, %164 : vector<1x128xf32>
    %c0_105 = arith.constant 0 : index
    %c0_106 = arith.constant 0 : index
    %c0_107 = arith.constant 0 : index
    %166 = vector.load %arg10[%c0_105, %c0_106, %c0_107] : memref<1x2x128xf32, #tpu.memory_space<vmem>>, vector<1x1x128xf32>
    %167 = vector.shape_cast %166 : vector<1x1x128xf32> to vector<1x128xf32>
    %168 = vector.shape_cast %165 : vector<1x128xf32> to vector<1x1x128xf32>
    tpu.vector_store %arg10[%c0_105, %c0_106, %c0_107], %168 {strides = array<i32>} : memref<1x2x128xf32, #tpu.memory_space<vmem>>, vector<1x1x128xf32>,
    %cst_108 = arith.constant 3.906250e-03 : f32
    %169 = vector.broadcast %cst_108 : f32 to vector<1x128xf32>
    %170 = arith.mulf %159, %169 : vector<1x128xf32>
    %c0_109 = arith.constant 0 : index
    %c1_110 = arith.constant 1 : index
    %c0_111 = arith.constant 0 : index
    %171 = vector.load %arg10[%c0_109, %c1_110, %c0_111] : memref<1x2x128xf32, #tpu.memory_space<vmem>>, vector<1x1x128xf32>
    %172 = vector.shape_cast %171 : vector<1x1x128xf32> to vector<1x128xf32>
    %173 = vector.shape_cast %170 : vector<1x128xf32> to vector<1x1x128xf32>
    tpu.vector_store %arg10[%c0_109, %c1_110, %c0_111], %173 {strides = array<i32>} : memref<1x2x128xf32, #tpu.memory_space<vmem>>, vector<1x1x128xf32>,
    return
  }
  func.func @transform_0(%arg0: i32) -> (i32, i32, i32) {
    %c0_i32 = arith.constant 0 : i32
    %c0_i32_0 = arith.constant 0 : i32
    %c0_i32_1 = arith.constant 0 : i32
    return %arg0, %c0_i32, %c0_i32_0 : i32, i32, i32
  }
  func.func @transform_1(%arg0: i32) -> (i32, i32, i32) {
    %c0_i32 = arith.constant 0 : i32
    %c0_i32_0 = arith.constant 0 : i32
    %c0_i32_1 = arith.constant 0 : i32
    %c0_i32_2 = arith.constant 0 : i32
    return %c0_i32, %c0_i32_0, %c0_i32_1 : i32, i32, i32
  }
  func.func @transform_2(%arg0: i32) -> (i32, i32) {
    %c0_i32 = arith.constant 0 : i32
    %c0_i32_0 = arith.constant 0 : i32
    %c0_i32_1 = arith.constant 0 : i32
    return %c0_i32, %c0_i32_0 : i32, i32
  }
  func.func @transform_3(%arg0: i32) -> (i32, i32, i32) {
    %c0_i32 = arith.constant 0 : i32
    %c0_i32_0 = arith.constant 0 : i32
    %c0_i32_1 = arith.constant 0 : i32
    return %arg0, %c0_i32, %c0_i32_0 : i32, i32, i32
  }
  func.func @transform_4(%arg0: i32) -> (i32, i32, i32) {
    %c0_i32 = arith.constant 0 : i32
    %c0_i32_0 = arith.constant 0 : i32
    %c0_i32_1 = arith.constant 0 : i32
    return %arg0, %c0_i32, %c0_i32_0 : i32, i32, i32
  }
  func.func @transform_5(%arg0: i32) -> (i32, i32) {
    %c0_i32 = arith.constant 0 : i32
    %c0_i32_0 = arith.constant 0 : i32
    %c0_i32_1 = arith.constant 0 : i32
    return %c0_i32, %c0_i32_0 : i32, i32
  }
  func.func @transform_6(%arg0: i32) -> (i32, i32, i32) {
    %c0_i32 = arith.constant 0 : i32
    %c0_i32_0 = arith.constant 0 : i32
    %c0_i32_1 = arith.constant 0 : i32
    return %arg0, %c0_i32, %c0_i32_0 : i32, i32, i32
  }
  func.func @transform_7(%arg0: i32) -> (i32, i32) {
    %c0_i32 = arith.constant 0 : i32
    %c0_i32_0 = arith.constant 0 : i32
    %c0_i32_1 = arith.constant 0 : i32
    return %c0_i32, %c0_i32_0 : i32, i32
  }
  func.func @transform_8(%arg0: i32) -> (i32, i32, i32) {
    %c0_i32 = arith.constant 0 : i32
    %c0_i32_0 = arith.constant 0 : i32
    %c0_i32_1 = arith.constant 0 : i32
    return %arg0, %c0_i32, %c0_i32_0 : i32, i32, i32
  }
  func.func @transform_9(%arg0: i32) -> (i32, i32, i32) {
    %c0_i32 = arith.constant 0 : i32
    %c0_i32_0 = arith.constant 0 : i32
    %c0_i32_1 = arith.constant 0 : i32
    return %arg0, %c0_i32, %c0_i32_0 : i32, i32, i32
  }
}

</mosaic_0001>

<bundles_post_ra>
// kernel: tpu_custom_call.1
= control target key start
LH: loop header
LB: loop body
LE: loop exit
PB: predicated region body
PF: predicated region fallthrough
CT: control target
= control target key end

     0   :  { %s14181_s0 = inlined_call_operand.hbm [shape: bf16[2,432,128], index: 0, kind: input, shape index: {}]   ;;  %s14182_s1 = inlined_call_operand.vmem [shape: bf16[9,128,128], index: 1, kind: input, shape index: {}]   ;;  %s14183_s2 = inlined_call_operand.vmem [shape: f32[1,128], index: 2, kind: input, shape index: {}]   ;;  %s14184_s3 = inlined_call_operand.vmem [shape: f32[2,1,128], index: 3, kind: input, shape index: {}]   ;;  %s14185_s4 = inlined_call_operand.vmem [shape: f32[2,1,128], index: 4, kind: input, shape index: {}]   ;;  %s14186_s5 = inlined_call_operand.vmem [shape: f32[432,1], index: 5, kind: input, shape index: {}]   ;;  %s14187_s6 = inlined_call_operand.hbm [shape: bf16[2,432,128], index: 6, kind: input, shape index: {}]   ;;  %s14188_s7 = inlined_call_operand.vmem [shape: f32[376,1], index: 7, kind: input, shape index: {}]   ;;  %s14189_s8 = inlined_call_operand.hbm [shape: bf16[2,432,128], index: 8, kind: output, shape index: {0}]   ;;  %s14190_s9 = inlined_call_operand.hbm [shape: f32[2,2,128], index: 9, kind: output, shape index: {1}]  }
   0x1   :  { %14287 = sst [smem:[#allocation85_spill]] %s14181_s0 }
   0x2   :  { %15 = vsyncpa [#allocation3], 0 }
   0x3   :  { %17 = vsyncpa [#allocation3 + $0x1], 0 }
   0x4   :  { %18 = vsyncpa [#allocation6], 0 }
   0x5   :  { %20 = vsyncpa [#allocation6 + $0x1], 0 }
   0x6   :  { %21 = vsyncpa [#allocation4], 0 }
   0x7   :  { %23 = vsyncpa [#allocation4 + $0x1], 0 }
   0x8   :  { %24 = vsyncpa [#allocation9], 0 }
   0x9   :  { %26 = vsyncpa [#allocation9 + $0x1], 0  ;;  %s10523_s30 = smov 0   ;;  %s10525_s10 = smov 0  }
   0xa   :  { %s10527_s11 = smov 0   ;;  %s10529_s12 = smov 0  }
   0xb LB: > { %14288 = sst [smem:[#allocation14_spill]] %s10458_s11  ;;  %s10544_s13 = sadd.s32 4294967295, %s10462_s12   ;;  %s10462_s12 = sphi %s10529_s12, %s14628_s12   ;;  %s10458_s11 = sphi %s10527_s11, %s14630_s11   ;;  %s10454_s10 = sphi %s10525_s10, %s14632_s10   ;;  %s10450_s30 = sphi %s10523_s30, %s14631_s30  }
   0xc   : > { %s7623_s14 = sadd.s32 4294967294, %s10462_s12   ;;  %s10548_s15 = sadd.s32 1, %s10462_s12  }
   0xd   : > { %14289 = sst [smem:[#allocation15_spill]] %s10548_s15  ;;  %s39_s16 = sadd.s32 1, %s10458_s11 }
   0xe   : > { %s36_s17 = ssub.s32 %s10462_s12, %s10548_s15  ;;  %p46_p0 = scmp.ne.s32.totalorder %s10458_s11, %s10454_s10 }
   0xf   : > { %p37_p1 = scmp.eq.s32.totalorder %s36_s17, 0  ;;  %p47_p2 = scmp.eq.s32.totalorder %s10462_s12, 0 }
  0x10   : > { %p52_p3 = scmp.ne.s32.totalorder %s10454_s10, %s10450_s30  ;;  %p53_p4 = scmp.eq.s32.totalorder %s10544_s13, 0 }
  0x11   : > { %s10560_s18 = scalar_select %p37_p1, %s10458_s11, %s39_s16  }
  0x12   : > { %p48_p5 = por %p47_p2, %p46_p0  ;;  %p10562_p6 = por %p53_p4, %p52_p3 }
  0x13   : > { %14290 = sst [smem:[#allocation16_spill]] %s10560_s18  ;;  %p238_p7 = scmp.eq.s32.totalorder %s10544_s13, 1 }
  0x14   : > { %s14291_s19 = scalar_select %p10562_p6, 1, 0 }
  0x15   : > { %p244_p8 = scmp.eq.s32.totalorder %s7623_s14, 1  ;;  %p9890_p10 = scmp.lt.s32.totalorder %s10462_s12, 2 }
  0x16   : > { %p10569_p11 = por %p238_p7, %p46_p0  ;;  %s10578_s22 = sand.u32 1, %s10458_s11  }
  0x17   : > { %p10573_p12 = por %p244_p8, %p52_p3  ;;  %s14191_s23 = smul.u32 3456, %s10462_s12 }
  0x18   : > { %s14292_s20 = scalar_select %p10569_p11, 1, 0 }
  0x19   : > { %s14293_s21 = scalar_select %p10573_p12, 1, 0 }
  0x1a   : > { %s9862_s24 = smul.u32 216, %s10578_s22  ;;  %s14294_s0 = sld [smem:[#allocation85_spill]] }
  0x1b   : > { %p10589_p13 = pnand %p9890_p10, %p48_p5  ;;  %s303_s16 = scalar_lea.sflag [#allocation3], %s10578_s22 }
  0x1c   : > { %s306_s29 = scalar_lea.vmem [#allocation2], %s9862_s24 }
  0x1d   : > { %s313_s14 = sshll.u32 %s306_s29, 4  ;;  %p10302_p1 = pneg %p10589_p13  ;;  %s10595_s14 = int_to_ptr.vmem [resolvable:$true] %s313_s14 }
  0x20   : > { %s10587_s27 = scalar_lea.hbm %s14294_s0, %s14191_s23  ;;  %s10305_s23 = scalar_lea.hbm %s14294_s0, 6912 }
  0x21   : > { %s10300_s17 = scalar_lea.hbm %s10587_s27, 3456  ;;  %p10306_p4 = scmp.lt.u32.totalorder %s10587_s27, %s14294_s0 }
  0x22   : > { %p10301_p0 = scmp.ne.s32.totalorder %s10587_s27, %s10300_s17  ;;  %p10307_p5 = scmp.lt.u32.totalorder %s10305_s23, %s10300_s17 }
  0x23   : > { %p10309_p8 = scmp.lt.u32.totalorder %s10300_s17, %s10587_s27 }
  0x24   : > { %p10303_p2 = pnand %p10302_p1, %p10301_p0  ;;  %p10308_p7 = por %p10307_p5, %p10306_p4 }
  0x26   : > { %p10304_p3 = pneg %p10303_p2  ;;  %p10310_p10 = por %p10309_p8, %p10308_p7 }
  0x28   : > { %p10311_p9 = pnand %p10310_p10, %p10304_p3 }
  0x2a   : > { %10314 = shalt.err (!%p10311_p9)
}
  0x2b   : > { %s10315_s29 = scalar_lea.vmem %s10595_s14, 3456  ;;  %s10464_s25 = smov [#allocation2]  }
  0x2c   : > { %p10316_p0 = scmp.ne.s32.totalorder %s10595_s14, %s10315_s29  ;;  %s10320_s26 = sshll.u32 %s10464_s25, 4  ;;  %s10321_s26 = int_to_ptr.vmem [resolvable:$false] %s10320_s26 }
  0x2d   : > { %s10322_s11 = scalar_lea.vmem %s10321_s26, 6912  ;;  %p10323_p11 = scmp.lt.s32.totalorder %s10595_s14, %s10321_s26 }
  0x2e   : > { %p10318_p2 = pnand %p10316_p0, %p10302_p1  ;;  %p10324_p4 = scmp.lt.s32.totalorder %s10322_s11, %s10315_s29 }
  0x30   : > { %p10319_p12 = pneg %p10318_p2  ;;  %p10325_p5 = por %p10324_p4, %p10323_p11 }
  0x32   : > { %p10326_p7 = pnand %p10325_p5, %p10319_p12 }
  0x34   : > { %10329 = shalt.err (!%p10326_p7)
}
  0x35   : > { %s14196_s18 = smov 64   ;;  %s10466_s23 = smov 4  }
  0x36   : > { %9879 = dma.hbm_to_vmem [thread:$0]  (!%p10589_p13), %s10587_s27, 3456, %s10595_s14, %s303_s16, %s14196_s18, %s14196_s18, %s10466_s23  }
  0x37   : > { %p7628_p9 = scmp.ge.s32.totalorder %s10462_s12, 1  ;;  %p354_p11 = scmp.lt.s32.totalorder %s10462_s12, 3 }
  0x38   : > { %s14297_s29 = smul.u32 3456, %s10462_s12  ;;  %s339_s0 = scalar_lea.vmem [#allocation5], %s9862_s24 }
  0x39   : > { %p10630_p12 = pnand %p7628_p9, %p354_p11  ;;  %s346_s15 = sshll.u32 %s339_s0, 4  ;;  %s10643_s15 = int_to_ptr.vmem [resolvable:$true] %s346_s15 }
  0x3a   : > { %s10639_s11 = scalar_lea.hbm %s14187_s6, %s14297_s29  ;;  %s336_s27 = scalar_lea.sflag [#allocation6], %s10578_s22 }
  0x3b   : > { %s10330_s14 = scalar_lea.hbm %s10639_s11, 3456  ;;  %s10335_s29 = scalar_lea.hbm %s14187_s6, 6912 }
  0x3c   : > { %p10331_p3 = scmp.ne.s32.totalorder %s10639_s11, %s10330_s14  ;;  %p10336_p0 = scmp.lt.u32.totalorder %s10639_s11, %s14187_s6 }
  0x3d   : > { %p10337_p2 = scmp.lt.u32.totalorder %s10335_s29, %s10330_s14  ;;  %p10339_p5 = scmp.lt.u32.totalorder %s10330_s14, %s10639_s11 }
  0x3e   : > { %p10333_p8 = pnand %p10331_p3, %p10302_p1 }
  0x3f   : > { %p10338_p4 = por %p10337_p2, %p10336_p0 }
  0x40   : > { %p10334_p10 = pneg %p10333_p8 }
  0x41   : > { %p10340_p7 = por %p10339_p5, %p10338_p4 }
  0x43   : > { %p10341_p9 = pnand %p10340_p7, %p10334_p10 }
  0x45   : > { %10344 = shalt.err (!%p10341_p9)
}
  0x46   : > { %s10345_s0 = scalar_lea.vmem %s10643_s15, 3456  ;;  %s10467_s24 = smov [#allocation5]  }
  0x47   : > { %p10346_p11 = scmp.ne.s32.totalorder %s10643_s15, %s10345_s0  ;;  %s10350_s16 = sshll.u32 %s10467_s24, 4  ;;  %s10351_s16 = int_to_ptr.vmem [resolvable:$false] %s10350_s16 }
  0x48   : > { %s10352_s18 = scalar_lea.vmem %s10351_s16, 6912  ;;  %p10353_p6 = scmp.lt.s32.totalorder %s10643_s15, %s10351_s16 }
  0x49   : > { %p10348_p3 = pnand %p10346_p11, %p10302_p1  ;;  %p10354_p0 = scmp.lt.s32.totalorder %s10352_s18, %s10345_s0 }
  0x4b   : > { %p10349_p8 = pneg %p10348_p3  ;;  %p10355_p2 = por %p10354_p0, %p10353_p6 }
  0x4d   : > { %p10356_p4 = pnand %p10355_p2, %p10349_p8 }
  0x4f   : > { %10359 = shalt.err (!%p10356_p4)
}
  0x50   : > { %s14298_s14 = smov 64   ;;  %358 = sbr.rel (%p10630_p12) target bundleno = 1064 (0x428), region = 52 }
  0x51   : > { %9882 = dma.hbm_to_vmem [thread:$0]  (!%p10589_p13), %s10639_s11, 3456, %s10643_s15, %s336_s27, %s14298_s14, %s14298_s14, %s10466_s23  }
  0x57   : > { %s10677_s25 = sand.u32 1, %s10454_s10   ;;  %p14299_p6 = scmp.ne.s32.totalorder %s14291_s19, 0 }
  0x58   : > { %s9866_s29 = smul.u32 216, %s10677_s25  ;;  %s361_s26 = scalar_lea.sflag [#allocation3], %s10677_s25 }
  0x5a   : > { %s10681_s28 = scalar_lea.vmem [#allocation2], %s9866_s29 }
  0x5b   : > { %10433 = dma.done.wait (%p14299_p6), %s361_s26, 3456  }
  0x5c   : > { %10435 = vsyncadd (%p14299_p6), %s361_s26, 4294963840  ;;  %s370_s15 = scalar_lea.sflag [#allocation6], %s10677_s25  ;;  %s10688_s22 = scalar_lea.vmem [#allocation5], %s9866_s29 }
  0x5d   : > { %10437 = dma.done.wait (%p14299_p6), %s370_s15, 3456  }
  0x5e   : > { %10439 = vsyncadd (%p14299_p6), %s370_s15, 4294963840  ;;  %v10468_v0 = vmov 0   ;;  %s10694_s23 = scalar_lea.vmem [#allocation7], %s9866_s29  ;;  %v1041_v1 = vld [vmem:[%s14186_s5 + $0x10] sm:$0xff]  ;;  %v1039_v2 = vld [vmem:[%s14186_s5] sm:$0xff]  ;;  %p424_p13 = scmp.lt.s32.totalorder %s10544_s13, 1 }
  0x5f   : > { %9930 = vset.pattern.permute.xlu1 %v10468_v0  ;;  %1445 = vst [vmem:[%s10694_s23] sm:$0xf] %v10468_v0  ;;  %1446 = vst [vmem:[%s10694_s23 + $0x4] sm:$0xf] %v10468_v0  ;;  %9929 = vset.pattern.permute.xlu0 %v10468_v0  ;;  %v1042_v3 = vld [vmem:[%s14186_s5 + $0x18] sm:$0xff]  ;;  %v1040_v4 = vld [vmem:[%s14186_s5 + $0x8] sm:$0xff]  ;;  %vm2097_vm0 = vcmask 1046528  }
  0x60   : > { %1447 = vst [vmem:[%s10694_s23 + $0x8] sm:$0xf] %v10468_v0  ;;  %1460 = vst [vmem:[%s10694_s23 + $0xcc] sm:$0xf] %v10468_v0  ;;  %1105 = vperm.xlu1 %9930, %v1041_v1   ;;  %1095 = vperm.xlu0 %9929, %v1039_v2   ;;  %v1044_v5 = vld [vmem:[%s14186_s5 + $0x28] sm:$0xff]  ;;  %v1043_v6 = vld [vmem:[%s14186_s5 + $0x20] sm:$0xff] }
  0x61   : > { %1461 = vst [vmem:[%s10694_s23 + $0xd0] sm:$0xf] %v10468_v0  ;;  %1462 = vst [vmem:[%s10694_s23 + $0xd4] sm:$0xf] %v10468_v0  ;;  %v1046_v7 = vld [vmem:[%s14186_s5 + $0x38] sm:$0xff]  ;;  %v1045_v8 = vld [vmem:[%s14186_s5 + $0x30] sm:$0xff] }
  0x62   : > { %v1048_v9 = vld [vmem:[%s14186_s5 + $0x48] sm:$0xff]  ;;  %v1047_v10 = vld [vmem:[%s14186_s5 + $0x40] sm:$0xff]  ;;  %v1050_v11 = vld [vmem:[%s14186_s5 + $0x58] sm:$0xff]  ;;  %s425_s16 = scalar_select %p424_p13, %s10544_s13, 1  ;;  %vm1496_vm1 = vsmask.f32 7424 }
  0x63   : > { %v1049_v12 = vld [vmem:[%s14186_s5 + $0x50] sm:$0xff]  ;;  %v9931_v13 = vld [vmem:[%s14182_s1 + $0x80] sm:$0xff]   ;;  %v1052_v15 = vld [vmem:[%s14186_s5 + $0x68] sm:$0xff]  ;;  %vm2713_vm2 = vsmask.f32 3328  ;;  %vm1454_vm3 = vcmask 1043456  }
  0x64   : > { %1110 = vperm.xlu1 %9930, %v1042_v3   ;;  %1100 = vperm.xlu0 %9929, %v1040_v4   ;;  %v9932_v14 = vld [vmem:[%s14182_s1 + $0x40] sm:$0xff]   ;;  %v9933_v17 = vld [vmem:[%s14182_s1 + $0x88] sm:$0xff]   ;;  %v9935_v19 = vld [vmem:[%s14182_s1 + $0x90] sm:$0xff]   ;;  %s10804_s14 = scalar_lea.vmem %s14184_s3, %s425_s16  ;;  %s10828_s15 = scalar_lea.vmem %s14185_s4, %s425_s16  ;;  %vm3062_vm4 = vcmask 1042432   ;;  %vm1448_vm5 = vcmask 1040384  }
  0x65   : > { %v1051_v16 = vld [vmem:[%s14186_s5 + $0x60] sm:$0xff]  ;;  %8886 = vmatprep.subr.bf16.mxu0 %v9931_v13  ;;  %8790 = vmatprep.subr.bf16.mxu1 %v9932_v14  ;;  %v9934_v18 = vld [vmem:[%s14182_s1 + $0x48] sm:$0xff]   ;;  %v1054_v20 = vld [vmem:[%s14186_s5 + $0x78] sm:$0xff]  ;;  %vm1449_vm6 = vsmask.f32 256  ;;  %s7629_s26 = sshll.u32 %s10677_s25, 1 }
  0x66   : > { %8887 = vmatpush3.bf16.msra.mxu0 %v9931_v13  ;;  %8791 = vmatpush3.bf16.msra.mxu1 %v9932_v14  ;;  %v1053_v21 = vld [vmem:[%s14186_s5 + $0x70] sm:$0xff]  ;;  %v9937_v23 = vld [vmem:[%s14182_s1 + $0x98] sm:$0xff]   ;;  %v1056_v24 = vld [vmem:[%s14186_s5 + $0x88] sm:$0xff]  ;;  %vm1455_vm8 = vsmask.f32 7938  ;;  %s7464_s17 = sshll.u32 %s10694_s23, 4  ;;  %s14094_s17 = int_to_ptr.vmem [resolvable:$true] %s7464_s17 }
  0x67   : > { %8888 = vmatprep.subr.bf16.mxu0 %v9933_v17  ;;  %8792 = vmatprep.subr.bf16.mxu1 %v9934_v18  ;;  %v9936_v22 = vld [vmem:[%s14182_s1 + $0x50] sm:$0xff]   ;;  %v1055_v25 = vld [vmem:[%s14186_s5 + $0x80] sm:$0xff]  ;;  %v9938_v26 = vld [vmem:[%s14182_s1 + $0x58] sm:$0xff]   ;;  %vm4853_vm10 = vsmask.f32 4368  ;;  %s14101_s16 = scalar_lea.vmem [#allocation8], %s7629_s26 }
  0x68   : > { %1120 = vperm.xlu1 %9930, %v1044_v5   ;;  %1115 = vperm.xlu0 %9929, %v1043_v6   ;;  %v9939_v27 = vld [vmem:[%s14182_s1 + $0xa0] sm:$0xff]   ;;  %v1058_v28 = vld [vmem:[%s14186_s5 + $0x98] sm:$0xff]  ;;  %v1057_v29 = vld [vmem:[%s14186_s5 + $0x90] sm:$0xff]  ;;  %s7480_s27 = sshll.u32 %s14101_s16, 4  ;;  %s7446_s0 = scalar_lea.sflag [#allocation4], %s10677_s25  ;;  %s14138_s27 = int_to_ptr.vmem [resolvable:$true] %s7480_s27 }
  0x69   : > { %v9940_v30 = vld [vmem:[%s14182_s1 + $0x60] sm:$0xff]   ;;  %v9941_v32 = vld [vmem:[%s14182_s1 + $0xa8] sm:$0xff]   ;;  %v1062_v38 = vld [vmem:[%s14186_s5 + $0xb8] sm:$0xff]  ;;  %p14625_p12 = scmp.ne.s32.totalorder %s14292_s20, 0  ;;  %s10469_s24 = smov [#allocation7]  }
  0x6a   : > { %8889 = vmatpush3.bf16.msra.mxu0 %v9933_v17  ;;  %8793 = vmatpush3.bf16.msra.mxu1 %v9934_v18  ;;  %v8382_v31 = vld [vmem:[%s10681_s28 + $0x8] sm:$0xff]   ;;  %v8187_v35 = vld [vmem:[%s10681_s28] sm:$0xff]   ;;  %v9943_v40 = vld [vmem:[%s14182_s1 + $0xb0] sm:$0xff]   ;;  %s10364_s18 = sshll.u32 %s10469_s24, 4  ;;  %s10365_s18 = int_to_ptr.vmem [resolvable:$false] %s10364_s18 }
  0x6b   : > { %8890 = vmatprep.subr.bf16.mxu0 %v9935_v19  ;;  %8794 = vmatprep.subr.bf16.mxu1 %v9936_v22  ;;  %v1060_v33 = vld [vmem:[%s14186_s5 + $0xa8] sm:$0xff]  ;;  %v1059_v34 = vld [vmem:[%s14186_s5 + $0xa0] sm:$0xff]  ;;  %v8192_v37 = vunpack.c.l.bf16 %v8382_v31  ;;  %v1061_v41 = vld [vmem:[%s14186_s5 + $0xb0] sm:$0xff]  ;;  %v8188_v42 = vunpack.c.l.bf16 %v8187_v35  ;;  %v8193_v46 = vunpack.c.h.bf16 %v8382_v31  ;;  %v8189_v48 = vunpack.c.h.bf16 %v8187_v35  ;;  %s10366_s29 = scalar_lea.vmem %s10365_s18, 6912  ;;  %p10367_p7 = scmp.lt.s32.totalorder %s14094_s17, %s10365_s18 }
  0x6c   : > { %1130 = vperm.xlu1 %9930, %v1046_v7   ;;  %1125 = vperm.xlu0 %9929, %v1045_v8   ;;  %v9942_v36 = vld [vmem:[%s14182_s1 + $0x68] sm:$0xff]   ;;  %v10817_v39 = vld [vmem:[%s10804_s14] ss:$0 sm:$0xff]  ;;  %v9944_v44 = vld [vmem:[%s14182_s1 + $0x70] sm:$0xff]  }
  0x6d   : > { %v8383_v43 = vld [vmem:[%s10681_s28 + $0x10] sm:$0xff]   ;;  %v548_v45 = vmul.f32 %v8192_v37, %v10817_v39  ;;  %v10836_v47 = vld [vmem:[%s10828_s15] ss:$0 sm:$0xff]  ;;  %v9945_v49 = vld [vmem:[%s14182_s1 + $0xb8] sm:$0xff]   ;;  %v546_v52 = vmul.f32 %v8188_v42, %v10817_v39  ;;  %v549_v56 = vmul.f32 %v8193_v46, %v10817_v39  ;;  %v547_v57 = vmul.f32 %v8189_v48, %v10817_v39 }
  0x6e   : > { %8891 = vmatpush3.bf16.msra.mxu0 %v9935_v19  ;;  %8795 = vmatpush3.bf16.msra.mxu1 %v9936_v22  ;;  %v1064_v50 = vld [vmem:[%s14186_s5 + $0xc8] sm:$0xff]  ;;  %v1063_v51 = vld [vmem:[%s14186_s5 + $0xc0] sm:$0xff]  ;;  %v8197_v53 = vunpack.c.h.bf16 %v8383_v43  ;;  %v9946_v54 = vld [vmem:[%s14182_s1 + $0x78] sm:$0xff]   ;;  %v8196_v0 = vunpack.c.l.bf16 %v8383_v43 }
  0x6f   : > { %8892 = vmatprep.subr.bf16.mxu0 %v9937_v23  ;;  %8796 = vmatprep.subr.bf16.mxu1 %v9938_v26  ;;  %v10852_v55 = vadd.f32 %v10836_v47, %v548_v45  ;;  %v9947_v58 = vld [vmem:[%s14182_s1 + $0xc0] sm:$0xff]   ;;  %v10860_v59 = vadd.f32 %v10836_v47, %v546_v52  ;;  %v8384_v61 = vld [vmem:[%s10681_s28 + $0x18] sm:$0xff]   ;;  %v10872_v2 = vadd.f32 %v10836_v47, %v549_v56  ;;  %v1068_v6 = vld [vmem:[%s14186_s5 + $0xe8] sm:$0xff] }
  0x70   : > { %1140 = vperm.xlu1 %9930, %v1048_v9   ;;  %1135 = vperm.xlu0 %9929, %v1047_v10   ;;  %v551_v60 = vmul.f32 %v8197_v53, %v10817_v39  ;;  %v1066_v62 = vld [vmem:[%s14186_s5 + $0xd8] sm:$0xff]  ;;  %v1065_v63 = vld [vmem:[%s14186_s5 + $0xd0] sm:$0xff]  ;;  %v10875_v3 = vadd.f32 %v10836_v47, %v547_v57  ;;  %v8201_v4 = vunpack.c.h.bf16 %v8384_v61  ;;  %v8200_v5 = vunpack.c.l.bf16 %v8384_v61  ;;  %v1067_v7 = vld [vmem:[%s14186_s5 + $0xe0] sm:$0xff] }
  0x71   : > { %v7634_v1 = vmul.f32 -1.442695, %v10852_v55  ;;  %v7632_v8 = vmul.f32 -1.442695, %v10860_v59  ;;  %v550_v10 = vmul.f32 %v8196_v0, %v10817_v39  ;;  %v1070_v19 = vld [vmem:[%s14186_s5 + $0xf8] sm:$0xff]  ;;  %v1073_v43 = vld [vmem:[%s14186_s5 + $0x110] sm:$0xff]  ;;  %vm13113_vm7 = vmand %vm1448_vm5, %vm1449_vm6 }
  0x72   : > { %8893 = vmatpush3.bf16.msra.mxu0 %v9937_v23  ;;  %8797 = vmatpush3.bf16.msra.mxu1 %v9938_v26  ;;  %v10885_v9 = vadd.f32 %v10836_v47, %v551_v60  ;;  %v7633_v13 = vmul.f32 -1.442695, %v10875_v3  ;;  %v553_v14 = vmul.f32 %v8201_v4, %v10817_v39  ;;  %v1074_v42 = vld [vmem:[%s14186_s5 + $0x118] sm:$0xff]  ;;  %v1075_v60 = vld [vmem:[%s14186_s5 + $0x120] sm:$0xff]  ;;  %vm13121_vm9 = vmand %vm1454_vm3, %vm1455_vm8 }
  0x73   : > { %8894 = vmatprep.subr.bf16.mxu0 %v9939_v27  ;;  %8798 = vmatprep.subr.bf16.mxu1 %v9940_v30  ;;  %10075 = vpow2.f32 %v7634_v1  ;;  %v8389_v52 = vld [vmem:[%s10681_s28 + $0x40] sm:$0xff]   ;;  %v8390_v0 = vld [vmem:[%s10681_s28 + $0x48] sm:$0xff]   ;;  %vm13404_vm11 = vmor %vm1449_vm6, %vm4853_vm10 }
  0x74   : > { %1150 = vperm.xlu1 %9930, %v1050_v11   ;;  %1145 = vperm.xlu0 %9929, %v1049_v12   ;;  %v8385_v11 = vld [vmem:[%s10681_s28 + $0x20] sm:$0xff]   ;;  %v7635_v12 = vmul.f32 -1.442695, %v10872_v2  ;;  %10077 = vpow2.f32 %v7632_v8  ;;  %v7637_v17 = vmul.f32 -1.442695, %v10885_v9 }
  0x75   : > { %v8205_v18 = vunpack.c.h.bf16 %v8385_v11  ;;  %v8204_v22 = vunpack.c.l.bf16 %v8385_v11  ;;  %v8220_v11 = vunpack.c.l.bf16 %v8389_v52 }
  0x76   : > { %8895 = vmatpush3.bf16.msra.mxu0 %v9939_v27  ;;  %8799 = vmatpush3.bf16.msra.mxu1 %v9940_v30  ;;  %10079 = vpow2.f32 %v7635_v12  ;;  %v1072_v27 = vld [vmem:[%s14186_s5 + $0x108] sm:$0xff]  ;;  %v1077_v12 = vld [vmem:[%s14186_s5 + $0x130] sm:$0xff] }
  0x77   : > { %8896 = vmatprep.subr.bf16.mxu0 %v9941_v32  ;;  %8800 = vmatprep.subr.bf16.mxu1 %v9942_v36  ;;  %10081 = vpow2.f32 %v7633_v13  ;;  %v554_v31 = vmul.f32 %v8204_v22, %v10817_v39  ;;  %v8224_v22 = vunpack.c.l.bf16 %v8390_v0 }
  0x78   : > { %1160 = vperm.xlu1 %9930, %v1052_v15   ;;  %1155 = vperm.xlu0 %9929, %v1051_v16   ;;  %v552_v15 = vmul.f32 %v8200_v5, %v10817_v39  ;;  %v8386_v16 = vld [vmem:[%s10681_s28 + $0x28] sm:$0xff]   ;;  %10083 = vpow2.f32 %v7637_v17 }
  0x79   : > { %v8209_v23 = vunpack.c.h.bf16 %v8386_v16 }
  0x7a   : > { %8897 = vmatpush3.bf16.msra.mxu0 %v9941_v32  ;;  %8801 = vmatpush3.bf16.msra.mxu1 %v9942_v36  ;;  %v10911_v26 = vadd.f32 %v10836_v47, %v552_v15  ;;  %v8387_v32 = vld [vmem:[%s10681_s28 + $0x30] sm:$0xff]   ;;  %v8208_v36 = vunpack.c.l.bf16 %v8386_v16  ;;  %v8225_v15 = vunpack.c.h.bf16 %v8390_v0 }
  0x7b   : > { %8898 = vmatprep.subr.bf16.mxu0 %v9943_v40  ;;  %8802 = vmatprep.subr.bf16.mxu1 %v9944_v44  ;;  %v8212_v45 = vunpack.c.l.bf16 %v8387_v32 }
  0x7c   : > { %1170 = vperm.xlu1 %9930, %v1054_v20   ;;  %1165 = vperm.xlu0 %9929, %v1053_v21   ;;  %v1069_v20 = vld [vmem:[%s14186_s5 + $0xf0] sm:$0xff]  ;;  %v10902_v21 = vadd.f32 %v10836_v47, %v550_v10  ;;  %v7638_v35 = vmul.f32 -1.442695, %v10911_v26 }
  0x7d   : > { %v10076_v37 = vpop.eup %10075 }
  0x7e   : > { %8899 = vmatpush3.bf16.msra.mxu0 %v9943_v40  ;;  %8803 = vmatpush3.bf16.msra.mxu1 %v9944_v44  ;;  %v7636_v30 = vmul.f32 -1.442695, %v10902_v21  ;;  %v8213_v40 = vunpack.c.h.bf16 %v8387_v32  ;;  %v10937_v44 = vadd.f32 %v10836_v47, %v554_v31  ;;  %v10078_v46 = vpop.eup %10077  ;;  %v1079_v31 = vld [vmem:[%s14186_s5 + $0x140] sm:$0xff] }
  0x7f   : > { %8900 = vmatprep.subr.bf16.mxu0 %v9945_v49  ;;  %8804 = vmatprep.subr.bf16.mxu1 %v9946_v54  ;;  %v823_v61 = vadd.f32 1.0, %v10078_v46 }
  0x80   : > { %1180 = vperm.xlu1 %9930, %v1056_v24   ;;  %1175 = vperm.xlu0 %9929, %v1055_v25   ;;  %v9952_v24 = vld [vmem:[%s14182_s1] sm:$0xff]   ;;  %v10908_v25 = vadd.f32 %v10836_v47, %v553_v14  ;;  %10085 = vpow2.f32 %v7636_v30  ;;  %v10080_v53 = vpop.eup %10079  ;;  %v559_v56 = vmul.f32 %v8213_v40, %v10817_v39  ;;  %v1080_v30 = vld [vmem:[%s14186_s5 + $0x148] sm:$0xff] }
  0x81   : > { %v10082_v57 = vpop.eup %10081  ;;  %v826_v13 = vadd.f32 1.0, %v10080_v53 }
  0x82   : > { %8901 = vmatpush3.bf16.msra.mxu0 %v9945_v49  ;;  %8805 = vmatpush3.bf16.msra.mxu1 %v9946_v54  ;;  %v825_v49 = vadd.f32 1.0, %v10076_v37  ;;  %v10084_v1 = vpop.eup %10083  ;;  %v10967_v14 = vadd.f32 %v10836_v47, %v559_v56  ;;  %v824_v16 = vadd.f32 1.0, %v10082_v57  ;;  %v1081_v57 = vld [vmem:[%s14186_s5 + $0x150] sm:$0xff] }
  0x83   : > { %8934 = vmatprep.subr.bf16.mxu0 %v9947_v58  ;;  %8838 = vmatprep.subr.bf16.mxu1 %v9952_v24  ;;  %v1076_v58 = vld [vmem:[%s14186_s5 + $0x128] sm:$0xff]  ;;  %v828_v17 = vadd.f32 1.0, %v10084_v1 }
  0x84   : > { %1190 = vperm.xlu1 %9930, %v1058_v28   ;;  %1185 = vperm.xlu0 %9929, %v1057_v29   ;;  %v555_v28 = vmul.f32 %v8205_v18, %v10817_v39  ;;  %v1071_v29 = vld [vmem:[%s14186_s5 + $0x100] sm:$0xff]  ;;  %v7645_v32 = vmul.f32 -1.442695, %v10967_v14 }
  0x88   : > { %1200 = vperm.xlu1 %9930, %v1060_v33   ;;  %1195 = vperm.xlu0 %9929, %v1059_v34   ;;  %v557_v33 = vmul.f32 %v8209_v23, %v10817_v39  ;;  %v7639_v34 = vmul.f32 -1.442695, %v10908_v25  ;;  %v8391_v23 = vld [vmem:[%s10681_s28 + $0x50] sm:$0xff]  }
  0x89   : > { %v8229_v37 = vunpack.c.h.bf16 %v8391_v23  ;;  %v8228_v53 = vunpack.c.l.bf16 %v8391_v23 }
  0x8a   : > { %v10940_v48 = vadd.f32 %v10836_v47, %v557_v33  ;;  %10087 = vpow2.f32 %v7639_v34  ;;  %v565_v33 = vmul.f32 %v8225_v15, %v10817_v39  ;;  %v8392_v34 = vld [vmem:[%s10681_s28 + $0x58] sm:$0xff]  }
  0x8b   : > { %10089 = vpow2.f32 %v7638_v35 }
  0x8c   : > { %1210 = vperm.xlu1 %9930, %v1062_v38   ;;  %1205 = vperm.xlu0 %9929, %v1061_v41   ;;  %v10927_v38 = vadd.f32 %v10836_v47, %v555_v28  ;;  %v8388_v41 = vld [vmem:[%s10681_s28 + $0x38] sm:$0xff]   ;;  %v7643_v4 = vmul.f32 -1.442695, %v10940_v48  ;;  %10091 = vrcp.f32 %v825_v49  ;;  %v562_v28 = vmul.f32 %v8220_v11, %v10817_v39 }
  0x8d   : > { %v8216_v5 = vunpack.c.l.bf16 %v8388_v41 }
  0x8e   : > { %v7641_v54 = vmul.f32 -1.442695, %v10927_v38  ;;  %v10999_v49 = vadd.f32 %v10836_v47, %v562_v28  ;;  %v1086_v28 = vld [vmem:[%s14186_s5 + $0x178] sm:$0xff] }
  0x90   : > { %1220 = vperm.xlu1 %9930, %v1064_v50   ;;  %1215 = vperm.xlu0 %9929, %v1063_v51   ;;  %v556_v50 = vmul.f32 %v8208_v36, %v10817_v39  ;;  %v8217_v51 = vunpack.c.h.bf16 %v8388_v41  ;;  %10093 = vpow2.f32 %v7641_v54  ;;  %v8233_v54 = vunpack.c.h.bf16 %v8392_v34 }
  0x92   : > { %v10960_v8 = vadd.f32 %v10836_v47, %v556_v50  ;;  %v561_v10 = vmul.f32 %v8217_v51, %v10817_v39  ;;  %v1082_v50 = vld [vmem:[%s14186_s5 + $0x158] sm:$0xff] }
  0x94   : > { %1230 = vperm.xlu1 %9930, %v1066_v62   ;;  %1225 = vperm.xlu0 %9929, %v1065_v63   ;;  %v7640_v62 = vmul.f32 -1.442695, %v10937_v44  ;;  %v558_v63 = vmul.f32 %v8212_v45, %v10817_v39  ;;  %v7642_v24 = vmul.f32 -1.442695, %v10960_v8 }
  0x96   : > { %10095 = vpow2.f32 %v7640_v62  ;;  %v10970_v18 = vadd.f32 %v10836_v47, %v558_v63 }
  0x97   : > { %10097 = vpow2.f32 %v7643_v4 }
  0x98   : > { %1240 = vperm.xlu1 %9930, %v1068_v6   ;;  %1235 = vperm.xlu0 %9929, %v1067_v7   ;;  %v8221_v6 = vunpack.c.h.bf16 %v8389_v52  ;;  %v1078_v7 = vld [vmem:[%s14186_s5 + $0x138] sm:$0xff]  ;;  %10099 = vrcp.f32 %v823_v61  ;;  %v7644_v36 = vmul.f32 -1.442695, %v10970_v18  ;;  %v11005_v52 = vadd.f32 %v10836_v47, %v565_v33 }
  0x99   : > { %10101 = vrcp.f32 %v826_v13  ;;  %v8232_v61 = vunpack.c.l.bf16 %v8392_v34  ;;  %v569_v13 = vmul.f32 %v8233_v54, %v10817_v39 }
  0x9a   : > { %10103 = vrcp.f32 %v824_v16  ;;  %v7651_v11 = vmul.f32 -1.442695, %v11005_v52 }
  0x9b   : > { %10105 = vrcp.f32 %v828_v17  ;;  %v11052_v34 = vadd.f32 %v10836_v47, %v569_v13 }
  0x9c   : > { %1250 = vperm.xlu1 %9930, %v1070_v19   ;;  %1245 = vperm.xlu0 %9929, %v1069_v20   ;;  %v560_v19 = vmul.f32 %v8216_v5, %v10817_v39  ;;  %v563_v20 = vmul.f32 %v8221_v6, %v10817_v39  ;;  %10107 = vpow2.f32 %v7642_v24  ;;  %v7648_v5 = vmul.f32 -1.442695, %v10999_v49 }
  0x9d   : > { %10109 = vpow2.f32 %v7645_v32 }
  0x9e   : > { %v10991_v41 = vadd.f32 %v10836_v47, %v560_v19  ;;  %10111 = vpow2.f32 %v7644_v36  ;;  %v568_v19 = vmul.f32 %v8232_v61, %v10817_v39  ;;  %v8394_v36 = vld [vmem:[%s10681_s28 + $0x68] sm:$0xff]   ;;  %v8395_v61 = vld [vmem:[%s10681_s28 + $0x70] sm:$0xff]  }
  0xa0   : > { %1260 = vperm.xlu1 %9930, %v1072_v27   ;;  %1255 = vperm.xlu0 %9929, %v1071_v29   ;;  %v10977_v27 = vadd.f32 %v10836_v47, %v561_v10  ;;  %v10086_v29 = vpop.eup %10085  ;;  %v7646_v63 = vmul.f32 -1.442695, %v10991_v41  ;;  %v1083_v10 = vld [vmem:[%s14186_s5 + $0x160] sm:$0xff] }
  0xa1   : > { %v10088_v35 = vpop.eup %10087  ;;  %v827_v45 = vadd.f32 1.0, %v10086_v29  ;;  %v1085_v29 = vld [vmem:[%s14186_s5 + $0x170] sm:$0xff] }
  0xa2   : > { %v10090_v40 = vpop.eup %10089  ;;  %v7647_v46 = vmul.f32 -1.442695, %v10977_v27  ;;  %v830_v51 = vadd.f32 1.0, %v10088_v35 }
  0xa3   : > { %v11007_v56 = vpop.eup %10091  ;;  %10113 = vrcp.f32 %v827_v45 }
  0xa4   : > { %1270 = vperm.xlu1 %9930, %v1074_v42   ;;  %1265 = vperm.xlu0 %9929, %v1073_v43   ;;  %v10994_v42 = vadd.f32 %v10836_v47, %v563_v20  ;;  %v564_v43 = vmul.f32 %v8224_v22, %v10817_v39  ;;  %v10094_v62 = vpop.eup %10093  ;;  %10115 = vpow2.f32 %v7647_v46  ;;  %v8393_v20 = vld [vmem:[%s10681_s28 + $0x60] sm:$0xff]  }
  0xa5   : > { %v10096_v4 = vpop.eup %10095  ;;  %10117 = vrcp.f32 %v830_v51  ;;  %v832_v16 = vadd.f32 1.0, %v10094_v62  ;;  %v8237_v35 = vunpack.c.h.bf16 %v8393_v20  ;;  %v8236_v45 = vunpack.c.l.bf16 %v8393_v20  ;;  %v1087_v51 = vld [vmem:[%s14186_s5 + $0x180] sm:$0xff]  ;;  %v1090_v20 = vld [vmem:[%s14186_s5 + $0x198] sm:$0xff] }
  0xa6   : > { %v7649_v0 = vmul.f32 -1.442695, %v10994_v42  ;;  %v11016_v1 = vadd.f32 %v10836_v47, %v564_v43  ;;  %v10098_v6 = vpop.eup %10097  ;;  %v11057_v43 = vadd.f32 %v10836_v47, %v568_v19 }
  0xa7   : > { %v11028_v15 = vpop.eup %10099 }
  0xa8   : > { %1280 = vperm.xlu1 %9930, %v1076_v58   ;;  %1275 = vperm.xlu0 %9929, %v1075_v60   ;;  %v829_v58 = vadd.f32 1.0, %v10090_v40  ;;  %v567_v60 = vmul.f32 %v8229_v37, %v10817_v39  ;;  %v11035_v22 = vpop.eup %10101  ;;  %v7650_v23 = vmul.f32 -1.442695, %v11016_v1 }
  0xa9   : > { %v11038_v24 = vpop.eup %10103 }
  0xaa   : > { %v11031_v17 = vadd.f32 %v10836_v47, %v567_v60  ;;  %10119 = vrcp.f32 %v829_v58  ;;  %v11046_v32 = vpop.eup %10105  ;;  %v7655_v58 = vmul.f32 -1.442695, %v11052_v34  ;;  %v571_v60 = vmul.f32 %v8237_v35, %v10817_v39 }
  0xab   : > { %10121 = vpow2.f32 %v7646_v63  ;;  %v10108_v37 = vpop.eup %10107  ;;  %v7654_v63 = vmul.f32 -1.442695, %v11057_v43 }
  0xac   : > { %1290 = vperm.xlu1 %9930, %v1078_v7   ;;  %1285 = vperm.xlu0 %9929, %v1077_v12   ;;  %v1084_v7 = vld [vmem:[%s14186_s5 + $0x168] sm:$0xff]  ;;  %v566_v12 = vmul.f32 %v8228_v53, %v10817_v39  ;;  %10123 = vpow2.f32 %v7649_v0  ;;  %v7653_v40 = vmul.f32 -1.442695, %v11031_v17  ;;  %v10110_v46 = vpop.eup %10109  ;;  %v833_v54 = vadd.f32 1.0, %v10108_v37 }
  0xad   : > { %10125 = vrcp.f32 %v832_v16  ;;  %v10112_v53 = vpop.eup %10111  ;;  %v8241_v0 = vunpack.c.h.bf16 %v8394_v36  ;;  %v11078_v13 = vadd.f32 %v10836_v47, %v571_v60  ;;  %v8245_v16 = vunpack.c.h.bf16 %v8395_v61 }
  0xae   : > { %v11049_v33 = vadd.f32 %v10836_v47, %v566_v12  ;;  %10127 = vpow2.f32 %v7648_v5  ;;  %v11069_v62 = vpop.eup %10113  ;;  %v836_v5 = vadd.f32 1.0, %v10110_v46 }
  0xaf   : > { %10129 = vpow2.f32 %v7651_v11  ;;  %v8240_v11 = vunpack.c.l.bf16 %v8394_v36 }
  0xb0   : > { %1300 = vperm.xlu1 %9930, %v1080_v30   ;;  %1295 = vperm.xlu0 %9929, %v1079_v31   ;;  %v831_v30 = vadd.f32 1.0, %v10096_v4  ;;  %v834_v31 = vadd.f32 1.0, %v10098_v6  ;;  %v10116_v4 = vpop.eup %10115  ;;  %v570_v6 = vmul.f32 %v8236_v45, %v10817_v39 }
  0xb1   : > { %v572_v37 = vmul.f32 %v8240_v11, %v10817_v39  ;;  %v4425_v11 = vld [vmem:[%s14188_s7] sm:$0xff] }
  0xb2   : > { %10131 = vrcp.f32 %v831_v30  ;;  %v8244_v30 = vunpack.c.l.bf16 %v8395_v61  ;;  %v11088_v35 = vadd.f32 %v10836_v47, %v570_v6 }
  0xb3   : > { %10133 = vrcp.f32 %v834_v31 }
  0xb4   : > { %1310 = vperm.xlu1 %9930, %v1082_v50   ;;  %1305 = vperm.xlu0 %9929, %v1081_v57   ;;  %v1088_v50 = vld [vmem:[%s14186_s5 + $0x188] sm:$0xff]  ;;  %v7652_v57 = vmul.f32 -1.442695, %v11049_v33  ;;  %10135 = vpow2.f32 %v7650_v23  ;;  %v838_v23 = vadd.f32 1.0, %v10116_v4  ;;  %v11112_v4 = vmul.f32 %v11028_v15, %v10860_v59 }
  0xb5   : > { %10137 = vrcp.f32 %v833_v54 }
  0xb6   : > { %10139 = vpow2.f32 %v7653_v40  ;;  %v1092_v40 = vld [vmem:[%s14186_s5 + $0x1a8] sm:$0xff] }
  0xb7   : > { %10141 = vrcp.f32 %v836_v5  ;;  %v7656_v5 = vmul.f32 -1.442695, %v11088_v35 }
  0xb8   : > { %1320 = vperm.xlu1 %9930, %v1084_v7   ;;  %1315 = vperm.xlu0 %9929, %v1083_v10   ;;  %v11073_v7 = vpop.eup %10117  ;;  %v835_v10 = vadd.f32 1.0, %v10112_v53  ;;  %10143 = vpow2.f32 %v7652_v57  ;;  %v8396_v53 = vld [vmem:[%s10681_s28 + $0x78] sm:$0xff]   ;;  %v1091_v57 = vld [vmem:[%s14186_s5 + $0x1a0] sm:$0xff] }
  0xb9   : > { %v11075_v12 = vpop.eup %10119  ;;  %10145 = vpow2.f32 %v7655_v58  ;;  %v11108_v58 = vmul.f32 %v11007_v56, %v10852_v55  ;;  %v11122_v56 = vadd.f32 %v10836_v47, %v572_v37  ;;  %v8249_v59 = vunpack.c.h.bf16 %v8396_v53 }
  0xba   : > { %v10122_v19 = vpop.eup %10121  ;;  %10147 = vrcp.f32 %v835_v10  ;;  %v4426_v10 = vld [vmem:[%s14188_s7 + $0x8] sm:$0xff]  ;;  %v11149_v37 = vmul.f32 %v11069_v62, %v10902_v21  ;;  %v4427_v21 = vld [vmem:[%s14188_s7 + $0x10] sm:$0xff] }
  0xbb   : > { %v10124_v31 = vpop.eup %10123  ;;  %v837_v46 = vadd.f32 1.0, %v10122_v19  ;;  %10149 = vpow2.f32 %v7654_v63  ;;  %v11126_v63 = vmul.f32 %v11035_v22, %v10872_v2  ;;  %v11145_v22 = vmul.f32 %v11046_v32, %v10885_v9  ;;  %v4428_v9 = vld [vmem:[%s14188_s7 + $0x18] sm:$0xff] }
  0xbc   : > { %1330 = vperm.xlu1 %9930, %v1086_v28   ;;  %1325 = vperm.xlu0 %9929, %v1085_v29   ;;  %v1089_v28 = vld [vmem:[%s14186_s5 + $0x190] sm:$0xff]  ;;  %v573_v29 = vmul.f32 %v8241_v0, %v10817_v39  ;;  %v11090_v36 = vpop.eup %10125  ;;  %v840_v60 = vadd.f32 1.0, %v10124_v31  ;;  %v574_v0 = vmul.f32 %v8244_v30, %v10817_v39  ;;  %10151 = vrcp.f32 %v838_v23  ;;  %v11141_v31 = vld [vmem:[%s10681_s28 + $0x88] sm:$0xff]  }
  0xbd   : > { %v10128_v45 = vpop.eup %10127  ;;  %10153 = vrcp.f32 %v837_v46  ;;  %v11134_v23 = vmul.f32 %v11038_v24, %v10875_v3  ;;  %v8248_v3 = vunpack.c.l.bf16 %v8396_v53  ;;  %v577_v46 = vmul.f32 %v8249_v59, %v10817_v39 }
  0xbe   : > { %v10130_v54 = vpop.eup %10129  ;;  %v11103_v61 = vadd.f32 %v10836_v47, %v573_v29  ;;  %v839_v55 = vadd.f32 1.0, %v10128_v45  ;;  %10155 = vrcp.f32 %v840_v60  ;;  %v11138_v30 = vadd.f32 %v10836_v47, %v574_v0 }
  0xbf   : > { %v10132_v6 = vpop.eup %10131  ;;  %v11153_v45 = vmul.f32 %v11073_v7, %v10908_v25  ;;  %v11171_v60 = vmul.f32 %v11090_v36, %v10927_v38  ;;  %v576_v0 = vmul.f32 %v8248_v3, %v10817_v39  ;;  %v11185_v36 = vadd.f32 %v10836_v47, %v577_v46 }
  0xc0   : > { %1340 = vperm.xlu1 %9930, %v1088_v50   ;;  %1335 = vperm.xlu0 %9929, %v1087_v51   ;;  %v7657_v50 = vmul.f32 -1.442695, %v11078_v13  ;;  %v575_v51 = vmul.f32 %v8245_v16, %v10817_v39  ;;  %v10134_v15 = vpop.eup %10133  ;;  %v842_v16 = vadd.f32 1.0, %v10130_v54  ;;  %v7659_v29 = vmul.f32 -1.442695, %v11103_v61 }
  0xc1   : > { %v7660_v53 = vmul.f32 -1.442695, %v11138_v30  ;;  %14300 = vst [vmem:[#allocation17_spill] sm:$0xff] %v11185_v36  ;;  %v11188_v59 = vmul.f32 %v10134_v15, %v10940_v48  ;;  %v11201_v48 = vadd.f32 %v10836_v47, %v576_v0 }
  0xc2   : > { %v11129_v19 = vadd.f32 %v10836_v47, %v575_v51  ;;  %10157 = vpow2.f32 %v7657_v50  ;;  %v11166_v50 = vmul.f32 %v11075_v12, %v10911_v26  ;;  %v4430_v26 = vld [vmem:[%s14188_s7 + $0x28] sm:$0xff]  ;;  %v4429_v12 = vld [vmem:[%s14188_s7 + $0x20] sm:$0xff] }
  0xc3   : > { %10159 = vrcp.f32 %v839_v55  ;;  %14301 = vst [vmem:[#allocation18_spill] sm:$0xff] %v11201_v48 }
  0xc4   : > { %1350 = vperm.xlu1 %9930, %v1090_v20   ;;  %1345 = vperm.xlu0 %9929, %v1089_v28   ;;  %v8397_v20 = vld [vmem:[%s10681_s28 + $0x80] sm:$0xff]   ;;  %v10136_v28 = vpop.eup %10135  ;;  %10161 = vrcp.f32 %v842_v16  ;;  %v7661_v25 = vmul.f32 -1.442695, %v11129_v19 }
  0xc5   : > { %v10138_v2 = vpop.eup %10137  ;;  %v841_v32 = vadd.f32 1.0, %v10136_v28  ;;  %v8253_v62 = vunpack.c.h.bf16 %v8397_v20  ;;  %10163 = vpow2.f32 %v7656_v5  ;;  %v8252_v54 = vunpack.c.l.bf16 %v8397_v20  ;;  %v8399_v28 = vld [vmem:[%s10681_s28 + $0x90] sm:$0xff]  }
  0xc6   : > { %v10140_v24 = vpop.eup %10139  ;;  %10165 = vpow2.f32 %v7659_v29  ;;  %v11182_v5 = vmul.f32 %v10132_v6, %v10937_v44  ;;  %v11193_v44 = vmul.f32 %v10138_v2, %v10960_v8  ;;  %v7663_v8 = vmul.f32 -1.442695, %v11185_v36 }
  0xc7   : > { %v10142_v51 = vpop.eup %10141  ;;  %v844_v38 = vadd.f32 1.0, %v10140_v24  ;;  %v579_v20 = vmul.f32 %v8253_v62, %v10817_v39  ;;  %v578_v3 = vmul.f32 %v8252_v54, %v10817_v39  ;;  %v8400_v24 = vld [vmem:[%s10681_s28 + $0x98] sm:$0xff]   ;;  %v8256_v2 = vunpack.c.l.bf16 %v11141_v31 }
  0xc8   : > { %1360 = vperm.xlu1 %9930, %v1092_v40   ;;  %1355 = vperm.xlu0 %9929, %v1091_v57   ;;  %v7658_v40 = vmul.f32 -1.442695, %v11122_v56  ;;  %v10144_v7 = vpop.eup %10143  ;;  %v11198_v46 = vmul.f32 %v10142_v51, %v10967_v14  ;;  %v4432_v14 = vld [vmem:[%s14188_s7 + $0x38] sm:$0xff]  ;;  %v4431_v51 = vld [vmem:[%s14188_s7 + $0x30] sm:$0xff]  ;;  %v8261_v62 = vunpack.c.h.bf16 %v8399_v28  ;;  %v8260_v54 = vunpack.c.l.bf16 %v8399_v28 }
  0xc9   : > { %v10146_v57 = vpop.eup %10145  ;;  %v843_v16 = vadd.f32 1.0, %v10144_v7 }
  0xca   : > { %10167 = vpow2.f32 %v7658_v40  ;;  %v846_v6 = vadd.f32 1.0, %v10146_v57  ;;  %v8265_v57 = vunpack.c.h.bf16 %v8400_v24 }
  0xcb   : > { %10169 = vrcp.f32 %v841_v32 }
  0xcc   : > { %4464 = vperm.xlu1 %9930, %v4426_v10   ;;  %4459 = vperm.xlu0 %9929, %v4425_v11   ;;  %v8257_v10 = vunpack.c.h.bf16 %v11141_v31  ;;  %v10148_v11 = vpop.eup %10147  ;;  %10171 = vpow2.f32 %v7661_v25  ;;  %v11216_v25 = vadd.f32 %v10836_v47, %v579_v20  ;;  %v8401_v20 = vld [vmem:[%s10681_s28 + $0xa0] sm:$0xff]  }
  0xcd   : > { %v10150_v55 = vpop.eup %10149  ;;  %10173 = vpow2.f32 %v7660_v53  ;;  %v11222_v53 = vadd.f32 %v10836_v47, %v578_v3 }
  0xce   : > { %v10152_v29 = vpop.eup %10151  ;;  %v581_v15 = vmul.f32 %v8257_v10, %v10817_v39  ;;  %10175 = vrcp.f32 %v844_v38  ;;  %v11213_v39 = vmul.f32 %v10148_v11, %v10970_v18  ;;  %14302 = vst [vmem:[#allocation19_spill] sm:$0xff] %v11216_v25  ;;  %v7662_v18 = vmul.f32 -1.442695, %v11201_v48 }
  0xcf   : > { %v10154_v40 = vpop.eup %10153  ;;  %10177 = vrcp.f32 %v843_v16  ;;  %v11219_v7 = vmul.f32 %v10152_v29, %v10977_v27  ;;  %14303 = vst [vmem:[#allocation20_spill] sm:$0xff] %v11222_v53  ;;  %v8264_v11 = vunpack.c.l.bf16 %v8400_v24  ;;  %v4434_v27 = vld [vmem:[%s14188_s7 + $0x48] sm:$0xff]  ;;  %v11238_v16 = vld [vmem:[%s10804_s14] ss:$0 sm:$0xff] }
  0xd0   : > { %4474 = vperm.xlu1 %9930, %v4428_v9   ;;  %4469 = vperm.xlu0 %9929, %v4427_v21   ;;  %v10156_v9 = vpop.eup %10155  ;;  %v845_v21 = vadd.f32 1.0, %v10150_v55  ;;  %10179 = vrcp.f32 %v846_v6  ;;  %v11226_v10 = vadd.f32 %v10836_v47, %v581_v15  ;;  %v11235_v38 = vmul.f32 %v10154_v40, %v10991_v41 }
  0xd1   : > { %v10158_v32 = vpop.eup %10157  ;;  %v580_v47 = vmul.f32 %v11238_v16, %v8256_v2  ;;  %v11243_v29 = vmul.f32 %v10156_v9, %v10994_v42  ;;  %v7665_v6 = vmul.f32 -1.442695, %v11216_v25  ;;  %v583_v41 = vmul.f32 %v11238_v16, %v8261_v62 }
  0xd2   : > { %v10160_v31 = vpop.eup %10159  ;;  %14304 = vst [vmem:[#allocation21_spill] sm:$0xff] %v11226_v10  ;;  %10181 = vrcp.f32 %v845_v21  ;;  %v848_v55 = vadd.f32 1.0, %v10158_v32  ;;  %v7664_v40 = vmul.f32 -1.442695, %v11222_v53  ;;  %v582_v15 = vmul.f32 %v11238_v16, %v8260_v54 }
  0xd3   : > { %v10162_v0 = vpop.eup %10161  ;;  %10183 = vpow2.f32 %v7663_v8  ;;  %v11248_v24 = vmul.f32 %v10160_v31, %v10999_v49  ;;  %v585_v21 = vmul.f32 %v11238_v16, %v8265_v57  ;;  %v11254_v42 = vmul.f32 -1.442695, %v11226_v10  ;;  %v11264_v31 = vld [vmem:[%s10681_s28 + $0xa8] sm:$0xff]   ;;  %v4436_v57 = vld [vmem:[%s14188_s7 + $0x58] sm:$0xff] }
  0xd4   : > { %4484 = vperm.xlu1 %9930, %v4430_v26   ;;  %4479 = vperm.xlu0 %9929, %v4429_v12   ;;  %v10164_v26 = vpop.eup %10163  ;;  %v4433_v12 = vld [vmem:[%s14188_s7 + $0x40] sm:$0xff]  ;;  %10185 = vpow2.f32 %v7662_v18  ;;  %v584_v9 = vmul.f32 %v11238_v16, %v8264_v11  ;;  %v8269_v8 = vunpack.c.h.bf16 %v8401_v20  ;;  %v8268_v62 = vunpack.c.l.bf16 %v8401_v20  ;;  %v4435_v18 = vld [vmem:[%s14188_s7 + $0x50] sm:$0xff] }
  0xd5   : > { %v10166_v28 = vpop.eup %10165  ;;  %10187 = vrcp.f32 %v848_v55  ;;  %v11276_v20 = vmul.f32 %v10162_v0, %v11005_v52  ;;  %v4438_v52 = vld [vmem:[%s14188_s7 + $0x68] sm:$0xff]  ;;  %v4437_v0 = vld [vmem:[%s14188_s7 + $0x60] sm:$0xff] }
  0xd6   : > { %v10168_v3 = vpop.eup %10167  ;;  %v850_v11 = vadd.f32 1.0, %v10166_v28  ;;  %10189 = vpow2.f32 %v7665_v6  ;;  %v587_v6 = vmul.f32 %v11238_v16, %v8269_v8 }
  0xd7   : > { %v10170_v2 = vpop.eup %10169  ;;  %10191 = vpow2.f32 %v7664_v40 }
  0xd8   : > { %4494 = vperm.xlu1 %9930, %v4432_v14   ;;  %4489 = vperm.xlu0 %9929, %v4431_v51   ;;  %v10172_v32 = vpop.eup %10171  ;;  %v847_v14 = vadd.f32 1.0, %v10164_v26  ;;  %v11258_v51 = vld [vmem:[%s10828_s15] ss:$0 sm:$0xff]  ;;  %v849_v26 = vadd.f32 1.0, %v10168_v3  ;;  %v11298_v8 = vmul.f32 %v10170_v2, %v11016_v1 }
  0xd9   : > { %v11261_v49 = vadd.f32 %v11258_v51, %v580_v47  ;;  %v10174_v54 = vpop.eup %10173  ;;  %v11273_v55 = vadd.f32 %v11258_v51, %v583_v41  ;;  %v852_v53 = vadd.f32 1.0, %v10172_v32  ;;  %v11285_v28 = vadd.f32 %v11258_v51, %v584_v9 }
  0xda   : > { %v10176_v47 = vpop.eup %10175  ;;  %v8273_v41 = vunpack.c.h.bf16 %v11264_v31  ;;  %10193 = vrcp.f32 %v847_v14  ;;  %v851_v40 = vadd.f32 1.0, %v10174_v54 }
  0xdb   : > { %14305 = vst [vmem:[#allocation22_spill] sm:$0xff] %v11261_v49  ;;  %14306 = vst [vmem:[#allocation23_spill] sm:$0xff] %v11273_v55  ;;  %v10178_v10 = vpop.eup %10177  ;;  %v11301_v32 = vmul.f32 %v10176_v47, %v11031_v17  ;;  %10195 = vrcp.f32 %v850_v11  ;;  %v7669_v48 = vmul.f32 -1.442695, %v11273_v55  ;;  %v11314_v1 = vmul.f32 -1.442695, %v11285_v28 }
  0xdc   : > { %4504 = vperm.xlu1 %9930, %v4434_v27   ;;  %4499 = vperm.xlu0 %9929, %v4433_v12   ;;  %v11279_v27 = vadd.f32 %v11258_v51, %v582_v15  ;;  %v11282_v12 = vadd.f32 %v11258_v51, %v585_v21  ;;  %14309 = vst [vmem:[#allocation26_spill] sm:$0xff] %v11285_v28  ;;  %v7666_v15 = vmul.f32 -1.442695, %v11261_v49  ;;  %v10180_v9 = vpop.eup %10179  ;;  %10197 = vrcp.f32 %v849_v26  ;;  %v4440_v11 = vld [vmem:[%s14188_s7 + $0x78] sm:$0xff] }
  0xdd   : > { %v586_v21 = vmul.f32 %v11238_v16, %v8268_v62  ;;  %v10182_v36 = vpop.eup %10181  ;;  %v11305_v14 = vmul.f32 %v10178_v10, %v11049_v33  ;;  %10199 = vrcp.f32 %v852_v53  ;;  %v11317_v17 = vadd.f32 %v11258_v51, %v587_v6  ;;  %v4439_v53 = vld [vmem:[%s14188_s7 + $0x70] sm:$0xff] }
  0xde   : > { %14307 = vst [vmem:[#allocation24_spill] sm:$0xff] %v11279_v27  ;;  %14308 = vst [vmem:[#allocation25_spill] sm:$0xff] %v11282_v12  ;;  %v11308_v54 = vmul.f32 -1.442695, %v11279_v27  ;;  %v11311_v62 = vmul.f32 -1.442695, %v11282_v12  ;;  %v589_v2 = vmul.f32 %v11238_v16, %v8273_v41  ;;  %10201 = vrcp.f32 %v851_v40 }
  0xdf   : > { %v1106_v3 = vpop.permute.xlu1 %1105  ;;  %v1096_v25 = vpop.permute.xlu0 %1095  ;;  %14310 = vst [vmem:[#allocation27_spill] sm:$0xff] %v11317_v17  ;;  %v11328_v26 = vadd.f32 %v11258_v51, %v586_v21  ;;  %v8272_v47 = vunpack.c.l.bf16 %v11264_v31  ;;  %10203 = vpow2.f32 %v11254_v42  ;;  %v11338_v40 = vmul.f32 %v10180_v9, %v11052_v34 }
  0xe0   : > { %4514 = vperm.xlu1 %9930, %v4436_v57   ;;  %4509 = vperm.xlu0 %9929, %v4435_v18   ;;  %v10184_v57 = vpop.eup %10183  ;;  %v1365_v33 = vmul.f32 %v1106_v3, %v11108_v58  ;;  %v1363_v58 = vmul.f32 %v1096_v25, %v11112_v4  ;;  %v11341_v21 = vmul.f32 %v10182_v36, %v11057_v43  ;;  %10205 = vpow2.f32 %v7666_v15  ;;  %v11344_v4 = vld [vmem:[%s10681_s28 + $0xb0] sm:$0xff]  }
  0xe1   : > { %14311 = vst [vmem:[#allocation28_spill] sm:$0xff] %v11328_v26  ;;  %v10186_v6 = vpop.eup %10185  ;;  %v854_v31 = vadd.f32 1.0, %v10184_v57  ;;  %v11354_v42 = vadd.f32 %v11258_v51, %v589_v2  ;;  %10207 = vpow2.f32 %v7669_v48  ;;  %v11357_v36 = vmul.f32 -1.442695, %v11328_v26  ;;  %v4442_v48 = vld [vmem:[%s14188_s7 + $0x88] sm:$0xff] }
  0xe2   : > { %v11335_v27 = vpop.eup %10187  ;;  %v853_v43 = vadd.f32 1.0, %v10186_v6  ;;  %v588_v15 = vmul.f32 %v11238_v16, %v8272_v47  ;;  %v4441_v47 = vld [vmem:[%s14188_s7 + $0x80] sm:$0xff] }
  0xe3   : > { %v1111_v10 = vpop.permute.xlu1 %1110  ;;  %v1101_v18 = vpop.permute.xlu0 %1100  ;;  %14313 = vst [vmem:[#allocation30_spill] sm:$0xff] %v11354_v42  ;;  %10209 = vrcp.f32 %v854_v31 }
  0xe4   : > { %v1366_v41 = vmul.f32 %v1111_v10, %v11126_v63  ;;  %v1364_v3 = vmul.f32 %v1101_v18, %v11134_v23  ;;  %4524 = vperm.xlu1 %9930, %v4438_v52   ;;  %4519 = vperm.xlu0 %9929, %v4437_v0   ;;  %v10190_v63 = vpop.eup %10189  ;;  %v11351_v52 = vmul.f32 -1.442695, %v11317_v17  ;;  %10211 = vrcp.f32 %v853_v43 }
  0xe5   : > { %v10192_v34 = vpop.eup %10191  ;;  %10213 = vpow2.f32 %v11308_v54 }
  0xe6   : > { %v11346_v25 = vpack.c.bf16 %v1366_v41, %v1365_v33  ;;  %v11348_v23 = vpack.c.bf16 %v1364_v3, %v1363_v58  ;;  %v11364_v18 = vpop.eup %10193  ;;  %v11381_v41 = vmul.f32 -1.442695, %v11354_v42  ;;  %v8276_v3 = vunpack.c.l.bf16 %v11344_v4 }
  0xe7   : > { %v1121_v0 = vpop.permute.xlu1 %1120  ;;  %v1116_v9 = vpop.permute.xlu0 %1115 }
  0xe8   : > { %14312 = vst [vmem:[#allocation29_spill] sm:$0xff] %v11346_v25  ;;  %v1368_v57 = vmul.f32 %v1121_v0, %v11145_v22  ;;  %v1367_v33 = vmul.f32 %v1116_v9, %v11149_v37  ;;  %4534 = vperm.xlu1 %9930, %v4440_v11   ;;  %4529 = vperm.xlu0 %9929, %v4439_v53   ;;  %v2098_v10 = vrot.slane %v11348_v23, 1  ;;  %v2099_v2 = vrot.slane %v11346_v25, 1  ;;  %v11375_v53 = vpop.eup %10195 }
  0xe9   : > { %v1500_v22 = vshll.u32 %v11348_v23, 16  ;;  %v8277_v11 = vunpack.c.h.bf16 %v11344_v4  ;;  %v11384_v0 = vpop.eup %10197  ;;  %v1498_v31 = vshrl.u32 %v11348_v23, 16  ;;  %v14315_v17 = vshll.u32 %v11346_v25, 16 }
  0xea   : > { %v11377_v6 = vpack.c.bf16 %v1368_v57, %v1367_v33  ;;  %v2100_v58 = vsel %vm2097_vm0, %v2098_v10, %v2099_v2  ;;  %v11390_v33 = vpop.eup %10199 }
  0xeb   : > { %v1131_v9 = vpop.permute.xlu1 %1130  ;;  %v1126_v26 = vpop.permute.xlu0 %1125  ;;  %8902 = vmatprep.mubr.bf16.mxu0 %v2100_v58  ;;  %v1502_v37 = vrot.slane %v1500_v22, 1  ;;  %v1507_v55 = vrot.slane %v14315_v17, 1  ;;  %v7063_v58 = vld [vmem:[%s14188_s7 + $0x100] sm:$0xff]  ;;  %v4443_v17 = vld [vmem:[%s14188_s7 + $0x90] sm:$0xff] }
  0xec   : > { %14314 = vst [vmem:[#allocation31_spill] sm:$0xff] %v11377_v6  ;;  %v1370_v10 = vmul.f32 %v1131_v9, %v11153_v45  ;;  %v1369_v42 = vmul.f32 %v1126_v26, %v11166_v50  ;;  %4544 = vperm.xlu1 %9930, %v4442_v48   ;;  %4539 = vperm.xlu0 %9929, %v4441_v47   ;;  %v2101_v4 = vrot.slane %v11377_v6, 1  ;;  %v14211_v22 = vshll.u32 %v11377_v6, 16  ;;  %v11402_v57 = vpop.eup %10201 }
  0xed   : > { %v1503_v28 = vor.u32 %v1502_v37, %v1498_v31  ;;  %v856_v45 = vadd.f32 1.0, %v10190_v63  ;;  %v11404_v50 = vadd.f32 1.0, %v10192_v34  ;;  %v11406_v26 = vpop.eup %10203  ;;  %v14317_v9 = vshrl.u32 %v11346_v25, 16  ;;  %v9948_v37 = vld [vmem:[%s14182_s1 + $0xc8] sm:$0xff]  }
  0xee   : > { %v11408_v48 = vpack.c.bf16 %v1370_v10, %v1369_v42  ;;  %v2102_v47 = vsel %vm2097_vm0, %v2099_v2, %v2101_v4  ;;  %v1515_v49 = vrot.slane %v14211_v22, 1  ;;  %v11418_v43 = vpop.eup %10205  ;;  %v11423_v42 = vmul.f32 %v11335_v27, %v11078_v13  ;;  %v10293_v22 = vld [vmem:[%s14182_s1 + $0xc0] sm:$0xff]   ;;  %v4444_v27 = vld [vmem:[%s14188_s7 + $0x98] sm:$0xff] }
  0xef   : > { %v1511_v12 = vor.u32 %v14317_v9, %v1507_v55  ;;  %v1141_v63 = vpop.permute.xlu1 %1140  ;;  %v1136_v34 = vpop.permute.xlu0 %1135  ;;  %v1508_v31 = vsel %vm1496_vm1, %v1503_v28, %v1507_v55  ;;  %8903 = vmatmul.mubr.bf16.vlgmr.msra.gmra.mrb[0].mxu0 %v2102_v47  ;;  %v11427_v2 = vadd.f32 %v11258_v51, %v588_v15  ;;  %v7064_v28 = vld [vmem:[%s14188_s7 + $0x108] sm:$0xff]  ;;  %v9949_v15 = vld [vmem:[%s14182_s1 + $0xd0] sm:$0xff]   ;;  %v590_v47 = vmul.f32 %v11238_v16, %v8276_v3 }
  0xf0   : > { %14316 = vst [vmem:[#allocation32_spill] sm:$0xff] %v11408_v48  ;;  %v1372_v10 = vmul.f32 %v1141_v63, %v11171_v60  ;;  %v1371_v9 = vmul.f32 %v1136_v34, %v11182_v5  ;;  %8806 = vmatprep.mubr.bf16.mxu1 %v1508_v31  ;;  %8935 = vmatpush3.bf16.msra.mxu0 %v10293_v22  ;;  %v2103_v13 = vrot.slane %v11408_v48, 1  ;;  %v9953_v60 = vld [vmem:[%s14182_s1 + $0x8] sm:$0xff]   ;;  %v11442_v5 = vpop.eup %10207  ;;  %10215 = vrcp.f32 %v856_v45  ;;  %v11462_v34 = vld [vmem:[%s10681_s28 + $0xb8] sm:$0xff]  }
  0xf1   : > { %14318 = vst [vmem:[#allocation33_spill] sm:$0xff] %v11427_v2  ;;  %v1516_v55 = vsel %vm1496_vm1, %v1511_v12, %v1515_v49  ;;  %7080 = vperm.xlu1 %9930, %v7063_v58   ;;  %4549 = vperm.xlu0 %9929, %v4443_v17   ;;  %v591_v22 = vmul.f32 %v11238_v16, %v8277_v11  ;;  %v11464_v31 = vpop.eup %10209  ;;  %v14320_v11 = vshrl.u32 %v11377_v6, 16  ;;  %10217 = vrcp.f32 %v11404_v50 }
  0xf2   : > { %v11454_v63 = vpack.c.bf16 %v1372_v10, %v1371_v9  ;;  %8807 = vmatmul.mubr.bf16.vlgmr.msra.gmra.mrb[0].mxu1 %v1516_v55  ;;  %v2104_v58 = vsel %vm2097_vm0, %v2101_v4, %v2103_v13  ;;  %8936 = vmatprep.subr.bf16.mxu0 %v9948_v37  ;;  %v11459_v17 = vmul.f32 %v11364_v18, %v11088_v35  ;;  %v14321_v10 = vshll.u32 %v11408_v48, 16  ;;  %v10294_v35 = vld [vmem:[%s14182_s1] sm:$0xff]  }
  0xf3   : > { %v1151_v54 = vpop.permute.xlu1 %1150  ;;  %v1146_v12 = vpop.permute.xlu0 %1145  ;;  %8906 = vmatprep.mubr.bf16.mxu0 %v2104_v58  ;;  %v1519_v3 = vor.u32 %v14320_v11, %v1515_v49  ;;  %v14213_v4 = vshrl.u32 %v11408_v48, 16  ;;  %8839 = vmatpush3.bf16.msra.mxu1 %v10294_v35  ;;  %v11475_v18 = vmul.f32 -1.442695, %v11427_v2  ;;  %v4445_v49 = vld [vmem:[%s14188_s7 + $0xa0] sm:$0xff]  ;;  %10219 = vpow2.f32 %v11311_v62  ;;  %v7066_v62 = vld [vmem:[%s14188_s7 + $0x118] sm:$0xff] }
  0xf4   : > { %14319 = vst [vmem:[#allocation34_spill] sm:$0xff] %v11454_v63  ;;  %v1523_v9 = vrot.slane %v14321_v10, 1  ;;  %v1374_v45 = vmul.f32 %v1151_v54, %v11188_v59  ;;  %v1373_v55 = vmul.f32 %v1146_v12, %v11193_v44  ;;  %v2105_v58 = vrot.slane %v11454_v63, 1  ;;  %8937 = vmatpush3.bf16.msra.mxu0 %v9948_v37  ;;  %8840 = vmatprep.subr.bf16.mxu1 %v9953_v60  ;;  %v9955_v10 = vld [vmem:[%s14182_s1 + $0x10] sm:$0xff]  }
  0xf5   : > { %v14212_v11 = vshll.u32 %v11454_v63, 16  ;;  %4554 = vperm.xlu1 %9930, %v4444_v27   ;;  %7085 = vperm.xlu0 %9929, %v7064_v28   ;;  %v7065_v44 = vld [vmem:[%s14188_s7 + $0x110] sm:$0xff]  ;;  %v11493_v37 = vmul.f32 %v11375_v53, %v11103_v61  ;;  %v8281_v12 = vunpack.c.h.bf16 %v11462_v34  ;;  %v9950_v61 = vld [vmem:[%s14182_s1 + $0xd8] sm:$0xff]   ;;  %v11509_v53 = vpop.eup %10211  ;;  %10221 = vpow2.f32 %v11314_v1 }
  0xf6   : > { %v1524_v59 = vsel %vm1496_vm1, %v1519_v3, %v1523_v9  ;;  %v11497_v54 = vpack.c.bf16 %v1374_v45, %v1373_v55  ;;  %v11500_v27 = vsel %vm2097_vm0, %v2103_v13, %v2105_v58  ;;  %v1527_v28 = vor.u32 %v14213_v4, %v1523_v9  ;;  %8938 = vmatprep.subr.bf16.mxu0 %v9949_v15 }
  0xf7   : > { %8810 = vmatprep.mubr.bf16.mxu1 %v1524_v59  ;;  %14322 = vst [vmem:[#allocation35_spill] sm:$0xff] %v11500_v27  ;;  %v1531_v3 = vrot.slane %v14212_v11, 1  ;;  %v1161_v50 = vpop.permute.xlu1 %1160  ;;  %v1156_v35 = vpop.permute.xlu0 %1155  ;;  %8907 = vmatmul.mubr.bf16.gmra.mrb[4].mxu0 %v11500_v27  ;;  %v11514_v13 = vmul.f32 %v11384_v0, %v11122_v56  ;;  %v11518_v9 = vadd.f32 %v11258_v51, %v591_v22  ;;  %v4446_v56 = vld [vmem:[%s14188_s7 + $0xa8] sm:$0xff]  ;;  %v14217_v0 = vshrl.u32 %v11454_v63, 16 }
  0xf8   : > { %8841 = vmatpush3.bf16.msra.mxu1 %v9953_v60  ;;  %v11521_v45 = vadd.f32 %v11258_v51, %v590_v47  ;;  %v1376_v55 = vmul.f32 %v1161_v50, %v11198_v46  ;;  %v1375_v59 = vmul.f32 %v1156_v35, %v11213_v39  ;;  %v2107_v4 = vrot.slane %v11497_v54, 1  ;;  %8939 = vmatpush3.bf16.msra.mxu0 %v9949_v15  ;;  %v9956_v46 = vld [vmem:[%s14182_s1 + $0x18] sm:$0xff]   ;;  %v11538_v39 = vpop.eup %10213 }
  0xf9   : > { %14323 = vst [vmem:[#allocation36_spill] sm:$0xff] %v11518_v9  ;;  %v11526_v11 = vsel %vm1496_vm1, %v1527_v28, %v1531_v3  ;;  %8842 = vmatprep.subr.bf16.mxu1 %v9955_v10  ;;  %4559 = vperm.xlu1 %9930, %v4445_v49   ;;  %v14214_v60 = vshll.u32 %v11497_v54, 16  ;;  %v593_v22 = vmul.f32 %v11238_v16, %v8281_v12  ;;  %v9951_v49 = vld [vmem:[%s14182_s1 + $0xe0] sm:$0xff]   ;;  %10223 = vpow2.f32 %v11351_v52  ;;  %v9954_v52 = vld [vmem:[%s14182_s1 + $0xe8] sm:$0xff]  }
  0xfa   : > { %14324 = vst [vmem:[#allocation37_spill] sm:$0xff] %v11521_v45  ;;  %14325 = vst [vmem:[#allocation38_spill] sm:$0xff] %v11526_v11  ;;  %7090 = vperm.xlu0 %9929, %v7065_v44   ;;  %v11544_v28 = vpack.c.bf16 %v1376_v55, %v1375_v59  ;;  %8811 = vmatmul.mubr.bf16.gmra.mrb[4].mxu1 %v11526_v11  ;;  %v11548_v15 = vsel %vm2097_vm0, %v2105_v58, %v2107_v4  ;;  %v14216_v55 = vshrl.u32 %v11497_v54, 16 }
  0xfb   : > { %14326 = vst [vmem:[#allocation39_spill] sm:$0xff] %v11548_v15  ;;  %8940 = vmatprep.subr.bf16.mxu0 %v9950_v61  ;;  %v11555_v44 = vmul.f32 %v11390_v33, %v11129_v19  ;;  %v1171_v12 = vpop.permute.xlu1 %1170  ;;  %v1166_v50 = vpop.permute.xlu0 %1165  ;;  %8910 = vmatprep.mubr.bf16.mxu0 %v11548_v15  ;;  %v1535_v35 = vor.u32 %v14217_v0, %v1531_v3  ;;  %v1539_v58 = vrot.slane %v14214_v60, 1  ;;  %v11565_v59 = vmul.f32 -1.442695, %v11518_v9  ;;  %v4447_v3 = vld [vmem:[%s14188_s7 + $0xb0] sm:$0xff]  ;;  %v7067_v60 = vld [vmem:[%s14188_s7 + $0x120] sm:$0xff] }
  0xfc   : > { %8843 = vmatpush3.bf16.msra.mxu1 %v9955_v10  ;;  %v11567_v19 = vpop.eup %10215  ;;  %v1378_v1 = vmul.f32 %v1171_v12, %v11219_v7  ;;  %v1377_v33 = vmul.f32 %v1166_v50, %v11235_v38  ;;  %v2109_v47 = vrot.slane %v11544_v28, 1  ;;  %v14215_v10 = vshll.u32 %v11544_v28, 16  ;;  %8941 = vmatpush3.bf16.msra.mxu0 %v9950_v61  ;;  %v9958_v7 = vld [vmem:[%s14182_s1 + $0x20] sm:$0xff]  }
  0xfd   : > { %8844 = vmatprep.subr.bf16.mxu1 %v9956_v46  ;;  %4564 = vperm.xlu1 %9930, %v4446_v56   ;;  %v11583_v38 = vsel %vm1496_vm1, %v1535_v35, %v1539_v58  ;;  %v11587_v12 = vmul.f32 %v11402_v57, %v11138_v30  ;;  %v11591_v50 = vmul.f32 -1.442695, %v11521_v45  ;;  %v11606_v57 = vpop.eup %10217  ;;  %v14331_v0 = vshll.u32 %v11346_v25, 16 }
  0xfe   : > { %7095 = vperm.xlu0 %9929, %v7066_v62   ;;  %14327 = vst [vmem:[#allocation40_spill] sm:$0xff] %v11583_v38  ;;  %v11593_v61 = vpack.c.bf16 %v1378_v1, %v1377_v33  ;;  %8814 = vmatprep.mubr.bf16.mxu1 %v11583_v38  ;;  %v11597_v56 = vsel %vm2097_vm0, %v2107_v4, %v2109_v47  ;;  %v1547_v30 = vrot.slane %v14215_v10, 1  ;;  %v11610_v4 = vadd.f32 1.0, %v11406_v26  ;;  %v11616_v33 = vld [vmem:[%s10681_s28 + $0xc0] sm:$0xff]  }
  0xff   : > { %14328 = vst [vmem:[#allocation41_spill] sm:$0xff] %v11597_v56  ;;  %v1543_v62 = vor.u32 %v14216_v55, %v1539_v58  ;;  %8942 = vmatprep.subr.bf16.mxu0 %v9951_v49  ;;  %v1181_v35 = vpop.permute.xlu1 %1180  ;;  %v1176_v1 = vpop.permute.xlu0 %1175  ;;  %8911 = vmatmul.mubr.bf16.gmra.mrb[8].mxu0 %v11597_v56  ;;  %v11613_v58 = vadd.f32 %v11258_v51, %v593_v22  ;;  %v14330_v10 = vshrl.u32 %v11346_v25, 16  ;;  %v11624_v15 = vrot.slane %v14331_v0, 5  ;;  %v4448_v56 = vld [vmem:[%s14188_s7 + $0xb8] sm:$0xff] }
 0x100   : > { %8845 = vmatpush3.bf16.msra.mxu1 %v9956_v46  ;;  %v1380_v27 = vmul.f32 %v1181_v35, %v11243_v29  ;;  %v1379_v46 = vmul.f32 %v1176_v1, %v11248_v24  ;;  %v2111_v22 = vrot.slane %v11593_v61, 1  ;;  %8943 = vmatpush3.bf16.msra.mxu0 %v9951_v49  ;;  %v9959_v29 = vld [vmem:[%s14182_s1 + $0x28] sm:$0xff]   ;;  %v11641_v24 = vpop.eup %10219  ;;  %v14226_v0 = vshrl.u32 %v11544_v28, 16 }
 0x101   : > { %14329 = vst [vmem:[#allocation42_spill] sm:$0xff] %v11613_v58  ;;  %v11620_v55 = vrot.slane %v14330_v10, 4  ;;  %v11629_v26 = vsel %vm1496_vm1, %v1543_v62, %v1547_v30  ;;  %v7068_v10 = vld [vmem:[%s14188_s7 + $0x128] sm:$0xff]  ;;  %8846 = vmatprep.subr.bf16.mxu1 %v9958_v7  ;;  %4569 = vperm.xlu1 %9930, %v4447_v3   ;;  %10225 = vpow2.f32 %v11357_v36  ;;  %v14333_v35 = vunpack.c.l.bf16 %v11462_v34 }
 0x102   : > { %14332 = vst [vmem:[#allocation43_spill] sm:$0xff] %v11629_v26  ;;  %7100 = vperm.xlu0 %9929, %v7067_v60   ;;  %v11649_v49 = vpack.c.bf16 %v1380_v27, %v1379_v46  ;;  %8815 = vmatmul.mubr.bf16.gmra.mrb[8].mxu1 %v11629_v26  ;;  %v11653_v38 = vsel %vm2097_vm0, %v2109_v47, %v2111_v22  ;;  %v9957_v60 = vld [vmem:[%s14182_s1 + $0xf0] sm:$0xff]   ;;  %v11659_v3 = vadd.f32 1.0, %v11418_v43  ;;  %v8285_v36 = vunpack.c.h.bf16 %v11616_v33  ;;  %v11670_v43 = vpop.eup %10221 }
 0x103   : > { %v592_v1 = vmul.f32 %v11238_v16, %v14333_v35  ;;  %14334 = vst [vmem:[#allocation44_spill] sm:$0xff] %v11653_v38  ;;  %8944 = vmatprep.subr.bf16.mxu0 %v9954_v52  ;;  %v1191_v34 = vpop.permute.xlu1 %1190  ;;  %v1186_v62 = vpop.permute.xlu0 %1185  ;;  %8914 = vmatprep.mubr.bf16.mxu0 %v11653_v38  ;;  %v1551_v27 = vor.u32 %v14226_v0, %v1547_v30  ;;  %v14335_v47 = vshll.u32 %v11593_v61, 16  ;;  %v14228_v35 = vshrl.u32 %v11593_v61, 16  ;;  %v4449_v30 = vld [vmem:[%s14188_s7 + $0xc0] sm:$0xff] }
 0x104   : > { %8847 = vmatpush3.bf16.msra.mxu1 %v9958_v7  ;;  %v1382_v11 = vmul.f32 %v1191_v34, %v11276_v20  ;;  %v1381_v45 = vmul.f32 %v1186_v62, %v11298_v8  ;;  %v2113_v38 = vrot.slane %v11649_v49, 1  ;;  %v14227_v7 = vshll.u32 %v11649_v49, 16  ;;  %8945 = vmatpush3.bf16.msra.mxu0 %v9954_v52  ;;  %v9960_v20 = vld [vmem:[%s14182_s1 + $0xf8] sm:$0xff]   ;;  %v9961_v8 = vld [vmem:[%s14182_s1 + $0x30] sm:$0xff]  }
 0x105   : > { %v1555_v46 = vrot.slane %v14335_v47, 1  ;;  %v7069_v47 = vld [vmem:[%s14188_s7 + $0x130] sm:$0xff]  ;;  %8848 = vmatprep.subr.bf16.mxu1 %v9959_v29  ;;  %4574 = vperm.xlu1 %9930, %v4448_v56   ;;  %10227 = vpow2.f32 %v11381_v41  ;;  %v11693_v34 = vmul.f32 -1.442695, %v11613_v58  ;;  %v8284_v52 = vunpack.c.l.bf16 %v11616_v33  ;;  %v11709_v41 = vld [vmem:[%s14182_s1 + $0x38] sm:$0xff]   ;;  %v11711_v33 = vpop.eup %10223 }
 0x106   : > { %7105 = vperm.xlu0 %9929, %v7068_v10   ;;  %v11696_v0 = vpack.c.bf16 %v1382_v11, %v1381_v45  ;;  %v11700_v26 = vsel %vm2097_vm0, %v2111_v22, %v2113_v38  ;;  %v1563_v10 = vrot.slane %v14227_v7, 1  ;;  %8946 = vmatprep.subr.bf16.mxu0 %v9957_v60  ;;  %v14338_v11 = vshll.u32 %v11408_v48, 16 }
 0x107   : > { %v11689_v62 = vsel %vm1496_vm1, %v1551_v27, %v1555_v46  ;;  %14337 = vst [vmem:[#allocation46_spill] sm:$0xff] %v11700_v26  ;;  %v1559_v56 = vor.u32 %v14228_v35, %v1555_v46  ;;  %v1201_v22 = vpop.permute.xlu1 %1200  ;;  %v1196_v27 = vpop.permute.xlu0 %1195  ;;  %8915 = vmatmul.mubr.bf16.gmra.mrb[12].mxu0 %v11700_v26  ;;  %10229 = vrcp.f32 %v11610_v4  ;;  %v11720_v46 = vadd.f32 1.0, %v11442_v5  ;;  %v4450_v4 = vld [vmem:[%s14188_s7 + $0xc8] sm:$0xff]  ;;  %v7070_v5 = vld [vmem:[%s14188_s7 + $0x138] sm:$0xff] }
 0x108   : > { %14336 = vst [vmem:[#allocation45_spill] sm:$0xff] %v11689_v62  ;;  %8818 = vmatprep.mubr.bf16.mxu1 %v11689_v62  ;;  %v11715_v45 = vrot.slane %v14338_v11, 5  ;;  %8849 = vmatpush3.bf16.msra.mxu1 %v9959_v29  ;;  %v11723_v7 = vadd.f32 %v11258_v51, %v592_v1  ;;  %v1384_v35 = vmul.f32 %v1201_v22, %v11301_v32  ;;  %v2115_v9 = vrot.slane %v11696_v0, 1  ;;  %v11740_v32 = vld [vmem:[%s14182_s1 + $0x100] sm:$0xff]  }
 0x109   : > { %v1383_v62 = vmul.f32 %v1196_v27, %v11305_v14  ;;  %v11728_v11 = vsel %vm1496_vm1, %v1559_v56, %v1563_v10  ;;  %8947 = vmatpush3.bf16.msra.mxu0 %v9957_v60  ;;  %8850 = vmatprep.subr.bf16.mxu1 %v9961_v8  ;;  %v14238_v14 = vshrl.u32 %v11649_v49, 16  ;;  %v595_v1 = vmul.f32 %v11238_v16, %v8285_v36 }
 0x10a   : > { %14339 = vst [vmem:[#allocation47_spill] sm:$0xff] %v11728_v11  ;;  %4579 = vperm.xlu1 %9930, %v4449_v30   ;;  %7110 = vperm.xlu0 %9929, %v7069_v47   ;;  %v11746_v56 = vmul.f32 %v11238_v16, %v8284_v52  ;;  %v14340_v60 = vshrl.u32 %v11408_v48, 16  ;;  %v11754_v26 = vsel %vm2097_vm0, %v2113_v38, %v2115_v9  ;;  %v14342_v30 = vshrl.u32 %v11377_v6, 16 }
 0x10b   : > { %v11750_v27 = vpack.c.bf16 %v1384_v35, %v1383_v62  ;;  %8819 = vmatmul.mubr.bf16.gmra.mrb[12].mxu1 %v11728_v11  ;;  %14341 = vst [vmem:[#allocation48_spill] sm:$0xff] %v11754_v26  ;;  %8948 = vmatprep.subr.bf16.mxu0 %v9960_v20  ;;  %v11758_v29 = vpop.eup %10225  ;;  %v1211_v36 = vpop.permute.xlu1 %1210  ;;  %v1567_v35 = vor.u32 %v14238_v14, %v1563_v10  ;;  %v14343_v62 = vshll.u32 %v11696_v0, 16  ;;  %v14237_v38 = vshrl.u32 %v11696_v0, 16 }
 0x10c   : > { %v2721_v22 = vrot.slane %v14340_v60, 4  ;;  %v2717_v47 = vrot.slane %v14342_v30, 4  ;;  %v1206_v16 = vpop.permute.xlu0 %1205  ;;  %8918 = vmatprep.mubr.bf16.mxu0 %v11754_v26  ;;  %8851 = vmatpush3.bf16.msra.mxu1 %v9961_v8  ;;  %v14344_v60 = vshll.u32 %v11377_v6, 16  ;;  %v1386_v30 = vmul.f32 %v1211_v36, %v11338_v40  ;;  %v4451_v26 = vld [vmem:[%s14188_s7 + $0xd0] sm:$0xff]  ;;  %v11782_v8 = vld [vmem:[%s14182_s1 + $0x40] sm:$0xff]  }
 0x10d   : > { %v1571_v52 = vrot.slane %v14343_v62, 1  ;;  %v1385_v2 = vmul.f32 %v1206_v16, %v11341_v21  ;;  %v2117_v58 = vrot.slane %v11750_v27, 1  ;;  %v14236_v10 = vshll.u32 %v11750_v27, 16  ;;  %8949 = vmatpush3.bf16.msra.mxu0 %v9960_v20  ;;  %8852 = vmatprep.subr.bf16.mxu1 %v11709_v41  ;;  %v11777_v62 = vld [vmem:[%s10681_s28 + $0xc8] sm:$0xff]   ;;  %v14346_v21 = vld [vmem:[#allocation17_spill] sm:$0xff] }
 0x10e   : > { %v2718_v11 = vrot.slane %v14344_v60, 5  ;;  %4584 = vperm.xlu1 %9930, %v4450_v4   ;;  %7115 = vperm.xlu0 %9929, %v7070_v5   ;;  %v11789_v36 = vmul.f32 %v11464_v31, %v14346_v21  ;;  %10231 = vrcp.f32 %v11659_v3  ;;  %v11793_v20 = vmul.f32 -1.442695, %v11723_v7  ;;  %v7071_v4 = vld [vmem:[%s14188_s7 + $0x140] sm:$0xff] }
 0x10f   : > { %v11785_v40 = vsel %vm1496_vm1, %v1567_v35, %v1571_v52  ;;  %v11795_v16 = vpack.c.bf16 %v1386_v30, %v1385_v2  ;;  %v11799_v60 = vsel %vm2097_vm0, %v2115_v9, %v2117_v58  ;;  %v1575_v31 = vor.u32 %v14237_v38, %v1571_v52  ;;  %8982 = vmatprep.subr.bf16.mxu0 %v11740_v32  ;;  %v11809_v5 = vpop.eup %10227  ;;  %v1221_v2 = vpop.permute.xlu1 %1220 }
 0x110   : > { %14345 = vst [vmem:[#allocation49_spill] sm:$0xff] %v11785_v40  ;;  %8822 = vmatprep.mubr.bf16.mxu1 %v11785_v40  ;;  %14347 = vst [vmem:[#allocation17_spill] sm:$0xff] %v11799_v60  ;;  %v1579_v3 = vrot.slane %v14236_v10, 1  ;;  %v1216_v35 = vpop.permute.xlu0 %1215  ;;  %8919 = vmatmul.mubr.bf16.gmra.mrb[16].mxu0 %v11799_v60  ;;  %v8289_v30 = vunpack.c.h.bf16 %v11777_v62  ;;  %v2719_v21 = vor.u32 %v2718_v11, %v2717_v47  ;;  %10233 = vrcp.f32 %v11720_v46  ;;  %v7072_v47 = vld [vmem:[%s14188_s7 + $0x148] sm:$0xff] }
 0x111   : > { %8853 = vmatpush3.bf16.msra.mxu1 %v11709_v41  ;;  %v11816_v52 = vor.u32 %v11715_v45, %v2721_v22  ;;  %v1388_v10 = vmul.f32 %v1221_v2, %v11423_v42  ;;  %v1387_v38 = vmul.f32 %v1216_v35, %v11459_v17  ;;  %v2119_v40 = vrot.slane %v11795_v16, 1  ;;  %v11825_v9 = vpop.eup %10229  ;;  %v4452_v41 = vld [vmem:[%s14188_s7 + $0xd8] sm:$0xff] }
 0x112   : > { %v11821_v14 = vsel %vm1496_vm1, %v1575_v31, %v1579_v3  ;;  %9222 = vmatprep.subr.bf16.mxu1 %v11782_v8  ;;  %4589 = vperm.xlu1 %9930, %v4451_v26   ;;  %v14241_v45 = vshll.u32 %v11795_v16, 16  ;;  %v14349_v42 = vld [vmem:[#allocation18_spill] sm:$0xff]  ;;  %v11837_v11 = vadd.f32 %v11258_v51, %v595_v1  ;;  %v11852_v46 = vadd.f32 %v11258_v51, %v11746_v56 }
 0x113   : > { %14348 = vst [vmem:[#allocation50_spill] sm:$0xff] %v11821_v14  ;;  %7120 = vperm.xlu0 %9929, %v7071_v4   ;;  %v11833_v17 = vmul.f32 %v11509_v53, %v14349_v42  ;;  %v11839_v22 = vpack.c.bf16 %v1388_v10, %v1387_v38  ;;  %8823 = vmatmul.mubr.bf16.gmra.mrb[16].mxu1 %v11821_v14  ;;  %v14351_v4 = vshrl.u32 %v11750_v27, 16  ;;  %v1231_v1 = vpop.permute.xlu1 %1230  ;;  %v14242_v38 = vshrl.u32 %v11795_v16, 16 }
 0x114   : > { %v11843_v26 = vsel %vm2097_vm0, %v2117_v58, %v2119_v40  ;;  %v1226_v31 = vpop.permute.xlu0 %1225  ;;  %v1587_v58 = vrot.slane %v14241_v45, 1  ;;  %v14352_v10 = vor.u32 %v11624_v15, %v11620_v55  ;;  %v11866_v51 = vsel %vm2713_vm2, %v2719_v21, %v11816_v52  ;;  %v4453_v15 = vld [vmem:[%s14188_s7 + $0xe0] sm:$0xff] }
 0x115   : > { %14350 = vst [vmem:[#allocation18_spill] sm:$0xff] %v11843_v26  ;;  %v1583_v53 = vor.u32 %v14351_v4, %v1579_v3  ;;  %8922 = vmatprep.mubr.bf16.mxu0 %v11843_v26  ;;  %14354 = vst [vmem:[#allocation52_spill] sm:$0xff] %v11866_v51  ;;  %v1390_v56 = vmul.f32 %v1231_v1, %v11493_v37  ;;  %v1389_v3 = vmul.f32 %v1226_v31, %v11514_v13  ;;  %v11881_v37 = vld [vmem:[%s10804_s14] ss:$0 sm:$0xff]  ;;  %v14357_v31 = vld [vmem:[#allocation19_spill] sm:$0xff] }
 0x116   : > { %v11862_v2 = vsel %vm2713_vm2, %v14352_v10, %v2719_v21  ;;  %v2121_v35 = vrot.slane %v11839_v22, 1  ;;  %v14240_v42 = vshll.u32 %v11839_v22, 16  ;;  %4594 = vperm.xlu1 %9930, %v4452_v41   ;;  %v859_v55 = vadd.f32 1.0, %v11538_v39 }
 0x117   : > { %14353 = vst [vmem:[#allocation51_spill] sm:$0xff] %v11862_v2  ;;  %7125 = vperm.xlu0 %9929, %v7072_v47   ;;  %v11873_v4 = vsel %vm1496_vm1, %v1583_v53, %v1587_v58  ;;  %10235 = vpow2.f32 %v11475_v18  ;;  %v597_v13 = vmul.f32 %v11881_v37, %v8289_v30  ;;  %v11884_v21 = vpack.c.bf16 %v1390_v56, %v1389_v3  ;;  %v7073_v47 = vld [vmem:[%s14188_s7 + $0x150] sm:$0xff]  ;;  %v1241_v30 = vpop.permute.xlu1 %1240 }
 0x118   : > { %14355 = vst [vmem:[#allocation53_spill] sm:$0xff] %v11873_v4  ;;  %8826 = vmatprep.mubr.bf16.mxu1 %v11873_v4  ;;  %v11888_v41 = vsel %vm2097_vm0, %v2119_v40, %v2121_v35  ;;  %v1591_v39 = vor.u32 %v14242_v38, %v1587_v58  ;;  %v1595_v18 = vrot.slane %v14240_v42, 1  ;;  %v11897_v53 = vpop.eup %10231  ;;  %v1236_v1 = vpop.permute.xlu0 %1235  ;;  %v1018_v40 = vmul.f32 %v11567_v19, %v14357_v31  ;;  %v4454_v19 = vld [vmem:[%s14188_s7 + $0xe8] sm:$0xff] }
 0x119   : > { %14356 = vst [vmem:[#allocation54_spill] sm:$0xff] %v11888_v41  ;;  %8923 = vmatmul.mubr.bf16.gmra.mrb[20].mxu0 %v11888_v41  ;;  %10237 = vpow2.f32 %v11565_v59  ;;  %v11904_v10 = vmul.f32 -1.442695, %v11837_v11  ;;  %v1392_v58 = vmul.f32 %v1241_v30, %v11555_v44  ;;  %v1391_v3 = vmul.f32 %v1236_v1, %v11587_v12  ;;  %v14359_v38 = vld [vmem:[#allocation20_spill] sm:$0xff] }
 0x11a   : > { %v11910_v42 = vsel %vm1496_vm1, %v1591_v39, %v1595_v18  ;;  %v2123_v45 = vrot.slane %v11884_v21, 1  ;;  %4599 = vperm.xlu1 %9930, %v4453_v15   ;;  %v14248_v59 = vshrl.u32 %v11839_v22, 16  ;;  %v14247_v31 = vshll.u32 %v11884_v21, 16  ;;  %v7074_v15 = vld [vmem:[%s14188_s7 + $0x158] sm:$0xff] }
 0x11b   : > { %14358 = vst [vmem:[#allocation19_spill] sm:$0xff] %v11910_v42  ;;  %7130 = vperm.xlu0 %9929, %v7073_v47   ;;  %v1017_v44 = vmul.f32 %v11606_v57, %v14359_v38  ;;  %10239 = vrcp.f32 %v859_v55  ;;  %v11920_v12 = vpack.c.bf16 %v1392_v58, %v1391_v3  ;;  %8827 = vmatmul.mubr.bf16.gmra.mrb[20].mxu1 %v11910_v42  ;;  %v11930_v47 = vld [vmem:[%s10828_s15] ss:$0 sm:$0xff]  ;;  %v14361_v1 = vshrl.u32 %v11454_v63, 16  ;;  %v11937_v38 = vpop.eup %10233  ;;  %v1251_v55 = vpop.permute.xlu1 %1250 }
 0x11c   : > { %v11924_v39 = vsel %vm2097_vm0, %v2121_v35, %v2123_v45  ;;  %v11933_v30 = vadd.f32 %v11930_v47, %v597_v13  ;;  %v1246_v58 = vpop.permute.xlu0 %1245  ;;  %v1599_v35 = vor.u32 %v14248_v59, %v1595_v18  ;;  %v1603_v3 = vrot.slane %v14247_v31, 1 }
 0x11d   : > { %14360 = vst [vmem:[#allocation20_spill] sm:$0xff] %v11924_v39  ;;  %v2725_v57 = vrot.slane %v14361_v1, 4  ;;  %8926 = vmatprep.mubr.bf16.mxu0 %v11924_v39  ;;  %v14251_v56 = vshrl.u32 %v11884_v21, 16  ;;  %v14362_v13 = vshll.u32 %v11454_v63, 16  ;;  %v1394_v26 = vmul.f32 %v1251_v55, %v11789_v36  ;;  %v4455_v39 = vld [vmem:[%s14188_s7 + $0xf0] sm:$0xff] }
 0x11e   : > { %v1393_v1 = vmul.f32 %v1246_v58, %v11833_v17  ;;  %v2125_v60 = vrot.slane %v11920_v12, 1  ;;  %v14252_v18 = vshll.u32 %v11920_v12, 16  ;;  %4604 = vperm.xlu1 %9930, %v4454_v19   ;;  %v11955_v31 = vsel %vm1496_vm1, %v1599_v35, %v1603_v3  ;;  %v7075_v19 = vld [vmem:[%s14188_s7 + $0x160] sm:$0xff] }
 0x11f   : > { %v2726_v41 = vrot.slane %v14362_v13, 5  ;;  %7135 = vperm.xlu0 %9929, %v7074_v15   ;;  %14363 = vst [vmem:[#allocation55_spill] sm:$0xff] %v11955_v31  ;;  %v862_v13 = vadd.f32 1.0, %v11641_v24  ;;  %v11959_v36 = vadd.f32 1.0, %v11670_v43  ;;  %10241 = vpow2.f32 %v11591_v50  ;;  %8830 = vmatprep.mubr.bf16.mxu1 %v11955_v31  ;;  %v1261_v50 = vpop.permute.xlu1 %1260 }
 0x120   : > { %v11962_v17 = vpack.c.bf16 %v1394_v26, %v1393_v1  ;;  %v11966_v55 = vsel %vm2097_vm0, %v2123_v45, %v2125_v60  ;;  %v1607_v15 = vor.u32 %v14251_v56, %v1603_v3  ;;  %v1611_v24 = vrot.slane %v14252_v18, 1  ;;  %v1256_v26 = vpop.permute.xlu0 %1255 }
 0x121   : > { %14364 = vst [vmem:[#allocation56_spill] sm:$0xff] %v11966_v55  ;;  %v11975_v43 = vpop.eup %10235  ;;  %8927 = vmatmul.mubr.bf16.gmra.mrb[24].mxu0 %v11966_v55  ;;  %v864_v58 = vadd.f32 1.0, %v11711_v33  ;;  %v2727_v45 = vor.u32 %v2726_v41, %v2725_v57  ;;  %v14365_v35 = vshrl.u32 %v11497_v54, 16  ;;  %v14366_v59 = vshll.u32 %v11497_v54, 16  ;;  %v4456_v55 = vld [vmem:[%s14188_s7 + $0xf8] sm:$0xff] }
 0x122   : > { %v1396_v42 = vmul.f32 %v1261_v50, %v1018_v40  ;;  %v1395_v3 = vmul.f32 %v1256_v26, %v1017_v44  ;;  %v11984_v56 = vsel %vm1496_vm1, %v1607_v15, %v1611_v24  ;;  %v2127_v18 = vrot.slane %v11962_v17, 1  ;;  %4609 = vperm.xlu1 %9930, %v4455_v39   ;;  %v7076_v39 = vld [vmem:[%s14188_s7 + $0x168] sm:$0xff]  ;;  %v7077_v26 = vld [vmem:[%s14188_s7 + $0x170] sm:$0xff] }
 0x123   : > { %v2729_v1 = vrot.slane %v14365_v35, 4  ;;  %v2730_v31 = vrot.slane %v14366_v59, 5  ;;  %14367 = vst [vmem:[#allocation57_spill] sm:$0xff] %v11984_v56  ;;  %v11990_v4 = vpop.eup %10237  ;;  %7140 = vperm.xlu0 %9929, %v7075_v19   ;;  %v14256_v33 = vshrl.u32 %v11920_v12, 16  ;;  %v14255_v41 = vshll.u32 %v11962_v17, 16  ;;  %8831 = vmatmul.mubr.bf16.gmra.mrb[24].mxu1 %v11984_v56 }
 0x124   : > { %10243 = vpow2.f32 %v11693_v34  ;;  %v14368_v40 = vunpack.c.l.bf16 %v11777_v62  ;;  %v11998_v44 = vpack.c.bf16 %v1396_v42, %v1395_v3  ;;  %v12002_v57 = vsel %vm2097_vm0, %v2125_v60, %v2127_v18  ;;  %v12011_v62 = vpop.permute.xlu1 %1270 }
 0x125   : > { %14370 = vst [vmem:[#allocation59_spill] sm:$0xff] %v12002_v57  ;;  %v14260_v19 = vrot.slane %v11377_v6, 4  ;;  %10245 = vpow2.f32 %v11793_v20  ;;  %v12009_v34 = vpop.eup %10239  ;;  %8930 = vmatprep.mubr.bf16.mxu0 %v12002_v57  ;;  %v1615_v60 = vor.u32 %v14256_v33, %v1611_v24  ;;  %v1619_v42 = vrot.slane %v14255_v41, 1  ;;  %v9964_v57 = vld [vmem:[%s14182_s1 + $0x108] sm:$0xff]  }
 0x126   : > { %v596_v59 = vmul.f32 %v11881_v37, %v14368_v40  ;;  %14369 = vst [vmem:[#allocation58_spill] sm:$0xff] %v11998_v44  ;;  %v12013_v37 = vpop.permute.xlu0 %1265  ;;  %v12022_v15 = vsel %vm2713_vm2, %v11816_v52, %v2727_v45  ;;  %v2731_v50 = vor.u32 %v2730_v31, %v2729_v1  ;;  %v14257_v20 = vrot.slane %v11998_v44, 1  ;;  %4614 = vperm.xlu1 %9930, %v4456_v55  }
 0x127   : > { %14371 = vst [vmem:[#allocation60_spill] sm:$0xff] %v12022_v15  ;;  %v2406_v35 = vrot.slane %v11346_v25, 4  ;;  %v14259_v3 = vshrl.u32 %v11962_v17, 16  ;;  %v14258_v24 = vshll.u32 %v11998_v44, 16  ;;  %7145 = vperm.xlu0 %9929, %v7076_v39   ;;  %v12032_v40 = vsel %vm1496_vm1, %v1615_v60, %v1619_v42 }
 0x128   : > { %14372 = vst [vmem:[#allocation61_spill] sm:$0xff] %v12032_v40  ;;  %10247 = vrcp.f32 %v862_v13  ;;  %v14373_v52 = vshrl.u32 %v11544_v28, 16  ;;  %v14374_v1 = vshll.u32 %v11544_v28, 16  ;;  %8834 = vmatprep.mubr.bf16.mxu1 %v12032_v40  ;;  %v12042_v33 = vsel %vm2097_vm0, %v2127_v18, %v14257_v20 }
 0x129   : > { %14375 = vst [vmem:[#allocation62_spill] sm:$0xff] %v12042_v33  ;;  %v1623_v55 = vor.u32 %v14259_v3, %v1619_v42  ;;  %v12048_v39 = vrot.slane %v14258_v24, 1  ;;  %v863_v13 = vadd.f32 1.0, %v11758_v29  ;;  %v10242_v60 = vpop.eup %10241  ;;  %8931 = vmatmul.mubr.bf16.gmra.mrb[28].mxu0 %v12042_v33  ;;  %v2408_v18 = vsel %vm1454_vm3, %v2406_v35, %v14260_v19 }
 0x12a   : > { %v2733_v31 = vrot.slane %v14373_v52, 4  ;;  %v2734_v41 = vrot.slane %v14374_v1, 5  ;;  %v12051_v52 = vpop.permute.xlu1 %1280  ;;  %v12053_v1 = vpop.permute.xlu0 %1275  ;;  %v866_v20 = vadd.f32 1.0, %v11809_v5  ;;  %10249 = vpow2.f32 %v11904_v10  ;;  %8950 = vmatprep.mubr.bf16.mxu0 %v2408_v18 }
 0x12b   : > { %14376 = vst [vmem:[#allocation63_spill] sm:$0xff] %v12048_v39  ;;  %v12062_v42 = vsel %vm2713_vm2, %v2727_v45, %v2731_v50  ;;  %v12066_v29 = vsel %vm1496_vm1, %v1623_v55, %v12048_v39  ;;  %10251 = vrcp.f32 %v11959_v36  ;;  %v7680_v24 = vmul.f32 -1.442695, %v11852_v46  ;;  %7150 = vperm.xlu0 %9929, %v7077_v26  }
 0x12c   : > { %14377 = vst [vmem:[#allocation64_spill] sm:$0xff] %v12062_v42  ;;  %14378 = vst [vmem:[#allocation65_spill] sm:$0xff] %v12066_v29  ;;  %v12071_v3 = vadd.f32 %v11930_v47, %v596_v59  ;;  %10253 = vrcp.f32 %v864_v58  ;;  %v2409_v5 = vrot.slane %v11408_v48, 4  ;;  %v2735_v45 = vor.u32 %v2734_v41, %v2733_v31  ;;  %8835 = vmatmul.mubr.bf16.gmra.mrb[28].mxu1 %v12066_v29 }
 0x12d   : > { %10255 = vrcp.f32 %v863_v13  ;;  %v7683_v35 = vmul.f32 -1.442695, %v11933_v30  ;;  %v14379_v55 = vshrl.u32 %v11593_v61, 16  ;;  %v14380_v18 = vshll.u32 %v11593_v61, 16  ;;  %8854 = vmatprep.mubr.bf16.mxu1 %v11348_v23 }
 0x12e   : > { %v10244_v47 = vpop.eup %10243  ;;  %10257 = vrcp.f32 %v866_v20  ;;  %v12083_v58 = vsel %vm2713_vm2, %v2731_v50, %v2735_v45  ;;  %v14382_v41 = vshrl.u32 %v11649_v49, 16  ;;  %v14383_v26 = vshll.u32 %v11649_v49, 16  ;;  %v12089_v10 = vpop.permute.xlu1 %1290 }
 0x12f   : > { %v2737_v36 = vrot.slane %v14379_v55, 4  ;;  %v2738_v19 = vrot.slane %v14380_v18, 5  ;;  %14381 = vst [vmem:[#allocation66_spill] sm:$0xff] %v12083_v58  ;;  %v10246_v13 = vpop.eup %10245  ;;  %v12091_v55 = vpop.permute.xlu0 %1285  ;;  %v865_v18 = vadd.f32 1.0, %v11975_v43  ;;  %v868_v33 = vadd.f32 1.0, %v11990_v4 }
 0x130   : > { %v2741_v59 = vrot.slane %v14382_v41, 4  ;;  %v2742_v31 = vrot.slane %v14383_v26, 5  ;;  %10259 = vpow2.f32 %v7680_v24  ;;  %v7682_v23 = vmul.f32 -1.442695, %v12071_v3 }
 0x131   : > { %v14384_v50 = vrot.slane %v11377_v6, 4  ;;  %v14385_v41 = vrot.slane %v11454_v63, 4  ;;  %v2739_v29 = vor.u32 %v2738_v19, %v2737_v36  ;;  %v867_v43 = vadd.f32 1.0, %v10242_v60 }
 0x132   : > { %v2743_v40 = vor.u32 %v2742_v31, %v2741_v59  ;;  %10261 = vpow2.f32 %v7683_v35  ;;  %v14386_v4 = vshrl.u32 %v11696_v0, 16  ;;  %v14387_v56 = vshll.u32 %v11696_v0, 16  ;;  %v12109_v58 = vpop.eup %10247  ;;  %v9965_v31 = vld [vmem:[%s14182_s1 + $0x110] sm:$0xff]  }
 0x133   : > { %v2410_v20 = vsel %vm1454_vm3, %v14384_v50, %v2409_v5  ;;  %v2412_v26 = vsel %vm1454_vm3, %v2409_v5, %v14385_v41  ;;  %v12112_v50 = vsel %vm2713_vm2, %v2735_v45, %v2739_v29  ;;  %v14390_v19 = vshrl.u32 %v11750_v27, 16 }
 0x134   : > { %v2745_v24 = vrot.slane %v14386_v4, 4  ;;  %v2746_v14 = vrot.slane %v14387_v56, 5  ;;  %8951 = vmatmul.mubr.bf16.vlgmr.msra.gmra.mrb[0].mxu0 %v2410_v20  ;;  %14388 = vst [vmem:[#allocation67_spill] sm:$0xff] %v12112_v50  ;;  %v12115_v5 = vsel %vm2713_vm2, %v2739_v29, %v2743_v40  ;;  %v14391_v60 = vshll.u32 %v11750_v27, 16  ;;  %v9969_v56 = vld [vmem:[%s14182_s1 + $0x48] sm:$0xff]   ;;  %v10250_v45 = vpop.eup %10249  ;;  %8855 = vmatmul.mubr.bf16.vlgmr.msra.gmra.mrb[0].mxu1 %v11346_v25 }
 0x135   : > { %14389 = vst [vmem:[#allocation68_spill] sm:$0xff] %v12115_v5  ;;  %v2749_v36 = vrot.slane %v14390_v19, 4  ;;  %8983 = vmatpush3.bf16.msra.mxu0 %v11740_v32  ;;  %8954 = vmatprep.mubr.bf16.mxu0 %v2412_v26  ;;  %v870_v59 = vadd.f32 1.0, %v10244_v47  ;;  %10263 = vpow2.f32 %v7682_v23  ;;  %v869_v29 = vadd.f32 1.0, %v10246_v13  ;;  %v12128_v4 = vpop.eup %10251  ;;  %v12130_v32 = vpop.permute.xlu1 %1300 }
 0x136   : > { %v2750_v35 = vrot.slane %v14391_v60, 5  ;;  %10265 = vrcp.f32 %v865_v18  ;;  %8984 = vmatprep.subr.bf16.mxu0 %v9964_v57  ;;  %v2747_v20 = vor.u32 %v2746_v14, %v2745_v24  ;;  %v12132_v47 = vpop.permute.xlu0 %1295  ;;  %v2413_v23 = vrot.slane %v11497_v54, 4  ;;  %v12139_v19 = vpop.eup %10253  ;;  %8858 = vmatprep.mubr.bf16.mxu1 %v11377_v6 }
 0x137   : > { %10267 = vrcp.f32 %v868_v33  ;;  %v14269_v18 = vrot.slane %v11544_v28, 4  ;;  %v14392_v13 = vshrl.u32 %v11795_v16, 16  ;;  %9223 = vmatpush3.bf16.msra.mxu1 %v11782_v8  ;;  %v14395_v33 = vshll.u32 %v11795_v16, 16  ;;  %v12151_v60 = vpop.eup %10255  ;;  %v9966_v8 = vld [vmem:[%s14182_s1 + $0x118] sm:$0xff]  }
 0x138   : > { %v2751_v41 = vor.u32 %v2750_v35, %v2749_v36  ;;  %10269 = vrcp.f32 %v867_v43  ;;  %v12144_v14 = vsel %vm2713_vm2, %v2743_v40, %v2747_v20  ;;  %v872_v35 = vadd.f32 1.0, %v10250_v45  ;;  %9224 = vmatprep.subr.bf16.mxu1 %v9969_v56  ;;  %v9971_v40 = vld [vmem:[%s14182_s1 + $0x50] sm:$0xff]  }
 0x139   : > { %v2753_v26 = vrot.slane %v14392_v13, 4  ;;  %14393 = vst [vmem:[#allocation69_spill] sm:$0xff] %v12144_v14  ;;  %v2754_v36 = vrot.slane %v14395_v33, 5  ;;  %8985 = vmatpush3.bf16.msra.mxu0 %v9964_v57  ;;  %10271 = vrcp.f32 %v870_v59  ;;  %v12153_v13 = vpop.eup %10257  ;;  %v14397_v59 = vrot.slane %v11454_v63, 4  ;;  %v12182_v42 = vpop.permute.xlu1 %1310 }
 0x13a   : > { %v12147_v24 = vsel %vm2713_vm2, %v2747_v20, %v2751_v41  ;;  %10273 = vrcp.f32 %v869_v29  ;;  %8986 = vmatprep.subr.bf16.mxu0 %v9965_v31  ;;  %v14396_v20 = vshrl.u32 %v11839_v22, 16  ;;  %v10260_v57 = vpop.eup %10259  ;;  %v2416_v29 = vsel %vm1454_vm3, %v2413_v23, %v14269_v18 }
 0x13b   : > { %14394 = vst [vmem:[#allocation70_spill] sm:$0xff] %v12147_v24  ;;  %v2755_v43 = vor.u32 %v2754_v36, %v2753_v26  ;;  %v2414_v45 = vsel %vm1454_vm3, %v14397_v59, %v2413_v23  ;;  %v14398_v25 = vshll.u32 %v11839_v22, 16  ;;  %v14399_v24 = vshrl.u32 %v11884_v21, 16  ;;  %9225 = vmatpush3.bf16.msra.mxu1 %v9969_v56  ;;  %v9972_v56 = vld [vmem:[%s14182_s1 + $0x58] sm:$0xff]  }
 0x13c   : > { %v2757_v33 = vrot.slane %v14396_v20, 4  ;;  %8955 = vmatmul.mubr.bf16.gmra.mrb[4].mxu0 %v2414_v45  ;;  %v14401_v36 = vshll.u32 %v11884_v21, 16  ;;  %v14402_v59 = vshrl.u32 %v11920_v12, 16  ;;  %v14403_v50 = vshll.u32 %v11920_v12, 16  ;;  %v10262_v18 = vpop.eup %10261  ;;  %9226 = vmatprep.subr.bf16.mxu1 %v9971_v40 }
 0x13d   : > { %v2758_v6 = vrot.slane %v14398_v25, 5  ;;  %v2761_v14 = vrot.slane %v14399_v24, 4  ;;  %v12174_v26 = vsel %vm2713_vm2, %v2751_v41, %v2755_v43  ;;  %v12184_v25 = vpop.permute.xlu0 %1305  ;;  %8958 = vmatprep.mubr.bf16.mxu0 %v2416_v29  ;;  %10275 = vrcp.f32 %v872_v35  ;;  %8987 = vmatpush3.bf16.msra.mxu0 %v9965_v31  ;;  %v9967_v41 = vld [vmem:[%s14182_s1 + $0x120] sm:$0xff]  }
 0x13e   : > { %14400 = vst [vmem:[#allocation71_spill] sm:$0xff] %v12174_v26  ;;  %v2762_v20 = vrot.slane %v14401_v36, 5  ;;  %v2765_v5 = vrot.slane %v14402_v59, 4  ;;  %v2766_v23 = vrot.slane %v14403_v50, 5  ;;  %8988 = vmatprep.subr.bf16.mxu0 %v9966_v8  ;;  %8859 = vmatmul.mubr.bf16.gmra.mrb[4].mxu1 %v11408_v48  ;;  %v871_v29 = vadd.f32 1.0, %v10260_v57 }
 0x13f   : > { %v2759_v24 = vor.u32 %v2758_v6, %v2757_v33  ;;  %v10264_v36 = vpop.eup %10263  ;;  %v2417_v31 = vrot.slane %v11593_v61, 4  ;;  %v14404_v59 = vshrl.u32 %v11962_v17, 16  ;;  %8862 = vmatprep.mubr.bf16.mxu1 %v11454_v63  ;;  %9227 = vmatpush3.bf16.msra.mxu1 %v9971_v40  ;;  %v14407_v33 = vshll.u32 %v11962_v17, 16 }
 0x140   : > { %v2763_v45 = vor.u32 %v2762_v20, %v2761_v14  ;;  %v2767_v35 = vor.u32 %v2766_v23, %v2765_v5  ;;  %v12197_v15 = vpop.eup %10265  ;;  %v14408_v20 = vld [vmem:[#allocation21_spill] sm:$0xff]  ;;  %v874_v63 = vadd.f32 1.0, %v10262_v18  ;;  %9228 = vmatprep.subr.bf16.mxu1 %v9972_v56  ;;  %v873_v51 = vadd.f32 1.0, %v10264_v36 }
 0x141   : > { %v2769_v26 = vrot.slane %v14404_v59, 4  ;;  %v12202_v6 = vsel %vm2713_vm2, %v2755_v43, %v2759_v24  ;;  %v2770_v57 = vrot.slane %v14407_v33, 5  ;;  %v10268_v5 = vpop.eup %10267  ;;  %v1020_v23 = vmul.f32 %v11825_v9, %v14408_v20  ;;  %v14409_v59 = vld [vmem:[#allocation22_spill] sm:$0xff]  ;;  %8989 = vmatpush3.bf16.msra.mxu0 %v9966_v8  ;;  %v9970_v43 = vld [vmem:[%s14182_s1 + $0x128] sm:$0xff]   ;;  %v14412_v20 = vld [vmem:[#allocation25_spill] sm:$0xff]  ;;  %v12228_v48 = vpop.permute.xlu0 %1315 }
 0x142   : > { %14405 = vst [vmem:[#allocation72_spill] sm:$0xff] %v12202_v6  ;;  %v12205_v14 = vsel %vm2713_vm2, %v2759_v24, %v2763_v45  ;;  %v1019_v50 = vmul.f32 %v11897_v53, %v14409_v59  ;;  %v10270_v40 = vpop.eup %10269  ;;  %8990 = vmatprep.subr.bf16.mxu0 %v9967_v41  ;;  %v9974_v24 = vld [vmem:[%s14182_s1 + $0x60] sm:$0xff]   ;;  %v12220_v33 = vsel %vm2713_vm2, %v2763_v45, %v2767_v35  ;;  %v14411_v53 = vshrl.u32 %v11998_v44, 16  ;;  %v12226_v59 = vpop.permute.xlu1 %1320 }
 0x143   : > { %14406 = vst [vmem:[#allocation73_spill] sm:$0xff] %v12205_v14  ;;  %14410 = vst [vmem:[#allocation21_spill] sm:$0xff] %v12220_v33  ;;  %v2771_v9 = vor.u32 %v2770_v57, %v2769_v26  ;;  %v10272_v8 = vpop.eup %10271  ;;  %v1024_v36 = vmul.f32 %v12109_v58, %v14412_v20  ;;  %10277 = vrcp.f32 %v871_v29  ;;  %v14413_v14 = vrot.slane %v11544_v28, 4  ;;  %v14415_v57 = vld [vmem:[#allocation26_spill] sm:$0xff]  ;;  %9229 = vmatpush3.bf16.msra.mxu1 %v9972_v56  ;;  %v14417_v29 = vld [vmem:[#allocation23_spill] sm:$0xff] }
 0x144   : > { %v2775_v18 = vrot.slane %v14411_v53, 4  ;;  %v14414_v45 = vshll.u32 %v11998_v44, 16  ;;  %v10274_v26 = vpop.eup %10273  ;;  %v1023_v53 = vmul.f32 %v12128_v4, %v14415_v57  ;;  %v14416_v39 = vrot.slane %v11649_v49, 4  ;;  %v9975_v4 = vld [vmem:[%s14182_s1 + $0x68] sm:$0xff]   ;;  %9230 = vmatprep.subr.bf16.mxu1 %v9974_v24 }
 0x145   : > { %v2418_v6 = vsel %vm1454_vm3, %v14413_v14, %v2417_v31  ;;  %v12241_v20 = vsel %vm2713_vm2, %v2767_v35, %v2771_v9  ;;  %v1022_v2 = vmul.f32 %v11937_v38, %v14417_v29  ;;  %v14418_v14 = vld [vmem:[#allocation24_spill] sm:$0xff]  ;;  %10279 = vrcp.f32 %v874_v63  ;;  %8991 = vmatpush3.bf16.msra.mxu0 %v9967_v41  ;;  %v1326_v57 = vpop.permute.xlu0 %1325 }
 0x146   : > { %v2776_v33 = vrot.slane %v14414_v45, 5  ;;  %8959 = vmatmul.mubr.bf16.gmra.mrb[8].mxu0 %v2418_v6  ;;  %v2420_v58 = vsel %vm1454_vm3, %v2417_v31, %v14416_v39  ;;  %v1021_v44 = vmul.f32 %v12009_v34, %v14418_v14  ;;  %v14419_v6 = vld [vmem:[#allocation27_spill] sm:$0xff]  ;;  %v14420_v56 = vld [vmem:[#allocation28_spill] sm:$0xff]  ;;  %10281 = vrcp.f32 %v873_v51  ;;  %8992 = vmatprep.subr.bf16.mxu0 %v9970_v43 }
 0x147   : > { %8962 = vmatprep.mubr.bf16.mxu0 %v2420_v58  ;;  %v1026_v39 = vmul.f32 %v12139_v19, %v14419_v6  ;;  %v1025_v31 = vmul.f32 %v12151_v60, %v14420_v56  ;;  %v9973_v38 = vld [vmem:[%s14182_s1 + $0x130] sm:$0xff]   ;;  %v10276_v63 = vpop.eup %10275  ;;  %v1398_v41 = vmul.f32 %v12011_v62, %v1020_v23  ;;  %v1397_v35 = vmul.f32 %v12013_v37, %v1019_v50  ;;  %v14421_v62 = vld [vmem:[#allocation30_spill] sm:$0xff]  ;;  %v1331_v50 = vpop.permute.xlu1 %1330 }
 0x148   : > { %v12257_v34 = vor.u32 %v2776_v33, %v2775_v18  ;;  %8863 = vmatmul.mubr.bf16.gmra.mrb[8].mxu1 %v11497_v54  ;;  %v2421_v19 = vrot.slane %v11696_v0, 4  ;;  %v2423_v60 = vrot.slane %v11750_v27, 4  ;;  %v1402_v51 = vmul.f32 %v12089_v10, %v1024_v36  ;;  %v14422_v23 = vld [vmem:[#allocation42_spill] sm:$0xff]  ;;  %v14423_v10 = vld [vmem:[#allocation33_spill] sm:$0xff]  ;;  %v14424_v36 = vld [vmem:[#allocation36_spill] sm:$0xff] }
 0x149   : > { %v1401_v45 = vmul.f32 %v12091_v55, %v1023_v53  ;;  %8866 = vmatprep.mubr.bf16.mxu1 %v11544_v28  ;;  %9231 = vmatpush3.bf16.msra.mxu1 %v9974_v24  ;;  %v1028_v37 = vmul.f32 %v12153_v13, %v14421_v62  ;;  %v1032_v18 = vmul.f32 %v10272_v8, %v14422_v23  ;;  %v14425_v53 = vld [vmem:[#allocation37_spill] sm:$0xff] }
 0x14a   : > { %v12269_v33 = vsel %vm2713_vm2, %v2771_v9, %v12257_v34  ;;  %v1031_v58 = vmul.f32 %v10274_v26, %v11723_v7  ;;  %8993 = vmatpush3.bf16.msra.mxu0 %v9970_v43  ;;  %9232 = vmatprep.subr.bf16.mxu1 %v9975_v4  ;;  %v1027_v55 = vmul.f32 %v12197_v15, %v14423_v10  ;;  %v9976_v13 = vld [vmem:[%s14182_s1 + $0x138] sm:$0xff]   ;;  %v9977_v7 = vld [vmem:[%s14182_s1 + $0x70] sm:$0xff]  }
 0x14b   : > { %v1030_v24 = vmul.f32 %v10268_v5, %v14424_v36  ;;  %v1029_v29 = vmul.f32 %v10270_v40, %v14425_v53  ;;  %v12280_v9 = vmul.f32 %v10276_v63, %v11837_v11  ;;  %8994 = vmatprep.subr.bf16.mxu0 %v9973_v38  ;;  %v12288_v43 = vpack.c.bf16 %v1398_v41, %v1397_v35  ;;  %v1341_v35 = vpop.permute.xlu1 %1340 }
 0x14c   : > { %v1400_v15 = vmul.f32 %v12051_v52, %v1022_v2  ;;  %v14426_v5 = vrot.slane %v11649_v49, 4  ;;  %v2424_v11 = vsel %vm1454_vm3, %v2421_v19, %v2423_v60  ;;  %v1399_v8 = vmul.f32 %v12053_v1, %v1021_v44  ;;  %v9978_v52 = vld [vmem:[%s14182_s1 + $0x78] sm:$0xff]  }
 0x14d   : > { %v12296_v26 = vpack.c.bf16 %v1402_v51, %v1401_v45  ;;  %v1404_v14 = vmul.f32 %v12130_v32, %v1026_v39  ;;  %9233 = vmatpush3.bf16.msra.mxu1 %v9975_v4  ;;  %v10278_v6 = vpop.eup %10277  ;;  %v1403_v56 = vmul.f32 %v12132_v47, %v1025_v31  ;;  %v1410_v63 = vmul.f32 %v1331_v50, %v1032_v18  ;;  %v12311_v47 = vld [vmem:[%s14182_s1 + $0x140] sm:$0xff]  }
 0x14e   : > { %v2422_v40 = vsel %vm1454_vm3, %v14426_v5, %v2421_v19  ;;  %v1409_v41 = vmul.f32 %v1326_v57, %v1031_v58  ;;  %v2425_v2 = vrot.slane %v11795_v16, 4  ;;  %8995 = vmatpush3.bf16.msra.mxu0 %v9973_v38  ;;  %v1406_v44 = vmul.f32 %v12182_v42, %v1028_v37  ;;  %9234 = vmatprep.subr.bf16.mxu1 %v9977_v7  ;;  %v1336_v42 = vpop.permute.xlu0 %1335  ;;  %v12332_v18 = vld [vmem:[%s14182_s1] sm:$0xff]  }
 0x14f   : > { %8963 = vmatmul.mubr.bf16.gmra.mrb[12].mxu0 %v2422_v40  ;;  %v1405_v1 = vmul.f32 %v12184_v25, %v1027_v55  ;;  %v2427_v32 = vrot.slane %v11839_v22, 4  ;;  %v2429_v4 = vrot.slane %v11884_v21, 4  ;;  %8996 = vmatprep.subr.bf16.mxu0 %v9976_v13  ;;  %v10280_v39 = vpop.eup %10279  ;;  %v1408_v31 = vmul.f32 %v12226_v59, %v1030_v24 }
 0x150   : > { %8966 = vmatprep.mubr.bf16.mxu0 %v2424_v11  ;;  %v1407_v38 = vmul.f32 %v12228_v48, %v1029_v29  ;;  %8867 = vmatmul.mubr.bf16.gmra.mrb[12].mxu1 %v11593_v61  ;;  %v2780_v25 = vshrl.u32 %v12288_v43, 16  ;;  %v2783_v19 = vshll.u32 %v12288_v43, 16  ;;  %v10282_v51 = vpop.eup %10281  ;;  %v12318_v45 = vpack.c.bf16 %v1400_v15, %v1399_v8 }
 0x151   : > { %v1033_v62 = vmul.f32 %v10278_v6, %v11852_v46  ;;  %8870 = vmatprep.mubr.bf16.mxu1 %v11649_v49  ;;  %v2431_v37 = vrot.slane %v11920_v12, 4  ;;  %9235 = vmatpush3.bf16.msra.mxu1 %v9977_v7  ;;  %v3641_v48 = vshll.u32 %v12296_v26, 16  ;;  %v12324_v59 = vpack.c.bf16 %v1404_v14, %v1403_v56 }
 0x152   : > { %v12326_v50 = vpack.c.bf16 %v1410_v63, %v1409_v41  ;;  %v2426_v23 = vsel %vm1454_vm3, %v2423_v60, %v2425_v2  ;;  %8997 = vmatpush3.bf16.msra.mxu0 %v9976_v13  ;;  %9236 = vmatprep.subr.bf16.mxu1 %v9978_v52  ;;  %v5244_v46 = vshrl.u32 %v12296_v26, 16  ;;  %v12335_v57 = vpack.c.bf16 %v1406_v44, %v1405_v1  ;;  %v1346_v15 = vpop.permute.xlu0 %1345 }
 0x153   : > { %v1036_v58 = vmul.f32 %v10280_v39, %v11933_v30  ;;  %v2428_v10 = vsel %vm1454_vm3, %v2425_v2, %v2427_v32  ;;  %v2430_v55 = vsel %vm1454_vm3, %v2427_v32, %v2429_v4  ;;  %9030 = vmatprep.subr.bf16.mxu0 %v12311_v47  ;;  %v12341_v60 = vpack.c.bf16 %v1408_v31, %v1407_v38 }
 0x154   : > { %v1035_v36 = vmul.f32 %v10282_v51, %v12071_v3  ;;  %v2782_v24 = vrot.slane %v2780_v25, 4  ;;  %v2785_v53 = vrot.slane %v2783_v19, 5  ;;  %v2432_v30 = vsel %vm1454_vm3, %v2429_v4, %v2431_v37  ;;  %v1351_v3 = vpop.permute.xlu1 %1350 }
 0x155   : > { %9237 = vmatpush3.bf16.msra.mxu1 %v9978_v52  ;;  %v3633_v29 = vshll.u32 %v12318_v45, 16  ;;  %v3637_v13 = vshrl.u32 %v12318_v45, 16  ;;  %v5983_v7 = vrot.slane %v3641_v48, 5  ;;  %v5248_v5 = vshll.u32 %v12324_v59, 16 }
 0x156   : > { %9254 = vmatprep.subr.bf16.mxu1 %v12332_v18  ;;  %v5982_v40 = vrot.slane %v5244_v46, 4  ;;  %v5252_v11 = vshrl.u32 %v12324_v59, 16  ;;  %v5276_v8 = vshrl.u32 %v12326_v50, 16  ;;  %v1412_v14 = vmul.f32 %v1341_v35, %v12280_v9 }
 0x157   : > { %8967 = vmatmul.mubr.bf16.gmra.mrb[16].mxu0 %v2426_v23  ;;  %v1411_v6 = vmul.f32 %v1336_v42, %v1033_v62  ;;  %v5256_v56 = vshll.u32 %v12335_v57, 16  ;;  %v5260_v63 = vshrl.u32 %v12335_v57, 16  ;;  %v5264_v41 = vshll.u32 %v12341_v60, 16 }
 0x158   : > { %8970 = vmatprep.mubr.bf16.mxu0 %v2428_v10  ;;  %8871 = vmatmul.mubr.bf16.gmra.mrb[16].mxu1 %v11696_v0  ;;  %v5268_v2 = vshrl.u32 %v12341_v60, 16  ;;  %v5272_v52 = vshll.u32 %v12326_v50, 16  ;;  %v12368_v44 = vor.u32 %v2785_v53, %v2782_v24  ;;  %v1414_v1 = vmul.f32 %v1351_v3, %v1036_v58 }
 0x159   : > { %v1413_v32 = vmul.f32 %v1346_v15, %v1035_v36  ;;  %8874 = vmatprep.mubr.bf16.mxu1 %v11750_v27  ;;  %v5978_v9 = vrot.slane %v3637_v13, 4  ;;  %v5979_v4 = vrot.slane %v3633_v29, 5  ;;  %v5998_v39 = vrot.slane %v5276_v8, 4 }
 0x15a   : > { %v5984_v31 = vor.u32 %v5983_v7, %v5982_v40  ;;  %v5986_v38 = vrot.slane %v5252_v11, 4  ;;  %v5987_v35 = vrot.slane %v5248_v5, 5  ;;  %v12379_v42 = vpack.c.bf16 %v1412_v14, %v1411_v6 }
 0x15b   : > { %v5980_v51 = vor.u32 %v5979_v4, %v5978_v9  ;;  %v5990_v62 = vrot.slane %v5260_v63, 4  ;;  %v5991_v23 = vrot.slane %v5256_v56, 5  ;;  %v5994_v10 = vrot.slane %v5268_v2, 4 }
 0x15c   : > { %v5988_v58 = vor.u32 %v5987_v35, %v5986_v38  ;;  %v5995_v36 = vrot.slane %v5264_v41, 5  ;;  %v5999_v24 = vrot.slane %v5272_v52, 5  ;;  %v12389_v53 = vpack.c.bf16 %v1414_v1, %v1413_v32  ;;  %v14427_v1 = vld [vmem:[#allocation58_spill] sm:$0xff] }
 0x15d   : > { %v12393_v7 = vsel %vm2713_vm2, %v12368_v44, %v5980_v51  ;;  %v12396_v3 = vsel %vm2713_vm2, %v5980_v51, %v5984_v31  ;;  %v5992_v15 = vor.u32 %v5991_v23, %v5990_v62  ;;  %v2435_v32 = vrot.slane %v14427_v1, 4 }
 0x15e   : > { %v12399_v40 = vsel %vm2713_vm2, %v5984_v31, %v5988_v58  ;;  %v5996_v14 = vor.u32 %v5995_v36, %v5994_v10  ;;  %v12401_v6 = vor.u32 %v5999_v24, %v5998_v39  ;;  %v12417_v39 = vrot.slane %v5272_v52, 1 }
 0x15f   : > { %8971 = vmatmul.mubr.bf16.gmra.mrb[20].mxu0 %v2430_v55  ;;  %v12404_v9 = vsel %vm2713_vm2, %v5988_v58, %v5992_v15  ;;  %v2433_v55 = vrot.slane %v11962_v17, 4  ;;  %v14278_v31 = vshll.u32 %v12379_v42, 16  ;;  %v14277_v38 = vshll.u32 %v12389_v53, 16 }
 0x160   : > { %8974 = vmatprep.mubr.bf16.mxu0 %v2432_v30  ;;  %8875 = vmatmul.mubr.bf16.gmra.mrb[20].mxu1 %v11795_v16  ;;  %v12410_v4 = vsel %vm2713_vm2, %v5992_v15, %v5996_v14  ;;  %v12414_v30 = vsel %vm2713_vm2, %v5996_v14, %v12401_v6  ;;  %v12426_v62 = vor.u32 %v5276_v8, %v12417_v39  ;;  %v6003_v23 = vshrl.u32 %v12379_v42, 16  ;;  %v14428_v14 = vld [vmem:[#allocation51_spill] sm:$0xff] }
 0x161   : > { %8878 = vmatprep.mubr.bf16.mxu1 %v11839_v22  ;;  %v2434_v35 = vsel %vm1454_vm3, %v2431_v37, %v2433_v55  ;;  %v2436_v51 = vsel %vm1454_vm3, %v2433_v55, %v2435_v32  ;;  %v6574_v52 = vrot.slane %v14278_v31, 1  ;;  %v12433_v58 = vrot.slane %v14277_v38, 1  ;;  %v14429_v55 = vld [vmem:[#allocation63_spill] sm:$0xff] }
 0x162   : > { %v2437_v8 = vrot.slane %v12288_v43, 4  ;;  %v3629_v15 = vrot.slane %v2783_v19, 1  ;;  %v9982_v19 = vld [vmem:[%s14182_s1 + $0x148] sm:$0xff]   ;;  %v3090_v31 = vrot.slane %v11962_v17, 5 }
 0x163   : > { %v12437_v10 = vsel %vm1496_vm1, %v12426_v62, %v6574_v52  ;;  %v6576_v37 = vor.u32 %v6574_v52, %v6003_v23 }
 0x164   : > { %v2438_v24 = vsel %vm1454_vm3, %v2435_v32, %v2437_v8  ;;  %v3635_v32 = vrot.slane %v3633_v29, 1  ;;  %v9981_v29 = vld [vmem:[%s14182_s1 + $0x8] sm:$0xff]  }
 0x165   : > { %v12446_v36 = vsel %vm1496_vm1, %v6576_v37, %v12433_v58  ;;  %v3643_v37 = vrot.slane %v3641_v48, 1  ;;  %v5250_v48 = vrot.slane %v5248_v5, 1 }
 0x167   : > { %8975 = vmatmul.mubr.bf16.gmra.mrb[24].mxu0 %v2434_v35  ;;  %v14430_v35 = vshrl.u32 %v14427_v1, 16  ;;  %v5254_v5 = vor.u32 %v5252_v11, %v5250_v48  ;;  %v5266_v11 = vrot.slane %v5264_v41, 1 }
 0x168   : > { %8978 = vmatprep.mubr.bf16.mxu0 %v2436_v51  ;;  %8879 = vmatmul.mubr.bf16.gmra.mrb[24].mxu1 %v11884_v21 }
 0x169   : > { %8882 = vmatprep.mubr.bf16.mxu1 %v11920_v12  ;;  %v3628_v51 = vor.u32 %v14430_v35, %v14429_v55  ;;  %v14432_v55 = vld [vmem:[#allocation60_spill] sm:$0xff]  ;;  %v3639_v35 = vor.u32 %v3637_v13, %v3635_v32  ;;  %v5270_v41 = vor.u32 %v5268_v2, %v5266_v11 }
 0x16a   : > { %v9983_v13 = vld [vmem:[%s14182_s1 + $0x10] sm:$0xff]  }
 0x16b   : > { %v12459_v52 = vsel %vm1496_vm1, %v3628_v51, %v3629_v15  ;;  %v9989_v2 = vld [vmem:[%s14182_s1 + $0x30] sm:$0xff]  }
 0x16f   : > { %8979 = vmatmul.mubr.bf16.gmra.mrb[28].mxu0 %v2438_v24  ;;  %v3631_v24 = vor.u32 %v3629_v15, %v2780_v25  ;;  %v9985_v25 = vld [vmem:[%s14182_s1 + $0x150] sm:$0xff]   ;;  %v5258_v15 = vrot.slane %v5256_v56, 1  ;;  %v9984_v56 = vld [vmem:[%s14182_s1 + $0x18] sm:$0xff]  }
 0x170   : > { %8998 = vmatprep.mubr.bf16.mxu0 %v14428_v14  ;;  %8883 = vmatmul.mubr.bf16.gmra.mrb[28].mxu1 %v11962_v17  ;;  %v14431_v14 = vld [vmem:[#allocation52_spill] sm:$0xff] }
 0x171   : > { %9238 = vmatprep.mubr.bf16.mxu1 %v12459_v52  ;;  %v12480_v51 = vsel %vm1496_vm1, %v3631_v24, %v3635_v32  ;;  %v9988_v32 = vld [vmem:[%s14182_s1 + $0x158] sm:$0xff]   ;;  %v14433_v24 = vld [vmem:[#allocation64_spill] sm:$0xff] }
 0x177   : > { %8999 = vmatmul.mubr.bf16.vlgmr.msra.gmra.mrb[0].mxu0 %v14431_v14 }
 0x178   : > { %9031 = vmatpush3.bf16.msra.mxu0 %v12311_v47  ;;  %9002 = vmatprep.mubr.bf16.mxu0 %v14432_v55  ;;  %v12487_v47 = vsel %vm1496_vm1, %v3639_v35, %v3643_v37  ;;  %v12515_v55 = vsel %vm1496_vm1, %v5254_v5, %v5258_v15  ;;  %v9994_v35 = vld [vmem:[%s14182_s1 + $0x168] sm:$0xff]   ;;  %v12565_v5 = vld [vmem:[%s14182_s1 + $0x180] sm:$0xff]  }
 0x179   : > { %9032 = vmatprep.subr.bf16.mxu0 %v9982_v19  ;;  %9239 = vmatmul.mubr.bf16.vlgmr.msra.gmra.mrb[32].mxu1 %v12480_v51 }
 0x17a   : > { %9242 = vmatprep.mubr.bf16.mxu1 %v12487_v47  ;;  %9255 = vmatpush3.bf16.msra.mxu1 %v12332_v18  ;;  %v5246_v18 = vor.u32 %v5244_v46, %v3643_v37  ;;  %v9991_v46 = vld [vmem:[%s14182_s1 + $0x160] sm:$0xff]  }
 0x17b   : > { %9256 = vmatprep.subr.bf16.mxu1 %v9981_v29  ;;  %v9986_v37 = vld [vmem:[%s14182_s1 + $0x20] sm:$0xff]  }
 0x17c   : > { %9033 = vmatpush3.bf16.msra.mxu0 %v9982_v19  ;;  %v14434_v19 = vld [vmem:[#allocation66_spill] sm:$0xff]  ;;  %v12511_v14 = vsel %vm1496_vm1, %v5246_v18, %v5250_v48  ;;  %v14436_v48 = vld [vmem:[#allocation68_spill] sm:$0xff] }
 0x17d   : > { %9034 = vmatprep.subr.bf16.mxu0 %v9985_v25  ;;  %v14438_v18 = vld [vmem:[#allocation70_spill] sm:$0xff] }
 0x17e   : > { %9257 = vmatpush3.bf16.msra.mxu1 %v9981_v29  ;;  %v14435_v29 = vld [vmem:[#allocation67_spill] sm:$0xff] }
 0x17f   : > { %9003 = vmatmul.mubr.bf16.gmra.mrb[4].mxu0 %v14433_v24  ;;  %9258 = vmatprep.subr.bf16.mxu1 %v9983_v13  ;;  %v12544_v24 = vsel %vm1496_vm1, %v5270_v41, %v12417_v39  ;;  %v10000_v39 = vld [vmem:[%s14182_s1 + $0x178] sm:$0xff]   ;;  %v9999_v41 = vld [vmem:[%s14182_s1 + $0xa8] sm:$0xff]  }
 0x180   : > { %9006 = vmatprep.mubr.bf16.mxu0 %v14434_v19  ;;  %9035 = vmatpush3.bf16.msra.mxu0 %v9985_v25  ;;  %v5262_v25 = vor.u32 %v5260_v63, %v5258_v15  ;;  %v9997_v63 = vld [vmem:[%s14182_s1 + $0x170] sm:$0xff]   ;;  %v9990_v19 = vld [vmem:[%s14182_s1 + $0x38] sm:$0xff]  }
 0x181   : > { %9243 = vmatmul.mubr.bf16.gmra.mrb[36].mxu1 %v12511_v14  ;;  %9036 = vmatprep.subr.bf16.mxu0 %v9988_v32  ;;  %v14437_v15 = vld [vmem:[#allocation69_spill] sm:$0xff] }
 0x182   : > { %9246 = vmatprep.mubr.bf16.mxu1 %v12515_v55  ;;  %9259 = vmatpush3.bf16.msra.mxu1 %v9983_v13  ;;  %v9987_v13 = vld [vmem:[%s14182_s1 + $0x28] sm:$0xff]  }
 0x183   : > { %9260 = vmatprep.subr.bf16.mxu1 %v9984_v56 }
 0x184   : > { %9037 = vmatpush3.bf16.msra.mxu0 %v9988_v32  ;;  %v12539_v32 = vsel %vm1496_vm1, %v5262_v25, %v5266_v11  ;;  %v9993_v11 = vld [vmem:[%s14182_s1 + $0x88] sm:$0xff]   ;;  %v9996_v25 = vld [vmem:[%s14182_s1 + $0x98] sm:$0xff]  }
 0x185   : > { %9038 = vmatprep.subr.bf16.mxu0 %v9991_v46 }
 0x186   : > { %9261 = vmatpush3.bf16.msra.mxu1 %v9984_v56  ;;  %v9992_v56 = vld [vmem:[%s14182_s1 + $0x80] sm:$0xff]  }
 0x187   : > { %9007 = vmatmul.mubr.bf16.gmra.mrb[8].mxu0 %v14435_v29  ;;  %9262 = vmatprep.subr.bf16.mxu1 %v9986_v37  ;;  %v14442_v29 = vld [vmem:[#allocation21_spill] sm:$0xff] }
 0x188   : > { %9010 = vmatprep.mubr.bf16.mxu0 %v14436_v48  ;;  %9039 = vmatpush3.bf16.msra.mxu0 %v9991_v46  ;;  %v14439_v46 = vld [vmem:[#allocation71_spill] sm:$0xff] }
 0x189   : > { %9247 = vmatmul.mubr.bf16.gmra.mrb[40].mxu1 %v12539_v32  ;;  %9040 = vmatprep.subr.bf16.mxu0 %v9994_v35  ;;  %v9998_v48 = vld [vmem:[%s14182_s1 + $0xa0] sm:$0xff]  }
 0x18a   : > { %9250 = vmatprep.mubr.bf16.mxu1 %v12544_v24  ;;  %9263 = vmatpush3.bf16.msra.mxu1 %v9986_v37  ;;  %v9995_v37 = vld [vmem:[%s14182_s1 + $0x90] sm:$0xff]  }
 0x18b   : > { %9264 = vmatprep.subr.bf16.mxu1 %v9987_v13 }
 0x18c   : > { %9041 = vmatpush3.bf16.msra.mxu0 %v9994_v35  ;;  %v14441_v35 = vld [vmem:[#allocation73_spill] sm:$0xff] }
 0x18d   : > { %9042 = vmatprep.subr.bf16.mxu0 %v9997_v63 }
 0x18e   : > { %9265 = vmatpush3.bf16.msra.mxu1 %v9987_v13  ;;  %v14443_v13 = vld [vmem:[#allocation31_spill] sm:$0xff] }
 0x18f   : > { %9011 = vmatmul.mubr.bf16.gmra.mrb[12].mxu0 %v14437_v15  ;;  %9266 = vmatprep.subr.bf16.mxu1 %v9989_v2  ;;  %v3908_v15 = vrot.slane %v12288_v43, 1 }
 0x190   : > { %9014 = vmatprep.mubr.bf16.mxu0 %v14438_v18  ;;  %9043 = vmatpush3.bf16.msra.mxu0 %v9997_v63  ;;  %v3064_v63 = vrot.slane %v14443_v13, 5  ;;  %v10005_v13 = vld [vmem:[%s14182_s1 + $0xc8] sm:$0xff]  }
 0x191   : > { %9251 = vmatmul.mubr.bf16.gmra.mrb[44].mxu1 %v12426_v62  ;;  %9044 = vmatprep.subr.bf16.mxu0 %v10000_v39  ;;  %v14440_v62 = vld [vmem:[#allocation72_spill] sm:$0xff] }
 0x192   : > { %9267 = vmatpush3.bf16.msra.mxu1 %v9989_v2  ;;  %9270 = vmatprep.mubr.bf16.mxu1 %v14427_v1  ;;  %v14444_v2 = vld [vmem:[#allocation29_spill] sm:$0xff] }
 0x193   : > { %9268 = vmatprep.subr.bf16.mxu1 %v9990_v19 }
 0x194   : > { %9045 = vmatpush3.bf16.msra.mxu0 %v10000_v39  ;;  %v2787_v39 = vsel %vm2713_vm2, %v12257_v34, %v12368_v44  ;;  %v14446_v34 = vld [vmem:[#allocation32_spill] sm:$0xff] }
 0x195   : > { %9078 = vmatprep.subr.bf16.mxu0 %v12565_v5  ;;  %v3066_v44 = vrot.slane %v14446_v34, 5 }
 0x196   : > { %9269 = vmatpush3.bf16.msra.mxu1 %v9990_v19  ;;  %v10002_v19 = vld [vmem:[%s14182_s1 + $0xb8] sm:$0xff]  }
 0x197   : > { %9015 = vmatmul.mubr.bf16.gmra.mrb[16].mxu0 %v14439_v46  ;;  %9286 = vmatprep.subr.bf16.mxu1 %v9992_v56 }
 0x198   : > { %9018 = vmatprep.mubr.bf16.mxu0 %v14440_v62  ;;  %v14447_v62 = vld [vmem:[#allocation34_spill] sm:$0xff] }
 0x199   : > { %9271 = vmatmul.mubr.bf16.vlgmr.msra.gmra.mrb[32].mxu1 %v12288_v43 }
 0x19a   : > { %9274 = vmatprep.mubr.bf16.mxu1 %v12318_v45  ;;  %9287 = vmatpush3.bf16.msra.mxu1 %v9992_v56  ;;  %v14445_v56 = vrot.slane %v14427_v1, 1 }
 0x19b   : > { %9288 = vmatprep.subr.bf16.mxu1 %v9993_v11 }
 0x19c   : > { %v12616_v46 = vsel %vm2097_vm0, %v14445_v56, %v3908_v15  ;;  %v10012_v56 = vld [vmem:[%s14182_s1 + $0x198] sm:$0xff]  }
 0x19e   : > { %9289 = vmatpush3.bf16.msra.mxu1 %v9993_v11  ;;  %v3068_v11 = vrot.slane %v14447_v62, 5 }
 0x19f   : > { %9019 = vmatmul.mubr.bf16.gmra.mrb[20].mxu0 %v14441_v35  ;;  %9290 = vmatprep.subr.bf16.mxu1 %v9995_v37  ;;  %v10004_v35 = vld [vmem:[%s14182_s1 + $0xc0] sm:$0xff]  }
 0x1a0   : > { %9022 = vmatprep.mubr.bf16.mxu0 %v14442_v29  ;;  %v10006_v29 = vld [vmem:[%s14182_s1 + $0x188] sm:$0xff]  }
 0x1a1   : > { %9275 = vmatmul.mubr.bf16.gmra.mrb[36].mxu1 %v12296_v26 }
 0x1a2   : > { %9278 = vmatprep.mubr.bf16.mxu1 %v12324_v59  ;;  %9291 = vmatpush3.bf16.msra.mxu1 %v9995_v37  ;;  %v3910_v37 = vrot.slane %v12318_v45, 1 }
 0x1a3   : > { %9292 = vmatprep.subr.bf16.mxu1 %v9996_v25 }
 0x1a6   : > { %9293 = vmatpush3.bf16.msra.mxu1 %v9996_v25  ;;  %v3067_v25 = vsel %vm3062_vm4, %v3064_v63, %v3066_v44 }
 0x1a7   : > { %9023 = vmatmul.mubr.bf16.gmra.mrb[24].mxu0 %v12241_v20  ;;  %9294 = vmatprep.subr.bf16.mxu1 %v9998_v48  ;;  %v10001_v20 = vld [vmem:[%s14182_s1 + $0xb0] sm:$0xff]  }
 0x1a8   : > { %9026 = vmatprep.mubr.bf16.mxu0 %v12269_v33  ;;  %v3063_v33 = vrot.slane %v14444_v2, 5 }
 0x1a9   : > { %9279 = vmatmul.mubr.bf16.gmra.mrb[40].mxu1 %v12335_v57 }
 0x1aa   : > { %9282 = vmatprep.mubr.bf16.mxu1 %v12341_v60  ;;  %9295 = vmatpush3.bf16.msra.mxu1 %v9998_v48  ;;  %v3065_v18 = vsel %vm3062_vm4, %v3063_v33, %v3064_v63  ;;  %v3912_v48 = vrot.slane %v12296_v26, 1  ;;  %v10009_v63 = vld [vmem:[%s14182_s1 + $0x190] sm:$0xff]   ;;  %v3072_v33 = vrot.slane %v11544_v28, 5 }
 0x1ab   : > { %9296 = vmatprep.subr.bf16.mxu1 %v9999_v41 }
 0x1ac   : > { %v12643_v2 = vsel %vm2097_vm0, %v3910_v37, %v3912_v48 }
 0x1ae   : > { %9297 = vmatpush3.bf16.msra.mxu1 %v9999_v41  ;;  %v3069_v41 = vsel %vm3062_vm4, %v3066_v44, %v3068_v11 }
 0x1af   : > { %9027 = vmatmul.mubr.bf16.gmra.mrb[28].mxu0 %v2787_v39  ;;  %9298 = vmatprep.subr.bf16.mxu1 %v10001_v20  ;;  %v10007_v39 = vld [vmem:[%s14182_s1 + $0xd0] sm:$0xff]  }
 0x1b0   : > { %9046 = vmatprep.mubr.bf16.mxu0 %v3065_v18 }
 0x1b1   : > { %9283 = vmatmul.mubr.bf16.gmra.mrb[48].mxu1 %v12326_v50 }
 0x1b2   : > { %9299 = vmatpush3.bf16.msra.mxu1 %v10001_v20  ;;  %9302 = vmatprep.mubr.bf16.mxu1 %v12616_v46  ;;  %v12636_v20 = vsel %vm2097_vm0, %v3908_v15, %v3910_v37  ;;  %v5592_v15 = vrot.slane %v12324_v59, 1  ;;  %v10008_v37 = vld [vmem:[%s14182_s1 + $0xd8] sm:$0xff]  }
 0x1b3   : > { %9300 = vmatprep.subr.bf16.mxu1 %v10002_v19 }
 0x1b6   : > { %9301 = vmatpush3.bf16.msra.mxu1 %v10002_v19  ;;  %v5594_v19 = vrot.slane %v12335_v57, 1 }
 0x1b7   : > { %9047 = vmatmul.mubr.bf16.vlgmr.msra.gmra.mrb[0].mxu0 %v3067_v25  ;;  %9318 = vmatprep.subr.bf16.mxu1 %v10004_v35  ;;  %v10015_v25 = vld [vmem:[%s14182_s1 + $0x1a0] sm:$0xff]  }
 0x1b8   : > { %9079 = vmatpush3.bf16.msra.mxu0 %v12565_v5  ;;  %9050 = vmatprep.mubr.bf16.mxu0 %v3069_v41  ;;  %v3070_v5 = vrot.slane %v11497_v54, 5  ;;  %v3076_v41 = vrot.slane %v11649_v49, 5 }
 0x1b9   : > { %9080 = vmatprep.subr.bf16.mxu0 %v10006_v29  ;;  %9303 = vmatmul.mubr.bf16.vlgmr.msra.gmra.mrb[32].mxu1 %v12636_v20 }
 0x1ba   : > { %9306 = vmatprep.mubr.bf16.mxu1 %v12643_v2  ;;  %9319 = vmatpush3.bf16.msra.mxu1 %v10004_v35  ;;  %v3071_v18 = vsel %vm3062_vm4, %v3068_v11, %v3070_v5  ;;  %v3073_v44 = vsel %vm3062_vm4, %v3070_v5, %v3072_v33  ;;  %v12662_v35 = vsel %vm2097_vm0, %v3912_v48, %v5592_v15  ;;  %v10010_v48 = vld [vmem:[%s14182_s1 + $0xe0] sm:$0xff]   ;;  %v12680_v5 = vrot.slane %v12326_v50, 1 }
 0x1bb   : > { %9320 = vmatprep.subr.bf16.mxu1 %v10005_v13  ;;  %v12666_v11 = vsel %vm2097_vm0, %v5592_v15, %v5594_v19 }
 0x1bc   : > { %9081 = vmatpush3.bf16.msra.mxu0 %v10006_v29  ;;  %v3074_v29 = vrot.slane %v11593_v61, 5 }
 0x1bd   : > { %9082 = vmatprep.subr.bf16.mxu0 %v10009_v63 }
 0x1be   : > { %9321 = vmatpush3.bf16.msra.mxu1 %v10005_v13  ;;  %v5596_v13 = vrot.slane %v12341_v60, 1  ;;  %v3077_v15 = vsel %vm3062_vm4, %v3074_v29, %v3076_v41 }
 0x1bf   : > { %9051 = vmatmul.mubr.bf16.gmra.mrb[4].mxu0 %v3071_v18  ;;  %9322 = vmatprep.subr.bf16.mxu1 %v10007_v39  ;;  %v10011_v18 = vld [vmem:[%s14182_s1 + $0xe8] sm:$0xff]  }
 0x1c0   : > { %9054 = vmatprep.mubr.bf16.mxu0 %v3073_v44  ;;  %9083 = vmatpush3.bf16.msra.mxu0 %v10009_v63  ;;  %v3075_v63 = vsel %vm3062_vm4, %v3072_v33, %v3074_v29  ;;  %v12690_v33 = vsel %vm2097_vm0, %v5594_v19, %v5596_v13  ;;  %v3078_v44 = vrot.slane %v11696_v0, 5  ;;  %v3080_v19 = vrot.slane %v11750_v27, 5  ;;  %v10013_v29 = vld [vmem:[%s14182_s1 + $0xf0] sm:$0xff]  }
 0x1c1   : > { %9307 = vmatmul.mubr.bf16.gmra.mrb[36].mxu1 %v12662_v35  ;;  %9084 = vmatprep.subr.bf16.mxu0 %v10012_v56 }
 0x1c2   : > { %9310 = vmatprep.mubr.bf16.mxu1 %v12666_v11  ;;  %9323 = vmatpush3.bf16.msra.mxu1 %v10007_v39  ;;  %v10018_v39 = vld [vmem:[%s14182_s1 + $0x1a8] sm:$0xff]  }
 0x1c3   : > { %9324 = vmatprep.subr.bf16.mxu1 %v10008_v37 }
 0x1c4   : > { %9085 = vmatpush3.bf16.msra.mxu0 %v10012_v56  ;;  %v12695_v56 = vsel %vm2097_vm0, %v5596_v13, %v12680_v5  ;;  %v5781_v13 = vrot.slane %v12318_v45, 4 }
 0x1c5   : > { %9086 = vmatprep.subr.bf16.mxu0 %v10015_v25 }
 0x1c6   : > { %9325 = vmatpush3.bf16.msra.mxu1 %v10008_v37  ;;  %v10021_v37 = vld [vmem:[%s14182_s1 + $0x1b0] sm:$0xff]  }
 0x1c7   : > { %9055 = vmatmul.mubr.bf16.gmra.mrb[8].mxu0 %v3075_v63  ;;  %9326 = vmatprep.subr.bf16.mxu1 %v10010_v48  ;;  %v10024_v63 = vld [vmem:[%s14182_s1 + $0x1b8] sm:$0xff]  }
 0x1c8   : > { %9058 = vmatprep.mubr.bf16.mxu0 %v3077_v15  ;;  %9087 = vmatpush3.bf16.msra.mxu0 %v10015_v25  ;;  %v3079_v25 = vsel %vm3062_vm4, %v3076_v41, %v3078_v44  ;;  %v10014_v15 = vld [vmem:[%s14182_s1 + $0xf8] sm:$0xff]   ;;  %v5782_v41 = vsel %vm1454_vm3, %v2437_v8, %v5781_v13 }
 0x1c9   : > { %9311 = vmatmul.mubr.bf16.gmra.mrb[40].mxu1 %v12690_v33  ;;  %9088 = vmatprep.subr.bf16.mxu0 %v10018_v39 }
 0x1ca   : > { %9314 = vmatprep.mubr.bf16.mxu1 %v12695_v56  ;;  %9327 = vmatpush3.bf16.msra.mxu1 %v10010_v48  ;;  %v3081_v48 = vsel %vm3062_vm4, %v3078_v44, %v3080_v19  ;;  %v3084_v44 = vrot.slane %v11839_v22, 5 }
 0x1cb   : > { %9328 = vmatprep.subr.bf16.mxu1 %v10011_v18 }
 0x1cc   : > { %9089 = vmatpush3.bf16.msra.mxu0 %v10018_v39  ;;  %v3082_v39 = vrot.slane %v11795_v16, 5 }
 0x1cd   : > { %9090 = vmatprep.subr.bf16.mxu0 %v10021_v37 }
 0x1ce   : > { %9329 = vmatpush3.bf16.msra.mxu1 %v10011_v18  ;;  %v12723_v18 = vld [vmem:[%s14182_s1 + $0x1c0] sm:$0xff]   ;;  %v3083_v8 = vsel %vm3062_vm4, %v3080_v19, %v3082_v39  ;;  %v3086_v19 = vrot.slane %v11884_v21, 5 }
 0x1cf   : > { %9059 = vmatmul.mubr.bf16.gmra.mrb[12].mxu0 %v3079_v25  ;;  %9330 = vmatprep.subr.bf16.mxu1 %v10013_v29  ;;  %v5783_v25 = vrot.slane %v12296_v26, 4 }
 0x1d0   : > { %9062 = vmatprep.mubr.bf16.mxu0 %v3081_v48  ;;  %9091 = vmatpush3.bf16.msra.mxu0 %v10021_v37  ;;  %v10016_v37 = vld [vmem:[%s14182_s1 + $0x100] sm:$0xff]   ;;  %v5785_v48 = vrot.slane %v12324_v59, 4 }
 0x1d1   : > { %9315 = vmatmul.mubr.bf16.gmra.mrb[52].mxu1 %v12680_v5  ;;  %9092 = vmatprep.subr.bf16.mxu0 %v10024_v63  ;;  %v5784_v38 = vsel %vm1454_vm3, %v5781_v13, %v5783_v25  ;;  %v5789_v13 = vrot.slane %v12341_v60, 4 }
 0x1d2   : > { %9331 = vmatpush3.bf16.msra.mxu1 %v10013_v29  ;;  %9334 = vmatprep.mubr.bf16.mxu1 %v5782_v41  ;;  %v3085_v29 = vsel %vm3062_vm4, %v3082_v39, %v3084_v44  ;;  %v10017_v41 = vld [vmem:[%s14182_s1 + $0x108] sm:$0xff]   ;;  %v10019_v39 = vld [vmem:[%s14182_s1 + $0x110] sm:$0xff]  }
 0x1d3   : > { %9332 = vmatprep.subr.bf16.mxu1 %v10014_v15 }
 0x1d4   : > { %9093 = vmatpush3.bf16.msra.mxu0 %v10024_v63  ;;  %v5786_v63 = vsel %vm1454_vm3, %v5783_v25, %v5785_v48 }
 0x1d5   : > { %9126 = vmatprep.subr.bf16.mxu0 %v12723_v18 }
 0x1d6   : > { %9333 = vmatpush3.bf16.msra.mxu1 %v10014_v15  ;;  %v3088_v15 = vrot.slane %v11920_v12, 5 }
 0x1d7   : > { %9063 = vmatmul.mubr.bf16.gmra.mrb[16].mxu0 %v3083_v8  ;;  %9350 = vmatprep.subr.bf16.mxu1 %v10016_v37  ;;  %v5787_v8 = vrot.slane %v12335_v57, 4 }
 0x1d8   : > { %9066 = vmatprep.mubr.bf16.mxu0 %v3085_v29  ;;  %v3087_v29 = vsel %vm3062_vm4, %v3084_v44, %v3086_v19  ;;  %v3092_v44 = vrot.slane %v14427_v1, 5 }
 0x1d9   : > { %9335 = vmatmul.mubr.bf16.vlgmr.msra.gmra.mrb[32].mxu1 %v5784_v38  ;;  %v3089_v38 = vsel %vm3062_vm4, %v3086_v19, %v3088_v15  ;;  %v5788_v25 = vsel %vm1454_vm3, %v5785_v48, %v5787_v8  ;;  %v5791_v19 = vrot.slane %v12326_v50, 4  ;;  %v5793_v48 = vrot.slane %v12379_v42, 4 }
 0x1da   : > { %9338 = vmatprep.mubr.bf16.mxu1 %v5786_v63  ;;  %9351 = vmatpush3.bf16.msra.mxu1 %v10016_v37  ;;  %v10020_v37 = vld [vmem:[%s14182_s1 + $0x118] sm:$0xff]   ;;  %v5790_v63 = vsel %vm1454_vm3, %v5787_v8, %v5789_v13  ;;  %v3093_v8 = vsel %vm3062_vm4, %v3090_v31, %v3092_v44 }
 0x1db   : > { %9352 = vmatprep.subr.bf16.mxu1 %v10017_v41 }
 0x1de   : > { %9353 = vmatpush3.bf16.msra.mxu1 %v10017_v41  ;;  %v10022_v41 = vld [vmem:[%s14182_s1 + $0x120] sm:$0xff]  }
 0x1df   : > { %9067 = vmatmul.mubr.bf16.gmra.mrb[20].mxu0 %v3087_v29  ;;  %9354 = vmatprep.subr.bf16.mxu1 %v10019_v39  ;;  %v3091_v29 = vsel %vm3062_vm4, %v3088_v15, %v3090_v31  ;;  %v10025_v31 = vld [vmem:[%s14182_s1 + $0x130] sm:$0xff]  }
 0x1e0   : > { %9070 = vmatprep.mubr.bf16.mxu0 %v3089_v38  ;;  %v5792_v38 = vsel %vm1454_vm3, %v5789_v13, %v5791_v19  ;;  %v10026_v13 = vld [vmem:[%s14182_s1 + $0x138] sm:$0xff]  }
 0x1e1   : > { %9339 = vmatmul.mubr.bf16.gmra.mrb[36].mxu1 %v5788_v25  ;;  %v5794_v25 = vsel %vm1454_vm3, %v5791_v19, %v5793_v48 }
 0x1e2   : > { %9342 = vmatprep.mubr.bf16.mxu1 %v5790_v63  ;;  %9355 = vmatpush3.bf16.msra.mxu1 %v10019_v39  ;;  %v10023_v39 = vld [vmem:[%s14182_s1 + $0x128] sm:$0xff]   ;;  %v3094_v63 = vrot.slane %v12288_v43, 5 }
 0x1e3   : > { %9356 = vmatprep.subr.bf16.mxu1 %v10020_v37 }
 0x1e4   : > { %v3095_v15 = vsel %vm3062_vm4, %v3092_v44, %v3094_v63  ;;  %v10030_v44 = vld [vmem:[%s14182_s1 + $0x1c8] sm:$0xff]  }
 0x1e6   : > { %9357 = vmatpush3.bf16.msra.mxu1 %v10020_v37  ;;  %v10028_v37 = vld [vmem:[%s14182_s1 + $0x140] sm:$0xff]  }
 0x1e7   : > { %9071 = vmatmul.mubr.bf16.gmra.mrb[24].mxu0 %v3091_v29  ;;  %9358 = vmatprep.subr.bf16.mxu1 %v10022_v41  ;;  %v10045_v29 = vld [vmem:[%s14182_s1 + $0x1f0] sm:$0xff]  }
 0x1e8   : > { %9074 = vmatprep.mubr.bf16.mxu0 %v3093_v8 }
 0x1e9   : > { %9343 = vmatmul.mubr.bf16.gmra.mrb[40].mxu1 %v5792_v38 }
 0x1ea   : > { %9346 = vmatprep.mubr.bf16.mxu1 %v5794_v25  ;;  %9359 = vmatpush3.bf16.msra.mxu1 %v10022_v41 }
 0x1eb   : > { %9360 = vmatprep.subr.bf16.mxu1 %v10023_v39 }
 0x1ee   : > { %9361 = vmatpush3.bf16.msra.mxu1 %v10023_v39  ;;  %v10048_v39 = vld [vmem:[%s14182_s1 + $0x1f8] sm:$0xff]  }
 0x1ef   : > { %9075 = vmatmul.mubr.bf16.gmra.mrb[28].mxu0 %v3095_v15  ;;  %9362 = vmatprep.subr.bf16.mxu1 %v10025_v31 }
 0x1f0   : > { %9094 = vmatprep.mubr.bf16.mxu0 %v14446_v34  ;;  %v10033_v34 = vld [vmem:[%s14182_s1 + $0x1d0] sm:$0xff]  }
 0x1f1   : > { %9347 = vmatmul.mubr.bf16.gmra.mrb[56].mxu1 %v5793_v48  ;;  %v14449_v48 = vshll.u32 %v12389_v53, 16 }
 0x1f2   : > { %9363 = vmatpush3.bf16.msra.mxu1 %v10025_v31  ;;  %9366 = vmatprep.mubr.bf16.mxu1 %v12393_v7  ;;  %v10029_v7 = vld [vmem:[%s14182_s1 + $0x148] sm:$0xff]   ;;  %v10038_v31 = vld [vmem:[%s14182_s1 + $0x178] sm:$0xff]  }
 0x1f3   : > { %9364 = vmatprep.subr.bf16.mxu1 %v10026_v13 }
 0x1f6   : > { %9365 = vmatpush3.bf16.msra.mxu1 %v10026_v13 }
 0x1f7   : > { %9095 = vmatmul.mubr.bf16.vlgmr.msra.gmra.mrb[0].mxu0 %v14447_v62  ;;  %9382 = vmatprep.subr.bf16.mxu1 %v10028_v37  ;;  %v10036_v62 = vld [vmem:[%s14182_s1 + $0x1d8] sm:$0xff]  }
 0x1f8   : > { %9127 = vmatpush3.bf16.msra.mxu0 %v12723_v18  ;;  %9098 = vmatprep.mubr.bf16.mxu0 %v11497_v54  ;;  %v10031_v54 = vld [vmem:[%s14182_s1 + $0x150] sm:$0xff]   ;;  %v14448_v18 = vshll.u32 %v12379_v42, 16 }
 0x1f9   : > { %9128 = vmatprep.subr.bf16.mxu0 %v10030_v44  ;;  %9367 = vmatmul.mubr.bf16.vlgmr.msra.gmra.mrb[32].mxu1 %v12396_v3  ;;  %v10032_v3 = vld [vmem:[%s14182_s1 + $0x158] sm:$0xff]  }
 0x1fa   : > { %9370 = vmatprep.mubr.bf16.mxu1 %v12399_v40  ;;  %9383 = vmatpush3.bf16.msra.mxu1 %v10028_v37  ;;  %v6005_v40 = vrot.slane %v6003_v23, 4  ;;  %v6008_v41 = vrot.slane %v14448_v18, 5  ;;  %v10042_v23 = vld [vmem:[%s14182_s1 + $0x1e8] sm:$0xff]  }
 0x1fb   : > { %9384 = vmatprep.subr.bf16.mxu1 %v10029_v7 }
 0x1fc   : > { %9129 = vmatpush3.bf16.msra.mxu0 %v10030_v44  ;;  %v6202_v44 = vrot.slane %v12296_v26, 5 }
 0x1fd   : > { %9130 = vmatprep.subr.bf16.mxu0 %v10033_v34 }
 0x1fe   : > { %9385 = vmatpush3.bf16.msra.mxu1 %v10029_v7  ;;  %v8407_v7 = vld [vmem:[%s10681_s28 + $0xd0] sm:$0xff]  }
 0x1ff   : > { %9099 = vmatmul.mubr.bf16.gmra.mrb[4].mxu0 %v11544_v28  ;;  %9386 = vmatprep.subr.bf16.mxu1 %v10031_v54  ;;  %v10039_v28 = vld [vmem:[%s14182_s1 + $0x1e0] sm:$0xff]  }
 0x200   : > { %9102 = vmatprep.mubr.bf16.mxu0 %v11593_v61  ;;  %9131 = vmatpush3.bf16.msra.mxu0 %v10033_v34  ;;  %v10034_v61 = vld [vmem:[%s14182_s1 + $0x160] sm:$0xff]   ;;  %v6204_v34 = vrot.slane %v12324_v59, 5 }
 0x201   : > { %9371 = vmatmul.mubr.bf16.gmra.mrb[36].mxu1 %v12404_v9  ;;  %9132 = vmatprep.subr.bf16.mxu0 %v10036_v62  ;;  %v6009_v9 = vor.u32 %v6008_v41, %v6005_v40  ;;  %v8293_v40 = vunpack.c.h.bf16 %v8407_v7  ;;  %v8292_v41 = vunpack.c.l.bf16 %v8407_v7 }
 0x202   : > { %9374 = vmatprep.mubr.bf16.mxu1 %v12410_v4  ;;  %9387 = vmatpush3.bf16.msra.mxu1 %v10031_v54  ;;  %v10035_v4 = vld [vmem:[%s14182_s1 + $0x168] sm:$0xff]  }
 0x203   : > { %9388 = vmatprep.subr.bf16.mxu1 %v10032_v3  ;;  %v6010_v19 = vsel %vm2713_vm2, %v12401_v6, %v6009_v9  ;;  %v6200_v6 = vrot.slane %v12318_v45, 5 }
 0x204   : > { %9133 = vmatpush3.bf16.msra.mxu0 %v10036_v62 }
 0x205   : > { %9134 = vmatprep.subr.bf16.mxu0 %v10039_v28  ;;  %v6201_v13 = vsel %vm3062_vm4, %v3094_v63, %v6200_v6  ;;  %v6203_v18 = vsel %vm3062_vm4, %v6200_v6, %v6202_v44  ;;  %v10298_v6 = vld [vmem:[%s10828_s15] ss:$0 sm:$0xff]  ;;  %s10360_s15 = scalar_lea.vmem %s14094_s17, 3456 }
 0x206   : > { %9389 = vmatpush3.bf16.msra.mxu1 %v10032_v3  ;;  %v10041_v3 = vld [vmem:[%s14182_s1 + $0x188] sm:$0xff]   ;;  %p10361_p1 = scmp.ne.s32.totalorder %s14094_s17, %s10360_s15  ;;  %p10368_p9 = scmp.lt.s32.totalorder %s10366_s29, %s10360_s15 }
 0x207   : > { %9103 = vmatmul.mubr.bf16.gmra.mrb[8].mxu0 %v11649_v49  ;;  %9390 = vmatprep.subr.bf16.mxu1 %v10034_v61  ;;  %v12836_v49 = vpop.f32.mrb[0].mxu1 }
 0x208   : > { %9106 = vmatprep.mubr.bf16.mxu0 %v11696_v0  ;;  %9135 = vmatpush3.bf16.msra.mxu0 %v10039_v28  ;;  %v10037_v0 = vld [vmem:[%s14182_s1 + $0x170] sm:$0xff]   ;;  %v12840_v8 = vpop.f32.mrb[1].mxu1  ;;  %v6205_v28 = vsel %vm3062_vm4, %v6202_v44, %v6204_v34  ;;  %v6210_v44 = vrot.slane %v12326_v50, 5  ;;  %p10362_p10 = pnand %p10361_p1, %p14625_p12  ;;  %p10369_p11 = por %p10368_p9, %p10367_p7 }
 0x209   : > { %9375 = vmatmul.mubr.bf16.gmra.mrb[40].mxu1 %v12414_v30  ;;  %9136 = vmatprep.subr.bf16.mxu0 %v10042_v23  ;;  %v6014_v30 = vrot.slane %v14449_v48, 5  ;;  %v12846_v38 = vpop.f32.mrb[2].mxu1 }
 0x20a   : > { %9378 = vmatprep.mubr.bf16.mxu1 %v6010_v19  ;;  %9391 = vmatpush3.bf16.msra.mxu1 %v10034_v61  ;;  %v12849_v25 = vpop.f32.mrb[3].mxu1  ;;  %p10363_p5 = pneg %p10362_p10 }
 0x20b   : > { %9392 = vmatprep.subr.bf16.mxu1 %v10035_v4  ;;  %v6015_v15 = vsel %vm2713_vm2, %v6009_v9, %v6014_v30  ;;  %v10044_v30 = vld [vmem:[%s14182_s1 + $0x198] sm:$0xff]  }
 0x20c   : > { %9137 = vmatpush3.bf16.msra.mxu0 %v10042_v23  ;;  %v6206_v23 = vrot.slane %v12335_v57, 5  ;;  %p10370_p3 = pnand %p10369_p11, %p10363_p5 }
 0x20d   : > { %9138 = vmatprep.subr.bf16.mxu0 %v10045_v29 }
 0x20e   : > { %9393 = vmatpush3.bf16.msra.mxu1 %v10035_v4 }
 0x20f   : > { %9107 = vmatmul.mubr.bf16.gmra.mrb[12].mxu0 %v11750_v27  ;;  %9394 = vmatprep.subr.bf16.mxu1 %v10037_v0  ;;  %v12862_v27 = vld [vmem:[%s14182_s1 + $0x200] sm:$0xff]  }
 0x210   : > { %9110 = vmatprep.mubr.bf16.mxu0 %v11795_v16  ;;  %9139 = vmatpush3.bf16.msra.mxu0 %v10045_v29  ;;  %v10040_v16 = vld [vmem:[%s14182_s1 + $0x180] sm:$0xff]   ;;  %v6208_v29 = vrot.slane %v12341_v60, 5 }
 0x211   : > { %9379 = vmatmul.mubr.bf16.gmra.mrb[60].mxu1 %v6015_v15  ;;  %9140 = vmatprep.subr.bf16.mxu0 %v10048_v39  ;;  %v12867_v37 = vpop.f32.mrb[4].mxu1 }
 0x212   : > { %9395 = vmatpush3.bf16.msra.mxu1 %v10037_v0  ;;  %9398 = vmatprep.mubr.bf16.mxu1 %v6201_v13  ;;  %v12871_v63 = vpop.f32.mrb[5].mxu1  ;;  %v6209_v13 = vsel %vm3062_vm4, %v6206_v23, %v6208_v29 }
 0x213   : > { %9396 = vmatprep.subr.bf16.mxu1 %v10038_v31  ;;  %v12875_v54 = vpop.f32.mrb[6].mxu1 }
 0x214   : > { %9141 = vmatpush3.bf16.msra.mxu0 %v10048_v39  ;;  %v12878_v62 = vpop.f32.mrb[7].mxu1 }
 0x215   : > { %9174 = vmatprep.subr.bf16.mxu0 %v12862_v27 }
 0x216   : > { %9397 = vmatpush3.bf16.msra.mxu1 %v10038_v31  ;;  %v6207_v31 = vsel %vm3062_vm4, %v6204_v34, %v6206_v23 }
 0x217   : > { %9111 = vmatmul.mubr.bf16.gmra.mrb[16].mxu0 %v11839_v22  ;;  %9414 = vmatprep.subr.bf16.mxu1 %v10040_v16  ;;  %v10043_v22 = vld [vmem:[%s14182_s1 + $0x190] sm:$0xff]  }
 0x218   : > { %9114 = vmatprep.mubr.bf16.mxu0 %v11884_v21  ;;  %v10297_v21 = vld [vmem:[%s10804_s14] ss:$0 sm:$0xff]  ;;  %s8136_s14 = sshll.u32 %s10544_s13, 5 }
 0x219   : > { %9399 = vmatmul.mubr.bf16.vlgmr.msra.gmra.mrb[32].mxu1 %v6203_v18  ;;  %v599_v61 = vmul.f32 %v10297_v21, %v8293_v40  ;;  %v598_v4 = vmul.f32 %v10297_v21, %v8292_v41  ;;  %v10047_v41 = vld [vmem:[%s14182_s1 + $0x1a8] sm:$0xff]   ;;  %v6214_v21 = vrot.slane %v12389_v53, 5 }
 0x21a   : > { %9402 = vmatprep.mubr.bf16.mxu1 %v6205_v28  ;;  %9415 = vmatpush3.bf16.msra.mxu1 %v10040_v16  ;;  %v6211_v28 = vsel %vm3062_vm4, %v6208_v29, %v6210_v44  ;;  %v14462_v29 = vld [vmem:[#allocation38_spill] sm:$0xff] }
 0x21b   : > { %9416 = vmatprep.subr.bf16.mxu1 %v10041_v3  ;;  %v12890_v9 = vpop.f32.mrb[8].mxu1  ;;  %v12906_v39 = vadd.f32 %v10298_v6, %v599_v61  ;;  %v12909_v15 = vadd.f32 %v10298_v6, %v598_v4 }
 0x21c   : > { %14450 = vst [vmem:[#allocation22_spill] sm:$0xff] %v12890_v9  ;;  %v12893_v19 = vpop.f32.mrb[9].mxu1 }
 0x21d   : > { %14451 = vst [vmem:[#allocation25_spill] sm:$0xff] %v12893_v19  ;;  %v12896_v0 = vpop.f32.mrb[10].mxu1  ;;  %v7684_v7 = vmul.f32 -1.442695, %v12909_v15 }
 0x21e   : > { %14452 = vst [vmem:[#allocation26_spill] sm:$0xff] %v12896_v0  ;;  %9417 = vmatpush3.bf16.msra.mxu1 %v10041_v3  ;;  %v12899_v48 = vpop.f32.mrb[11].mxu1  ;;  %v6212_v3 = vrot.slane %v12379_v42, 5 }
 0x21f   : > { %9115 = vmatmul.mubr.bf16.gmra.mrb[20].mxu0 %v11920_v12  ;;  %14453 = vst [vmem:[#allocation23_spill] sm:$0xff] %v12899_v48  ;;  %9418 = vmatprep.subr.bf16.mxu1 %v10043_v22  ;;  %v10046_v12 = vld [vmem:[%s14182_s1 + $0x1a0] sm:$0xff]  }
 0x220   : > { %9118 = vmatprep.mubr.bf16.mxu0 %v11962_v17  ;;  %v7685_v17 = vmul.f32 -1.442695, %v12906_v39  ;;  %v6215_v6 = vsel %vm3062_vm4, %v6212_v3, %v6214_v21  ;;  %v10057_v21 = vld [vmem:[%s14182_s1 + $0x210] sm:$0xff]  }
 0x221   : > { %9403 = vmatmul.mubr.bf16.gmra.mrb[36].mxu1 %v6207_v31 }
 0x222   : > { %9406 = vmatprep.mubr.bf16.mxu1 %v6209_v13  ;;  %9419 = vmatpush3.bf16.msra.mxu1 %v10043_v22  ;;  %10283 = vpow2.f32 %v7685_v17  ;;  %v6213_v22 = vsel %vm3062_vm4, %v6210_v44, %v6212_v3  ;;  %v10054_v17 = vld [vmem:[%s14182_s1 + $0x208] sm:$0xff]  }
 0x223   : > { %9420 = vmatprep.subr.bf16.mxu1 %v10044_v30  ;;  %v12916_v16 = vpop.f32.mrb[12].mxu1  ;;  %10285 = vpow2.f32 %v7684_v7 }
 0x224   : > { %14454 = vst [vmem:[#allocation24_spill] sm:$0xff] %v12916_v16  ;;  %v12920_v34 = vpop.f32.mrb[13].mxu1 }
 0x225   : > { %14455 = vst [vmem:[#allocation27_spill] sm:$0xff] %v12920_v34  ;;  %v12923_v40 = vpop.f32.mrb[14].mxu1 }
 0x226   : > { %14456 = vst [vmem:[#allocation28_spill] sm:$0xff] %v12923_v40  ;;  %9421 = vmatpush3.bf16.msra.mxu1 %v10044_v30  ;;  %v12926_v18 = vpop.f32.mrb[15].mxu1  ;;  %v10050_v30 = vld [vmem:[%s14182_s1 + $0x1b8] sm:$0xff]  }
 0x227   : > { %9119 = vmatmul.mubr.bf16.gmra.mrb[24].mxu0 %v14427_v1  ;;  %14457 = vst [vmem:[#allocation30_spill] sm:$0xff] %v12926_v18  ;;  %9422 = vmatprep.subr.bf16.mxu1 %v10046_v12  ;;  %v10049_v1 = vld [vmem:[%s14182_s1 + $0x1b0] sm:$0xff]  }
 0x228   : > { %9122 = vmatprep.mubr.bf16.mxu0 %v12288_v43 }
 0x229   : > { %9407 = vmatmul.mubr.bf16.gmra.mrb[40].mxu1 %v6211_v28 }
 0x22a   : > { %9410 = vmatprep.mubr.bf16.mxu1 %v6213_v22  ;;  %9423 = vmatpush3.bf16.msra.mxu1 %v10046_v12  ;;  %v14468_v22 = vld [vmem:[#allocation43_spill] sm:$0xff] }
 0x22b   : > { %9424 = vmatprep.subr.bf16.mxu1 %v10047_v41  ;;  %v12937_v43 = vpop.f32.mrb[16].mxu1 }
 0x22c   : > { %14458 = vst [vmem:[#allocation42_spill] sm:$0xff] %v12937_v43  ;;  %v12940_v61 = vpop.f32.mrb[17].mxu1  ;;  %v10284_v31 = vpop.eup %10283 }
 0x22d   : > { %14459 = vst [vmem:[#allocation33_spill] sm:$0xff] %v12940_v61  ;;  %v12942_v23 = vpop.f32.mrb[18].mxu1  ;;  %v10286_v13 = vpop.eup %10285  ;;  %v876_v44 = vadd.f32 1.0, %v10284_v31 }
 0x22e   : > { %14460 = vst [vmem:[#allocation36_spill] sm:$0xff] %v12942_v23  ;;  %9425 = vmatpush3.bf16.msra.mxu1 %v10047_v41  ;;  %v12945_v4 = vpop.f32.mrb[19].mxu1  ;;  %v875_v3 = vadd.f32 1.0, %v10286_v13  ;;  %v14474_v13 = vld [vmem:[#allocation47_spill] sm:$0xff] }
 0x22f   : > { %9123 = vmatmul.mubr.bf16.gmra.mrb[28].mxu0 %v12318_v45  ;;  %14461 = vst [vmem:[#allocation37_spill] sm:$0xff] %v12945_v4  ;;  %9426 = vmatprep.subr.bf16.mxu1 %v10049_v1  ;;  %v10052_v45 = vld [vmem:[%s14182_s1 + $0x1c0] sm:$0xff]   ;;  %10287 = vrcp.f32 %v876_v44 }
 0x230   : > { %9142 = vmatprep.mubr.bf16.mxu0 %v14462_v29  ;;  %10289 = vrcp.f32 %v875_v3  ;;  %v10058_v3 = vld [vmem:[%s14182_s1 + $0x1e0] sm:$0xff]  }
 0x231   : > { %9411 = vmatmul.mubr.bf16.gmra.mrb[64].mxu1 %v6215_v6  ;;  %v10060_v6 = vld [vmem:[%s14182_s1 + $0x218] sm:$0xff]  }
 0x232   : > { %9427 = vmatpush3.bf16.msra.mxu1 %v10049_v1  ;;  %9430 = vmatprep.mubr.bf16.mxu1 %v12296_v26  ;;  %v14466_v26 = vld [vmem:[#allocation40_spill] sm:$0xff] }
 0x233   : > { %9428 = vmatprep.subr.bf16.mxu1 %v10050_v30  ;;  %v12953_v12 = vpop.f32.mrb[20].mxu1  ;;  %v10053_v1 = vld [vmem:[%s14182_s1 + $0x1c8] sm:$0xff]  }
 0x234   : > { %14463 = vst [vmem:[#allocation58_spill] sm:$0xff] %v12953_v12  ;;  %v12961_v7 = vpop.f32.mrb[21].mxu1 }
 0x235   : > { %14464 = vst [vmem:[#allocation51_spill] sm:$0xff] %v12961_v7  ;;  %v12963_v41 = vpop.f32.mrb[22].mxu1 }
 0x236   : > { %14465 = vst [vmem:[#allocation63_spill] sm:$0xff] %v12963_v41  ;;  %9429 = vmatpush3.bf16.msra.mxu1 %v10050_v30  ;;  %v12966_v28 = vpop.f32.mrb[23].mxu1  ;;  %v8413_v41 = vld [vmem:[%s10688_s22 + $0x38] sm:$0xff]  }
 0x237   : > { %9143 = vmatmul.mubr.bf16.vlgmr.msra.gmra.mrb[0].mxu0 %v14466_v26  ;;  %14467 = vst [vmem:[#allocation52_spill] sm:$0xff] %v12966_v28  ;;  %9446 = vmatprep.subr.bf16.mxu1 %v10052_v45  ;;  %v8412_v28 = vld [vmem:[%s10688_s22 + $0x30] sm:$0xff]   ;;  %v8317_v34 = vunpack.c.h.bf16 %v8413_v41 }
 0x238   : > { %9175 = vmatpush3.bf16.msra.mxu0 %v12862_v27  ;;  %9146 = vmatprep.mubr.bf16.mxu0 %v14468_v22  ;;  %v10055_v27 = vld [vmem:[%s14182_s1 + $0x1d0] sm:$0xff]  }
 0x239   : > { %9176 = vmatprep.subr.bf16.mxu0 %v10054_v17  ;;  %9431 = vmatmul.mubr.bf16.vlgmr.msra.gmra.mrb[32].mxu1 %v12324_v59  ;;  %v10288_v44 = vpop.eup %10287 }
 0x23a   : > { %9434 = vmatprep.mubr.bf16.mxu1 %v12335_v57  ;;  %9447 = vmatpush3.bf16.msra.mxu1 %v10052_v45  ;;  %v14472_v57 = vld [vmem:[#allocation45_spill] sm:$0xff]  ;;  %v10290_v26 = vpop.eup %10289 }
 0x23b   : > { %9448 = vmatprep.subr.bf16.mxu1 %v10053_v1  ;;  %v12981_v29 = vpop.f32.mrb[24].mxu1  ;;  %v10056_v45 = vld [vmem:[%s14182_s1 + $0x1d8] sm:$0xff]  }
 0x23c   : > { %9177 = vmatpush3.bf16.msra.mxu0 %v10054_v17  ;;  %14469 = vst [vmem:[#allocation60_spill] sm:$0xff] %v12981_v29  ;;  %v12983_v30 = vpop.f32.mrb[25].mxu1  ;;  %v10063_v17 = vld [vmem:[%s14182_s1 + $0x220] sm:$0xff]  }
 0x23d   : > { %9178 = vmatprep.subr.bf16.mxu0 %v10057_v21  ;;  %14470 = vst [vmem:[#allocation64_spill] sm:$0xff] %v12983_v30  ;;  %v12988_v59 = vpop.f32.mrb[26].mxu1 }
 0x23e   : > { %14471 = vst [vmem:[#allocation66_spill] sm:$0xff] %v12988_v59  ;;  %9449 = vmatpush3.bf16.msra.mxu1 %v10053_v1  ;;  %v12991_v31 = vpop.f32.mrb[27].mxu1 }
 0x23f   : > { %9147 = vmatmul.mubr.bf16.gmra.mrb[4].mxu0 %v14472_v57  ;;  %14473 = vst [vmem:[#allocation67_spill] sm:$0xff] %v12991_v31  ;;  %9450 = vmatprep.subr.bf16.mxu1 %v10055_v27  ;;  %v1037_v57 = vmul.f32 %v10290_v26, %v12909_v15  ;;  %v1356_v31 = vpop.permute.xlu0 %1355  ;;  %v14481_v26 = vld [vmem:[#allocation53_spill] sm:$0xff] }
 0x240   : > { %9150 = vmatprep.mubr.bf16.mxu0 %v14474_v13  ;;  %9179 = vmatpush3.bf16.msra.mxu0 %v10057_v21 }
 0x241   : > { %9435 = vmatmul.mubr.bf16.gmra.mrb[36].mxu1 %v12341_v60  ;;  %9180 = vmatprep.subr.bf16.mxu0 %v10060_v6  ;;  %v10066_v60 = vld [vmem:[%s14182_s1 + $0x228] sm:$0xff]  }
 0x242   : > { %9438 = vmatprep.mubr.bf16.mxu1 %v12326_v50  ;;  %9451 = vmatpush3.bf16.msra.mxu1 %v10055_v27  ;;  %v14478_v50 = vld [vmem:[#allocation49_spill] sm:$0xff]  ;;  %v1038_v27 = vmul.f32 %v10288_v44, %v12906_v39 }
 0x243   : > { %9452 = vmatprep.subr.bf16.mxu1 %v10056_v45  ;;  %v13005_v22 = vpop.f32.mrb[28].mxu1  ;;  %v10069_v39 = vld [vmem:[%s14182_s1 + $0x230] sm:$0xff]  }
 0x244   : > { %14475 = vst [vmem:[#allocation68_spill] sm:$0xff] %v13005_v22  ;;  %9181 = vmatpush3.bf16.msra.mxu0 %v10060_v6  ;;  %v13007_v1 = vpop.f32.mrb[29].mxu1  ;;  %v14480_v22 = vld [vmem:[#allocation50_spill] sm:$0xff]  ;;  %v10059_v6 = vld [vmem:[%s14182_s1 + $0x1e8] sm:$0xff]   ;;  %v10061_v44 = vld [vmem:[%s14182_s1 + $0x1f0] sm:$0xff]  }
 0x245   : > { %14476 = vst [vmem:[#allocation69_spill] sm:$0xff] %v13007_v1  ;;  %9182 = vmatprep.subr.bf16.mxu0 %v10063_v17  ;;  %v13012_v21 = vpop.f32.mrb[30].mxu1  ;;  %v1361_v1 = vpop.permute.xlu1 %1360 }
 0x246   : > { %14477 = vst [vmem:[#allocation70_spill] sm:$0xff] %v13012_v21  ;;  %9453 = vmatpush3.bf16.msra.mxu1 %v10056_v45  ;;  %v13017_v13 = vpop.f32.mrb[31].mxu1  ;;  %v1416_v15 = vmul.f32 %v1361_v1, %v1038_v27  ;;  %v1415_v45 = vmul.f32 %v1356_v31, %v1037_v57  ;;  %v10062_v31 = vld [vmem:[%s14182_s1 + $0x1f8] sm:$0xff]   ;;  %v14483_v1 = vld [vmem:[#allocation55_spill] sm:$0xff] }
 0x247   : > { %9151 = vmatmul.mubr.bf16.gmra.mrb[8].mxu0 %v14478_v50  ;;  %14479 = vst [vmem:[#allocation71_spill] sm:$0xff] %v13017_v13  ;;  %9454 = vmatprep.subr.bf16.mxu1 %v10058_v3  ;;  %v14482_v50 = vld [vmem:[#allocation19_spill] sm:$0xff]  ;;  %v14485_v57 = vld [vmem:[#allocation61_spill] sm:$0xff] }
 0x248   : > { %9154 = vmatprep.mubr.bf16.mxu0 %v14480_v22  ;;  %9183 = vmatpush3.bf16.msra.mxu0 %v10063_v17  ;;  %v10072_v17 = vld [vmem:[%s14182_s1 + $0x238] sm:$0xff]   ;;  %v13035_v22 = vpack.c.bf16 %v1416_v15, %v1415_v45  ;;  %v10065_v27 = vld [vmem:[%s14182_s1 + $0x208] sm:$0xff]  }
 0x249   : > { %9439 = vmatmul.mubr.bf16.gmra.mrb[40].mxu1 %v12379_v42  ;;  %9184 = vmatprep.subr.bf16.mxu0 %v10066_v60 }
 0x24a   : > { %9442 = vmatprep.mubr.bf16.mxu1 %v12389_v53  ;;  %9455 = vmatpush3.bf16.msra.mxu1 %v10058_v3  ;;  %v10064_v3 = vld [vmem:[%s14182_s1 + $0x200] sm:$0xff]  }
 0x24b   : > { %9456 = vmatprep.subr.bf16.mxu1 %v10059_v6 }
 0x24c   : > { %9185 = vmatpush3.bf16.msra.mxu0 %v10066_v60  ;;  %v14484_v60 = vld [vmem:[#allocation57_spill] sm:$0xff] }
 0x24d   : > { %9186 = vmatprep.subr.bf16.mxu0 %v10069_v39 }
 0x24e   : > { %9457 = vmatpush3.bf16.msra.mxu1 %v10059_v6  ;;  %v14486_v6 = vld [vmem:[#allocation65_spill] sm:$0xff] }
 0x24f   : > { %9155 = vmatmul.mubr.bf16.gmra.mrb[12].mxu0 %v14481_v26  ;;  %9458 = vmatprep.subr.bf16.mxu1 %v10061_v44 }
 0x250   : > { %9158 = vmatprep.mubr.bf16.mxu0 %v14482_v50  ;;  %9187 = vmatpush3.bf16.msra.mxu0 %v10069_v39  ;;  %v10068_v39 = vld [vmem:[%s14182_s1 + $0x218] sm:$0xff]   ;;  %v10071_v50 = vld [vmem:[%s14182_s1 + $0x228] sm:$0xff]  }
 0x251   : > { %9443 = vmatmul.mubr.bf16.gmra.mrb[68].mxu1 %v13035_v22  ;;  %9188 = vmatprep.subr.bf16.mxu0 %v10072_v17 }
 0x252   : > { %9459 = vmatpush3.bf16.msra.mxu1 %v10061_v44  ;;  %9462 = vmatprep.mubr.bf16.mxu1 %v12511_v14  ;;  %v10067_v14 = vld [vmem:[%s14182_s1 + $0x210] sm:$0xff]   ;;  %v6579_v44 = vshrl.u32 %v12389_v53, 16 }
 0x253   : > { %9460 = vmatprep.subr.bf16.mxu1 %v10062_v31 }
 0x254   : > { %9189 = vmatpush3.bf16.msra.mxu0 %v10072_v17 }
 0x256   : > { %9461 = vmatpush3.bf16.msra.mxu1 %v10062_v31 }
 0x257   : > { %9159 = vmatmul.mubr.bf16.gmra.mrb[16].mxu0 %v14483_v1  ;;  %9478 = vmatprep.subr.bf16.mxu1 %v10064_v3  ;;  %v14488_v1 = vld [vmem:[#allocation39_spill] sm:$0xff] }
 0x258   : > { %9162 = vmatprep.mubr.bf16.mxu0 %v14484_v60  ;;  %v14489_v60 = vld [vmem:[#allocation41_spill] sm:$0xff] }
 0x259   : > { %9463 = vmatmul.mubr.bf16.vlgmr.msra.gmra.mrb[32].mxu1 %v12515_v55  ;;  %v6583_v55 = vshll.u32 %v13035_v22, 16 }
 0x25a   : > { %9466 = vmatprep.mubr.bf16.mxu1 %v12539_v32  ;;  %9479 = vmatpush3.bf16.msra.mxu1 %v10064_v3  ;;  %v10070_v32 = vld [vmem:[%s14182_s1 + $0x220] sm:$0xff]  }
 0x25b   : > { %9480 = vmatprep.subr.bf16.mxu1 %v10065_v27  ;;  %v6585_v17 = vrot.slane %v6583_v55, 1 }
 0x25e   : > { %9481 = vmatpush3.bf16.msra.mxu1 %v10065_v27  ;;  %v14490_v27 = vld [vmem:[#allocation44_spill] sm:$0xff] }
 0x25f   : > { %9163 = vmatmul.mubr.bf16.gmra.mrb[20].mxu0 %v14485_v57  ;;  %9482 = vmatprep.subr.bf16.mxu1 %v10067_v14 }
 0x260   : > { %9166 = vmatprep.mubr.bf16.mxu0 %v14486_v6  ;;  %v6772_v6 = vrot.slane %v12389_v53, 1  ;;  %v14495_v53 = vld [vmem:[#allocation54_spill] sm:$0xff] }
 0x261   : > { %9467 = vmatmul.mubr.bf16.gmra.mrb[36].mxu1 %v12544_v24 }
 0x262   : > { %9470 = vmatprep.mubr.bf16.mxu1 %v12437_v10  ;;  %9483 = vmatpush3.bf16.msra.mxu1 %v10067_v14  ;;  %v6581_v10 = vor.u32 %v6579_v44, %v12433_v58  ;;  %v14487_v58 = vld [vmem:[#allocation35_spill] sm:$0xff]  ;;  %v14491_v14 = vld [vmem:[#allocation46_spill] sm:$0xff] }
 0x263   : > { %9484 = vmatprep.subr.bf16.mxu1 %v10068_v39 }
 0x264   : > { %v9252_v15 = vpop.f32.mrb[44].mxu1  ;;  %v6586_v31 = vsel %vm1496_vm1, %v6581_v10, %v6585_v17  ;;  %v14494_v10 = vld [vmem:[#allocation18_spill] sm:$0xff] }
 0x265   : > { %v5414_v45 = vpop.f32.mrb[45].mxu1 }
 0x266   : > { %v9253_v26 = vpop.f32.mrb[46].mxu1  ;;  %9485 = vmatpush3.bf16.msra.mxu1 %v10068_v39 }
 0x267   : > { %9167 = vmatmul.mubr.bf16.gmra.mrb[24].mxu0 %v12459_v52  ;;  %v5417_v24 = vpop.f32.mrb[47].mxu1  ;;  %9486 = vmatprep.subr.bf16.mxu1 %v10070_v32  ;;  %v10073_v52 = vld [vmem:[%s14182_s1 + $0x230] sm:$0xff]  }
 0x268   : > { %9170 = vmatprep.mubr.bf16.mxu0 %v12480_v51  ;;  %v6587_v51 = vshrl.u32 %v13035_v22, 16 }
 0x269   : > { %9471 = vmatmul.mubr.bf16.gmra.mrb[40].mxu1 %v12446_v36  ;;  %v10074_v36 = vld [vmem:[%s14182_s1 + $0x238] sm:$0xff]  }
 0x26a   : > { %9474 = vmatprep.mubr.bf16.mxu1 %v6586_v31  ;;  %9487 = vmatpush3.bf16.msra.mxu1 %v10070_v32  ;;  %v6589_v3 = vor.u32 %v6587_v51, %v6585_v17  ;;  %v14493_v17 = vld [vmem:[#allocation17_spill] sm:$0xff] }
 0x26b   : > { %9488 = vmatprep.subr.bf16.mxu1 %v10071_v50 }
 0x26e   : > { %9489 = vmatpush3.bf16.msra.mxu1 %v10071_v50  ;;  %v14499_v50 = vld [vmem:[#allocation62_spill] sm:$0xff] }
 0x26f   : > { %9171 = vmatmul.mubr.bf16.gmra.mrb[28].mxu0 %v12487_v47  ;;  %9490 = vmatprep.subr.bf16.mxu1 %v10073_v52  ;;  %v6770_v47 = vrot.slane %v12379_v42, 1  ;;  %v14492_v42 = vld [vmem:[#allocation48_spill] sm:$0xff] }
 0x270   : > { %9190 = vmatprep.mubr.bf16.mxu0 %v14487_v58 }
 0x271   : > { %9475 = vmatmul.mubr.bf16.gmra.mrb[72].mxu1 %v6589_v3 }
 0x272   : > { %9491 = vmatpush3.bf16.msra.mxu1 %v10073_v52  ;;  %9494 = vmatprep.mubr.bf16.mxu1 %v12662_v35  ;;  %v6771_v35 = vsel %vm2097_vm0, %v12680_v5, %v6770_v47 }
 0x273   : > { %9492 = vmatprep.subr.bf16.mxu1 %v10074_v36 }
 0x276   : > { %9493 = vmatpush3.bf16.msra.mxu1 %v10074_v36 }
 0x277   : > { %9191 = vmatmul.mubr.bf16.vlgmr.msra.gmra.mrb[0].mxu0 %v14488_v1 }
 0x278   : > { %9194 = vmatprep.mubr.bf16.mxu0 %v14489_v60 }
 0x279   : > { %9495 = vmatmul.mubr.bf16.vlgmr.msra.gmra.mrb[32].mxu1 %v12666_v11  ;;  %v6774_v11 = vrot.slane %v13035_v22, 1  ;;  %v14496_v22 = vld [vmem:[#allocation20_spill] sm:$0xff] }
 0x27a   : > { %9498 = vmatprep.mubr.bf16.mxu1 %v12690_v33 }
 0x27b   : > { %v6775_v5 = vsel %vm2097_vm0, %v6772_v6, %v6774_v11 }
 0x27f   : > { %9195 = vmatmul.mubr.bf16.gmra.mrb[4].mxu0 %v14490_v27 }
 0x280   : > { %9198 = vmatprep.mubr.bf16.mxu0 %v14491_v14 }
 0x281   : > { %9499 = vmatmul.mubr.bf16.gmra.mrb[36].mxu1 %v12695_v56  ;;  %v6773_v56 = vsel %vm2097_vm0, %v6770_v47, %v6772_v6  ;;  %v1451_v6 = vld [vmem:[%s10694_s23 + $0xc] sm:$0x1] }
 0x282   : > { %9502 = vmatprep.mubr.bf16.mxu1 %v6771_v35 }
 0x284   : > { %v9284_v57 = vpop.f32.mrb[48].mxu1 }
 0x285   : > { %v5567_v39 = vadd.f32 %v9284_v57, %v9252_v15  ;;  %v5558_v55 = vpop.f32.mrb[49].mxu1  ;;  %v14497_v15 = vld [vmem:[#allocation56_spill] sm:$0xff] }
 0x286   : > { %v5559_v33 = vadd.f32 %v5558_v55, %v5414_v45  ;;  %v9285_v32 = vpop.f32.mrb[50].mxu1  ;;  %v14498_v45 = vld [vmem:[#allocation59_spill] sm:$0xff] }
 0x287   : > { %9199 = vmatmul.mubr.bf16.gmra.mrb[8].mxu0 %v14492_v42  ;;  %v5561_v44 = vpop.f32.mrb[51].mxu1 }
 0x288   : > { %9202 = vmatprep.mubr.bf16.mxu0 %v14493_v17  ;;  %v5562_v26 = vadd.f32 %v5561_v44, %v5417_v24 }
 0x289   : > { %9503 = vmatmul.mubr.bf16.gmra.mrb[40].mxu1 %v6773_v56 }
 0x28a   : > { %9506 = vmatprep.mubr.bf16.mxu1 %v6775_v5 }
 0x28f   : > { %9203 = vmatmul.mubr.bf16.gmra.mrb[12].mxu0 %v14494_v10 }
 0x290   : > { %9206 = vmatprep.mubr.bf16.mxu0 %v14495_v53 }
 0x291   : > { %9507 = vmatmul.mubr.bf16.gmra.mrb[76].mxu1 %v6774_v11 }
 0x297   : > { %9207 = vmatmul.mubr.bf16.gmra.mrb[16].mxu0 %v14496_v22 }
 0x298   : > { %9210 = vmatprep.mubr.bf16.mxu0 %v14497_v15 }
 0x29f   : > { %9211 = vmatmul.mubr.bf16.gmra.mrb[20].mxu0 %v14498_v45 }
 0x2a0   : > { %9214 = vmatprep.mubr.bf16.mxu0 %v14499_v50  ;;  %v13129_v50 = vpop.permute.xlu0 %4459 }
 0x2a4   : > { %v9316_v24 = vpop.f32.mrb[52].mxu1 }
 0x2a5   : > { %v5763_v31 = vadd.f32 %v9316_v24, %v5567_v39  ;;  %v5735_v52 = vpop.f32.mrb[53].mxu1  ;;  %v14503_v39 = vmov 0  ;;  %v13131_v24 = vpop.permute.xlu0 %4469 }
 0x2a6   : > { %v5761_v51 = vadd.f32 %v5735_v52, %v5559_v33  ;;  %v9317_v58 = vpop.f32.mrb[54].mxu1  ;;  %v14504_v39 = vsel %vm13121_vm9, 4294967295, %v14503_v39  ;;  %v13135_v52 = vpop.permute.xlu1 %4464 }
 0x2a7   : > { %9215 = vmatmul.mubr.bf16.gmra.mrb[24].mxu0 %v12616_v46  ;;  %v5738_v3 = vpop.f32.mrb[55].mxu1  ;;  %v14500_v46 = vmov 0  ;;  %14505 = vst [vmem:[#allocation73_spill] sm:$0xff] %v14504_v39 }
 0x2a8   : > { %9218 = vmatprep.mubr.bf16.mxu0 %v12636_v20  ;;  %v5762_v36 = vadd.f32 %v5738_v3, %v5562_v26  ;;  %v14501_v46 = vsel %vm13113_vm7, 4294967295, %v14500_v46  ;;  %v1457_v20 = vld [vmem:[%s10694_s23 + $0xc8] sm:$0xf] }
 0x2a9   : > { %14502 = vst [vmem:[#allocation72_spill] sm:$0xff] %v14501_v46  ;;  %v1458_v55 = vsel %vm13121_vm9, 0, %v1457_v20  ;;  %v8316_v46 = vunpack.c.l.bf16 %v8413_v41 }
 0x2aa   : > { %1459 = vst [vmem:[%s10694_s23 + $0xc8] sm:$0xf] %v1458_v55  ;;  %v13139_v58 = vpop.permute.xlu1 %4474 }
 0x2af   : > { %9219 = vmatmul.mubr.bf16.gmra.mrb[28].mxu0 %v12643_v2  ;;  %v1452_v2 = vsel %vm13113_vm7, 0, %v1451_v6  ;;  %v8409_v6 = vld [vmem:[%s10688_s22 + $0x18] sm:$0xff]  }
 0x2b0   : > { %1453 = vst [vmem:[%s10694_s23 + $0xc] sm:$0x1] %v1452_v2  ;;  %v4196_v2 = vld [vmem:[%s10688_s22 + $0xc] sm:$0xf] }
 0x2c4   : > { %v9348_v1 = vpop.f32.mrb[56].mxu1 }
 0x2c5   : > { %v5961_v60 = vadd.f32 %v9348_v1, %v5763_v31  ;;  %v5933_v47 = vpop.f32.mrb[57].mxu1  ;;  %v13133_v31 = vpop.permute.xlu0 %4479 }
 0x2c6   : > { %v5959_v27 = vadd.f32 %v5933_v47, %v5761_v51  ;;  %v9349_v14 = vpop.f32.mrb[58].mxu1 }
 0x2c7   : > { %v5936_v35 = vpop.f32.mrb[59].mxu1  ;;  %v13147_v14 = vpop.permute.xlu1 %4484 }
 0x2c8   : > { %v5960_v57 = vadd.f32 %v5936_v35, %v5762_v36  ;;  %14507 = vst [vmem:[#allocation31_spill] sm:$0xff] %v13147_v14  ;;  %v13271_v14 = vld [vmem:[%s10688_s22 + $0x68] sm:$0xff]  }
 0x2c9   : > { %v13137_v51 = vpop.permute.xlu0 %4489  ;;  %14528 = vst [vmem:[#allocation46_spill] sm:$0xff] %v13271_v14 }
 0x2e4   : > { %v9380_v11 = vpop.f32.mrb[60].mxu1 }
 0x2e5   : > { %v6182_v33 = vadd.f32 %v9380_v11, %v5961_v60  ;;  %v6154_v32 = vpop.f32.mrb[61].mxu1  ;;  %v13143_v60 = vpop.permute.xlu0 %4499  ;;  %v8300_v11 = vunpack.c.l.bf16 %v8409_v6 }
 0x2e6   : > { %v6180_v42 = vadd.f32 %v6154_v32, %v5959_v27  ;;  %v9381_v44 = vpop.f32.mrb[62].mxu1  ;;  %14506 = vst [vmem:[#allocation21_spill] sm:$0xff] %v13143_v60 }
 0x2e7   : > { %v6157_v17 = vpop.f32.mrb[63].mxu1  ;;  %v8423_v44 = vld [vmem:[%s10688_s22 + $0x90] sm:$0xff]  }
 0x2e8   : > { %v6181_v26 = vadd.f32 %v6157_v17, %v5960_v57  ;;  %v8408_v57 = vld [vmem:[%s10688_s22 + $0x10] sm:$0xff]   ;;  %v8424_v17 = vld [vmem:[%s10688_s22 + $0x98] sm:$0xff]  }
 0x2e9   : > { %v8297_v55 = vunpack.c.h.bf16 %v8408_v57  ;;  %v8296_v32 = vunpack.c.l.bf16 %v8408_v57  ;;  %v8411_v57 = vld [vmem:[%s10688_s22 + $0x28] sm:$0xff]  }
 0x2ea   : > { %v8308_v29 = vunpack.c.l.bf16 %v8411_v57 }
 0x2ec   : > { %v4309_v18 = vrot.slane %v8308_v29, 1 }
 0x304   : > { %v9412_v56 = vpop.f32.mrb[64].mxu1 }
 0x305   : > { %v6382_v5 = vadd.f32 %v9412_v56, %v6182_v33  ;;  %v6354_v10 = vpop.f32.mrb[65].mxu1  ;;  %v13154_v33 = vpop.permute.xlu0 %4509  ;;  %v8301_v56 = vunpack.c.h.bf16 %v8409_v6 }
 0x306   : > { %v6380_v53 = vadd.f32 %v6354_v10, %v6180_v42  ;;  %v9413_v22 = vpop.f32.mrb[66].mxu1  ;;  %14508 = vst [vmem:[#allocation29_spill] sm:$0xff] %v13154_v33  ;;  %v4229_v42 = vunpack.c.l.bf16 %v4196_v2  ;;  %v4301_v10 = vrot.slane %v8300_v11, 1  ;;  %v8417_v33 = vld [vmem:[%s10688_s22 + $0x58] sm:$0xff]  }
 0x307   : > { %v6357_v15 = vpop.f32.mrb[67].mxu1  ;;  %v8360_v22 = vunpack.c.l.bf16 %v8424_v17 }
 0x308   : > { %v6381_v45 = vadd.f32 %v6357_v15, %v6181_v26  ;;  %v13158_v26 = vpop.permute.xlu1 %4494  ;;  %v4296_v15 = vrot.slane %v4229_v42, 1  ;;  %v8425_v42 = vld [vmem:[%s10688_s22 + $0xa0] sm:$0xff]  }
 0x309   : > { %v13163_v2 = vpop.permute.xlu0 %4519  ;;  %v7007_v11 = vrot.slane %v8360_v22, 1  ;;  %v8365_v22 = vunpack.c.h.bf16 %v8425_v42  ;;  %v8364_v4 = vunpack.c.l.bf16 %v8425_v42 }
 0x30a   : > { %14509 = vst [vmem:[#allocation32_spill] sm:$0xff] %v13163_v2  ;;  %v8427_v2 = vld [vmem:[%s10688_s22 + $0xb0] sm:$0xff]  }
 0x30b   : > { %v7013_v16 = vrot.slane %v8365_v22, 1  ;;  %v8373_v29 = vunpack.c.h.bf16 %v8427_v2 }
 0x30c   : > { %v13168_v6 = vpop.permute.xlu1 %4504 }
 0x30d   : > { %14510 = vst [vmem:[#allocation34_spill] sm:$0xff] %v13168_v6  ;;  %v13186_v61 = vpop.permute.xlu0 %4529  ;;  %v7011_v6 = vrot.slane %v8364_v4, 1  ;;  %v13210_v4 = vrot.slane %v8317_v34, 1 }
 0x30e   : > { %14511 = vst [vmem:[#allocation38_spill] sm:$0xff] %v13186_v61 }
 0x310   : > { %v13190_v40 = vpop.permute.xlu1 %4514 }
 0x311   : > { %14512 = vst [vmem:[#allocation40_spill] sm:$0xff] %v13190_v40  ;;  %v13214_v22 = vpop.permute.xlu0 %4539 }
 0x312   : > { %14513 = vst [vmem:[#allocation43_spill] sm:$0xff] %v13214_v22 }
 0x314   : > { %v13228_v34 = vpop.permute.xlu1 %4524 }
 0x315   : > { %14516 = vst [vmem:[#allocation49_spill] sm:$0xff] %v13228_v34 }
 0x324   : > { %v9444_v3 = vpop.f32.mrb[68].mxu1 }
 0x325   : > { %v13141_v36 = vadd.f32 %v9444_v3, %v6382_v5  ;;  %v6529_v1 = vpop.f32.mrb[69].mxu1  ;;  %v4299_v5 = vrot.slane %v8297_v55, 1  ;;  %v4303_v3 = vrot.slane %v8301_v56, 1  ;;  %v8426_v56 = vld [vmem:[%s10688_s22 + $0xa8] sm:$0xff]  }
 0x326   : > { %v13145_v47 = vadd.f32 %v6529_v1, %v6380_v53  ;;  %v9445_v27 = vpop.f32.mrb[70].mxu1  ;;  %v8357_v53 = vunpack.c.h.bf16 %v8423_v44  ;;  %v6954_v1 = vld [vmem:[%s10688_s22 + $0x8c] sm:$0xf]  ;;  %v8369_v23 = vunpack.c.h.bf16 %v8426_v56 }
 0x327   : > { %v6532_v35 = vpop.f32.mrb[71].mxu1  ;;  %v8361_v27 = vunpack.c.h.bf16 %v8424_v17  ;;  %v13166_v13 = vsel %vm2097_vm0, %v4299_v5, %v4301_v10  ;;  %v6970_v59 = vunpack.c.l.bf16 %v6954_v1  ;;  %v13181_v7 = vsel %vm2097_vm0, %v4301_v10, %v4303_v3 }
 0x328   : > { %v13151_v20 = vadd.f32 %v6532_v35, %v6381_v45  ;;  %v4297_v45 = vrot.slane %v8296_v32, 1  ;;  %v8410_v35 = vld [vmem:[%s10688_s22 + $0x20] sm:$0xff]   ;;  %v7005_v55 = vrot.slane %v8357_v53, 1  ;;  %v8356_v32 = vunpack.c.l.bf16 %v8423_v44 }
 0x329   : > { %v8305_v30 = vunpack.c.h.bf16 %v8410_v35  ;;  %v7009_v12 = vrot.slane %v8361_v27, 1  ;;  %v8304_v53 = vunpack.c.l.bf16 %v8410_v35  ;;  %v8368_v44 = vunpack.c.l.bf16 %v8426_v56  ;;  %v8428_v35 = vld [vmem:[%s10688_s22 + $0xb8] sm:$0xff]  }
 0x32a   : > { %v13171_v21 = vsel %vm2097_vm0, %v4297_v45, %v4299_v5  ;;  %v13176_v17 = vsel %vm2097_vm0, %v4296_v15, %v4297_v45  ;;  %v8309_v5 = vunpack.c.h.bf16 %v8411_v57  ;;  %v13184_v15 = vsel %vm2097_vm0, %v7005_v55, %v7007_v11 }
 0x32b   : > { %v7003_v45 = vrot.slane %v8356_v32, 1  ;;  %v8313_v1 = vunpack.c.h.bf16 %v8412_v28  ;;  %v7002_v43 = vrot.slane %v6970_v59, 1  ;;  %v4307_v10 = vrot.slane %v8305_v30, 1 }
 0x32c   : > { %v8312_v27 = vunpack.c.l.bf16 %v8412_v28  ;;  %v13193_v57 = vsel %vm2097_vm0, %v7007_v11, %v7009_v12  ;;  %v4305_v42 = vrot.slane %v8304_v53, 1  ;;  %v4311_v56 = vrot.slane %v8309_v5, 1  ;;  %v8415_v5 = vld [vmem:[%s10688_s22 + $0x48] sm:$0xff]  }
 0x32d   : > { %v7015_v32 = vrot.slane %v8368_v44, 1  ;;  %v7017_v61 = vrot.slane %v8369_v23, 1  ;;  %v4315_v59 = vrot.slane %v8313_v1, 1  ;;  %v4317_v30 = vrot.slane %v8316_v46, 1 }
 0x32e   : > { %v8376_v28 = vunpack.c.l.bf16 %v8428_v35  ;;  %v13196_v48 = vsel %vm2097_vm0, %v7002_v43, %v7003_v45  ;;  %v13199_v40 = vsel %vm2097_vm0, %v7003_v45, %v7005_v55  ;;  %v13202_v11 = vsel %vm2097_vm0, %v4307_v10, %v4309_v18  ;;  %v8414_v43 = vld [vmem:[%s10688_s22 + $0x40] sm:$0xff]  }
 0x32f   : > { %v4313_v41 = vrot.slane %v8312_v27, 1  ;;  %v13205_v53 = vsel %vm2097_vm0, %v4303_v3, %v4305_v42  ;;  %v13208_v23 = vsel %vm2097_vm0, %v4305_v42, %v4307_v10  ;;  %v8372_v46 = vunpack.c.l.bf16 %v8427_v2  ;;  %v8429_v27 = vld [vmem:[%s10688_s22 + $0xc0] sm:$0xff]   ;;  %v6969_v42 = vld [vmem:[%s10688_s22 + $0xc8] sm:$0x1] }
 0x330   : > { %v13217_v55 = vsel %vm2097_vm0, %v4309_v18, %v4311_v56  ;;  %v13220_v3 = vsel %vm2097_vm0, %v7013_v16, %v7015_v32  ;;  %v13223_v44 = vsel %vm2097_vm0, %v7009_v12, %v7011_v6  ;;  %v13226_v45 = vsel %vm2097_vm0, %v7015_v32, %v7017_v61  ;;  %v8416_v32 = vld [vmem:[%s10688_s22 + $0x50] sm:$0xff]  }
 0x331   : > { %14514 = vst [vmem:[#allocation45_spill] sm:$0xff] %v13223_v44  ;;  %14515 = vst [vmem:[#allocation47_spill] sm:$0xff] %v13226_v45  ;;  %v13231_v2 = vsel %vm2097_vm0, %v7011_v6, %v7013_v16  ;;  %v13234_v1 = vsel %vm2097_vm0, %v4315_v59, %v4317_v30  ;;  %v7021_v18 = vrot.slane %v8373_v29, 1  ;;  %v7023_v10 = vrot.slane %v8376_v28, 1  ;;  %v13253_v45 = vpop.permute.xlu0 %4549 }
 0x332   : > { %14517 = vst [vmem:[#allocation50_spill] sm:$0xff] %v13231_v2  ;;  %14518 = vst [vmem:[#allocation53_spill] sm:$0xff] %v13234_v1  ;;  %v13239_v22 = vsel %vm2097_vm0, %v4311_v56, %v4313_v41  ;;  %v8377_v12 = vunpack.c.h.bf16 %v8428_v35  ;;  %v8321_v0 = vunpack.c.h.bf16 %v8414_v43  ;;  %v8324_v60 = vunpack.c.l.bf16 %v8415_v5 }
 0x333   : > { %14519 = vst [vmem:[#allocation19_spill] sm:$0xff] %v13239_v22  ;;  %v13245_v34 = vsel %vm2097_vm0, %v4317_v30, %v13210_v4  ;;  %v7019_v16 = vrot.slane %v8372_v46, 1  ;;  %v8320_v6 = vunpack.c.l.bf16 %v8414_v43  ;;  %v8325_v2 = vunpack.c.h.bf16 %v8415_v5  ;;  %14523 = vst [vmem:[#allocation65_spill] sm:$0xff] %v13253_v45  ;;  %v13255_v5 = vpop.permute.xlu1 %4534 }
 0x334   : > { %14520 = vst [vmem:[#allocation55_spill] sm:$0xff] %v13245_v34  ;;  %v13248_v29 = vsel %vm2097_vm0, %v4313_v41, %v4315_v59  ;;  %v8381_v28 = vunpack.c.h.bf16 %v8429_v27  ;;  %v6985_v1 = vunpack.c.l.bf16 %v6969_v42  ;;  %v8380_v19 = vunpack.c.l.bf16 %v8429_v27  ;;  %14524 = vst [vmem:[#allocation35_spill] sm:$0xff] %v13255_v5 }
 0x335   : > { %14521 = vst [vmem:[#allocation57_spill] sm:$0xff] %v13248_v29  ;;  %v13251_v56 = vsel %vm2097_vm0, %v7021_v18, %v7023_v10  ;;  %v8329_v35 = vunpack.c.h.bf16 %v8416_v32  ;;  %v8332_v22 = vunpack.c.l.bf16 %v8417_v33  ;;  %v8328_v9 = vunpack.c.l.bf16 %v8416_v32 }
 0x336   : > { %14522 = vst [vmem:[#allocation61_spill] sm:$0xff] %v13251_v56  ;;  %v7025_v30 = vrot.slane %v8377_v12, 1  ;;  %v4323_v34 = vrot.slane %v8321_v0, 1  ;;  %v4325_v46 = vrot.slane %v8324_v60, 1  ;;  %v8333_v43 = vunpack.c.h.bf16 %v8417_v33  ;;  %v8418_v56 = vld [vmem:[%s10688_s22 + $0x60] sm:$0xff]  }
 0x337   : > { %v13261_v27 = vsel %vm2097_vm0, %v7017_v61, %v7019_v16  ;;  %v4321_v42 = vrot.slane %v8320_v6, 1  ;;  %v4327_v32 = vrot.slane %v8325_v2, 1  ;;  %v7029_v0 = vrot.slane %v8381_v28, 1 }
 0x338   : > { %v7031_v60 = vrot.slane %v6985_v1, 1  ;;  %v7027_v33 = vrot.slane %v8380_v19, 1  ;;  %v13267_v5 = vsel %vm2097_vm0, %v7019_v16, %v7021_v18  ;;  %v13280_v2 = vsel %vm2097_vm0, %v4323_v34, %v4325_v46  ;;  %v13287_v1 = vld [vmem:[%s14183_s2] ss:$0 sm:$0xff]  ;;  %v13299_v16 = vpop.permute.xlu0 %7085 }
 0x339   : > { %14527 = vst [vmem:[#allocation44_spill] sm:$0xff] %v13267_v5  ;;  %14530 = vst [vmem:[#allocation17_spill] sm:$0xff] %v13280_v2  ;;  %v13282_v19 = vrot.slane %v8333_v43, 1  ;;  %v13297_v18 = vsel %vm2097_vm0, %v4321_v42, %v4323_v34  ;;  %v13309_v43 = vpop.permute.xlu1 %4544 }
 0x33a   : > { %14534 = vst [vmem:[#allocation56_spill] sm:$0xff] %v13297_v18  ;;  %v13303_v28 = vsel %vm2097_vm0, %v7029_v0, %v7031_v60  ;;  %14537 = vst [vmem:[#allocation74_spill] sm:$0xff] %v13309_v43 }
 0x33b   : > { %14531 = vst [vmem:[#allocation18_spill] sm:$0xff] %v13282_v19  ;;  %14535 = vst [vmem:[#allocation59_spill] sm:$0xff] %v13303_v28 }
 0x344   : > { %v9476_v44 = vpop.f32.mrb[72].mxu1 }
 0x345   : > { %v13258_v59 = vadd.f32 %v9476_v44, %v13141_v36  ;;  %v6724_v41 = vpop.f32.mrb[73].mxu1  ;;  %v4331_v36 = vrot.slane %v8329_v35, 1  ;;  %v4333_v44 = vrot.slane %v8332_v22, 1  ;;  %v13291_v22 = vsel %vm2097_vm0, %v13210_v4, %v4321_v42 }
 0x346   : > { %v13264_v45 = vadd.f32 %v6724_v41, %v13145_v47  ;;  %v9477_v12 = vpop.f32.mrb[74].mxu1  ;;  %v13277_v47 = vsel %vm2097_vm0, %v7023_v10, %v7025_v30  ;;  %14532 = vst [vmem:[#allocation54_spill] sm:$0xff] %v13291_v22  ;;  %v8337_v10 = vunpack.c.h.bf16 %v8418_v56  ;;  %v13306_v35 = vsel %vm2097_vm0, %v7025_v30, %v7027_v33 }
 0x347   : > { %14525 = vst [vmem:[#allocation39_spill] sm:$0xff] %v13258_v59  ;;  %v6727_v29 = vpop.f32.mrb[75].mxu1  ;;  %v4329_v59 = vrot.slane %v8328_v9, 1  ;;  %14536 = vst [vmem:[#allocation62_spill] sm:$0xff] %v13306_v35  ;;  %v8340_v4 = vunpack.c.l.bf16 %v13271_v14  ;;  %v13313_v41 = vsel %vm2097_vm0, %v7027_v33, %v7029_v0  ;;  %v13316_v42 = vsel %vm2097_vm0, %v4331_v36, %v4333_v44  ;;  %v5175_v14 = vld [vmem:[%s10694_s23 + $0xc] sm:$0xf] }
 0x348   : > { %14526 = vst [vmem:[#allocation41_spill] sm:$0xff] %v13264_v45  ;;  %v13274_v61 = vadd.f32 %v6727_v29, %v13151_v20  ;;  %v13294_v20 = vsel %vm2097_vm0, %v4325_v46, %v4327_v32  ;;  %14538 = vst [vmem:[#allocation75_spill] sm:$0xff] %v13313_v41  ;;  %v13325_v43 = vsel %vm2097_vm0, %v4333_v44, %v13282_v19 }
 0x349   : > { %14533 = vst [vmem:[#allocation20_spill] sm:$0xff] %v13294_v20  ;;  %14539 = vst [vmem:[#allocation76_spill] sm:$0xff] %v13316_v42  ;;  %v13335_v44 = vrot.slane %v8340_v4, 1 }
 0x34a   : > { %14529 = vst [vmem:[#allocation48_spill] sm:$0xff] %v13274_v61  ;;  %v9192_v9 = vpop.f32.mrb[0].mxu0  ;;  %14541 = vst [vmem:[#allocation78_spill] sm:$0xff] %v13325_v43 }
 0x34b   : > { %v9510_v6 = vadd.f32 %v9192_v9, %v12836_v49  ;;  %v3999_v29 = vpop.f32.mrb[1].mxu0  ;;  %v13319_v49 = vsel %vm2097_vm0, %v4327_v32, %v4329_v59  ;;  %v13330_v32 = vrot.slane %v8337_v10, 1  ;;  %14543 = vst [vmem:[#allocation80_spill] sm:$0xff] %v13335_v44  ;;  %v13341_v10 = vsel %vm2097_vm0, %v4329_v59, %v4331_v36  ;;  %v7081_v36 = vpop.permute.xlu1 %7080 }
 0x34c   : > { %v9511_v46 = vadd.f32 %v3999_v29, %v12840_v8  ;;  %v9193_v34 = vpop.f32.mrb[2].mxu0  ;;  %14540 = vst [vmem:[#allocation77_spill] sm:$0xff] %v13319_v49  ;;  %v9496_v60 = vpop.f32.mrb[32].mxu1  ;;  %v8336_v8 = vunpack.c.l.bf16 %v8418_v56  ;;  %14544 = vst [vmem:[#allocation81_spill] sm:$0xff] %v13341_v10 }
 0x34d   : > { %v4166_v12 = vadd.f32 %v9510_v6, %v13287_v1  ;;  %v9512_v30 = vadd.f32 %v9193_v34, %v12846_v38  ;;  %v4002_v9 = vpop.f32.mrb[3].mxu0  ;;  %v6941_v33 = vadd.f32 %v9496_v60, %v13287_v1  ;;  %v6862_v42 = vpop.f32.mrb[33].mxu1  ;;  %14542 = vst [vmem:[#allocation79_spill] sm:$0xff] %v13330_v32 }
 0x34e   : > { %v4164_v0 = vadd.f32 %v9511_v46, %v13287_v1  ;;  %v9513_v29 = vadd.f32 %v4002_v9, %v12849_v25  ;;  %v6939_v34 = vadd.f32 %v13287_v1, %v6862_v42  ;;  %v9497_v49 = vpop.f32.mrb[34].mxu1  ;;  %v7091_v9 = vpop.permute.xlu0 %7090 }
 0x34f   : > { %v4395_v6 = vadd.f32 %v13166_v13, %v4166_v12  ;;  %v4167_v38 = vadd.f32 %v9512_v30, %v13287_v1  ;;  %v7050_v46 = vadd.f32 %v13184_v15, %v6941_v33  ;;  %v6865_v25 = vpop.f32.mrb[35].mxu1  ;;  %v6942_v4 = vadd.f32 %v9497_v49, %v13287_v1 }
 0x350   : > { %v4393_v56 = vadd.f32 %v13176_v17, %v4164_v0  ;;  %v4165_v60 = vadd.f32 %v9513_v29, %v13287_v1  ;;  %v7048_v42 = vadd.f32 %v13196_v48, %v6939_v34  ;;  %v13352_v0 = vrot.slane %v8336_v8, 1 }
 0x351   : > { %v4619_v13 = vmul.f32 %v13131_v24, %v4395_v6  ;;  %v4396_v12 = vadd.f32 %v13181_v7, %v4167_v38  ;;  %v13348_v17 = vmul.f32 %v7091_v9, %v7050_v46  ;;  %v6940_v6 = vadd.f32 %v13287_v1, %v6865_v25 }
 0x352   : > { %v4617_v30 = vmul.f32 %v13129_v50, %v4393_v56  ;;  %v13350_v15 = vpop.f32.mrb[4].mxu0  ;;  %14545 = vst [vmem:[#allocation82_spill] sm:$0xff] %v13352_v0  ;;  %v4394_v7 = vadd.f32 %v13171_v21, %v4165_v60  ;;  %v13364_v50 = vsel %vm2097_vm0, %v13330_v32, %v13335_v44  ;;  %v13368_v29 = vmul.f32 %v7081_v36, %v7048_v42 }
 0x353   : > { %v8141_v33 = vpack.c.bf16 %v4619_v13, %v4619_v13  ;;  %v13356_v24 = vmul.f32 %v13139_v58, %v4396_v12  ;;  %v13359_v48 = vpop.f32.mrb[5].mxu0  ;;  %14546 = vst [vmem:[#allocation83_spill] sm:$0xff] %v13364_v50  ;;  %v8173_v8 = vpack.c.bf16 %v13348_v17, %v13348_v17  ;;  %v4689_v58 = vmul.f32 %v4619_v13, %v4619_v13 }
 0x354   : > { %v8139_v49 = vpack.c.bf16 %v4617_v30, %v4617_v30  ;;  %v13371_v38 = vpop.f32.mrb[6].mxu0  ;;  %v7051_v56 = vadd.f32 %v13193_v57, %v6942_v4  ;;  %v13376_v46 = vpop.f32.mrb[36].mxu1  ;;  %v4687_v9 = vmul.f32 %v4617_v30, %v4617_v30  ;;  %v13382_v42 = vmul.f32 %v13348_v17, %v13348_v17 }
 0x355   : > { %v4873_v34 = vshrl.u32 %v8141_v33, 16  ;;  %v8142_v21 = vpack.c.bf16 %v13356_v24, %v13356_v24  ;;  %v13378_v60 = vpop.f32.mrb[7].mxu0  ;;  %v7289_v25 = vshrl.u32 %v8173_v8, 16  ;;  %v13384_v36 = vpop.f32.mrb[37].mxu1  ;;  %v4876_v50 = vshll.u32 %v8141_v33, 16 }
 0x356   : > { %v4856_v12 = vshrl.u32 %v8139_v49, 16  ;;  %v4618_v10 = vmul.f32 %v13135_v52, %v4394_v7  ;;  %v13387_v57 = vpop.f32.mrb[38].mxu1  ;;  %v4859_v43 = vshll.u32 %v8139_v49, 16  ;;  %v13393_v44 = vmul.f32 %v13356_v24, %v13356_v24  ;;  %v7096_v7 = vpop.permute.xlu0 %7095 }
 0x357   : > { %v4875_v59 = vrot.slane %v4873_v34, 7  ;;  %v4882_v32 = vshrl.u32 %v8142_v21, 16  ;;  %v8171_v19 = vpack.c.bf16 %v13368_v29, %v13368_v29  ;;  %v13397_v0 = vpop.f32.mrb[39].mxu1  ;;  %v4885_v33 = vshll.u32 %v8142_v21, 16 }
 0x358   : > { %v13389_v4 = vrot.slane %v4856_v12, 7  ;;  %v7292_v41 = vshll.u32 %v8173_v8, 16  ;;  %v4649_v52 = vadd.f32 %v4618_v10, %v4617_v30  ;;  %v13409_v35 = vrot.slane %v7289_v25, 7 }
 0x359   : > { %v13400_v34 = vrot.slane %v4882_v32, 7  ;;  %v4878_v61 = vor.u32 %v4876_v50, %v4875_v59  ;;  %v7189_v32 = vmul.f32 %v13368_v29, %v13368_v29  ;;  %v4880_v8 = vrot.slane %v4875_v59, 4 }
 0x35a   : > { %v4861_v12 = vor.u32 %v4859_v43, %v13389_v4  ;;  %v13413_v18 = vpop.f32.mrb[8].mxu0  ;;  %v4650_v50 = vadd.f32 %v4649_v52, %v4619_v13  ;;  %v4688_v21 = vmul.f32 %v4618_v10, %v4618_v10  ;;  %v4862_v28 = vrot.slane %v13389_v4, 4 }
 0x35b   : > { %v4887_v30 = vor.u32 %v4885_v33, %v13400_v34  ;;  %v13416_v45 = vpop.f32.mrb[9].mxu0  ;;  %v8140_v25 = vpack.c.bf16 %v4618_v10, %v4618_v10  ;;  %v7272_v20 = vshrl.u32 %v8171_v19, 16  ;;  %v13426_v33 = vmul.f32 %v7096_v7, %v7051_v56 }
 0x35c   : > { %v5176_v43 = vsel %vm13121_vm9, %v4861_v12, %v5175_v14  ;;  %v13421_v22 = vpop.f32.mrb[10].mxu0  ;;  %v4719_v2 = vadd.f32 %v4688_v21, %v4687_v9  ;;  %v7049_v13 = vadd.f32 %v13199_v40, %v6940_v6  ;;  %v13429_v52 = vpop.f32.mrb[40].mxu1  ;;  %v7275_v10 = vshll.u32 %v8171_v19, 16 }
 0x35d   : > { %5177 = vst [vmem:[%s10694_s23 + $0xc] sm:$0xf] %v5176_v43  ;;  %v4888_v59 = vsel %vm13404_vm11, %v4880_v8, %v4887_v30  ;;  %v13431_v5 = vpop.f32.mrb[11].mxu0  ;;  %v4864_v4 = vshrl.u32 %v8140_v25, 16  ;;  %v13434_v14 = vrot.slane %v7272_v20, 7  ;;  %v9514_v12 = vadd.f32 %v13350_v15, %v12867_v37  ;;  %v13438_v43 = vpop.f32.mrb[41].mxu1 }
 0x35e   : > { %5180 = vst [vmem:[%s10694_s23 + $0x18] sm:$0xf] %v4888_v59  ;;  %v7294_v9 = vor.u32 %v7292_v41, %v13409_v35  ;;  %v4720_v56 = vadd.f32 %v4719_v2, %v4689_v58  ;;  %v8174_v40 = vpack.c.bf16 %v13426_v33, %v13426_v33  ;;  %v7154_v6 = vmul.f32 %v13299_v16, %v7049_v13  ;;  %v13444_v7 = vpop.f32.mrb[42].mxu1  ;;  %v13446_v8 = vpop.permute.xlu0 %7100 }
 0x35f   : > { %v4866_v20 = vrot.slane %v4864_v4, 7  ;;  %v4867_v30 = vshll.u32 %v8140_v25, 16  ;;  %v13449_v19 = vor.u32 %v7275_v10, %v13434_v14  ;;  %v4170_v37 = vadd.f32 %v9514_v12, %v13287_v1  ;;  %v13452_v15 = vpop.f32.mrb[43].mxu1 }
 0x360   : > { %v7298_v41 = vshrl.u32 %v8174_v40, 16  ;;  %v7301_v2 = vshll.u32 %v8174_v40, 16  ;;  %v7168_v58 = vadd.f32 %v7154_v6, %v13368_v29  ;;  %v7190_v21 = vmul.f32 %v7154_v6, %v7154_v6 }
 0x361   : > { %14549 = vst [vmem:[#allocation84_spill] sm:$0xff] %v13449_v19  ;;  %v4869_v16 = vor.u32 %v4867_v30, %v4866_v20  ;;  %v4871_v59 = vrot.slane %v4866_v20, 4  ;;  %v8172_v13 = vpack.c.bf16 %v7154_v6, %v7154_v6  ;;  %v4399_v4 = vadd.f32 %v13202_v11, %v4170_v37  ;;  %v14555_v19 = vld [vmem:[#allocation25_spill] sm:$0xff] }
 0x362   : > { %v13456_v25 = vpop.f32.mrb[12].mxu0  ;;  %v13458_v10 = vrot.slane %v7298_v41, 7  ;;  %v13461_v12 = vadd.f32 %v7168_v58, %v13348_v17  ;;  %v7204_v39 = vadd.f32 %v7190_v21, %v7189_v32  ;;  %v9515_v40 = vadd.f32 %v13359_v48, %v12871_v63  ;;  %v13485_v41 = vpop.permute.xlu0 %7105 }
 0x363   : > { %v13465_v29 = vpop.f32.mrb[13].mxu0  ;;  %v7296_v30 = vrot.slane %v13409_v35, 4  ;;  %v4870_v6 = vsel %vm13404_vm11, %v4862_v28, %v4869_v16  ;;  %v4879_v11 = vsel %vm13404_vm11, %v4871_v59, %v4878_v61  ;;  %v7280_v20 = vshrl.u32 %v8172_v13, 16 }
 0x364   : > { %v13472_v37 = vpop.f32.mrb[14].mxu0  ;;  %5178 = vst [vmem:[%s10694_s23 + $0x10] sm:$0xf] %v4870_v6  ;;  %5179 = vst [vmem:[%s10694_s23 + $0x14] sm:$0xf] %v4879_v11  ;;  %v7303_v17 = vor.u32 %v7301_v2, %v13458_v10  ;;  %v7205_v32 = vadd.f32 %v7204_v39, %v13382_v42  ;;  %v7283_v63 = vshll.u32 %v8172_v13, 16  ;;  %v13479_v48 = vmul.f32 %v13137_v51, %v4399_v4 }
 0x365   : > { %v13481_v35 = vpop.f32.mrb[76].mxu1  ;;  %v13483_v28 = vpop.f32.mrb[15].mxu0  ;;  %v7282_v61 = vrot.slane %v7280_v20, 7  ;;  %v4168_v58 = vadd.f32 %v9515_v40, %v13287_v1  ;;  %v4651_v21 = vadd.f32 %v4650_v50, %v13356_v24  ;;  %v4721_v2 = vadd.f32 %v4720_v56, %v13393_v44 }
 0x366   : > { %v13490_v16 = vpop.f32.mrb[77].mxu1  ;;  %v7278_v39 = vrot.slane %v13434_v14, 4  ;;  %v7304_v51 = vsel %vm13404_vm11, %v7296_v30, %v7303_v17  ;;  %v8145_v42 = vpack.c.bf16 %v13479_v48, %v13479_v48  ;;  %v9516_v59 = vadd.f32 %v13371_v38, %v12875_v54 }
 0x367   : > { %v9509_v13 = vpop.f32.mrb[78].mxu1  ;;  %7426 = vst [vmem:[%s10694_s23 + $0x98] sm:$0xf] %v7304_v51  ;;  %v7285_v4 = vor.u32 %v7283_v63, %v7282_v61  ;;  %v7287_v24 = vrot.slane %v7282_v61, 4  ;;  %v4397_v44 = vadd.f32 %v13205_v53, %v4168_v58  ;;  %v6945_v50 = vadd.f32 %v13376_v46, %v13287_v1  ;;  %v7111_v63 = vpop.permute.xlu0 %7110 }
 0x368   : > { %v13503_v14 = vpop.f32.mrb[79].mxu1  ;;  %v4889_v56 = vrot.slane %v13400_v34, 4  ;;  %v4909_v40 = vshrl.u32 %v8145_v42, 16  ;;  %v4171_v30 = vadd.f32 %v9516_v59, %v13287_v1  ;;  %v9517_v54 = vadd.f32 %v13378_v60, %v12878_v62 }
 0x369   : > { %v7286_v38 = vsel %vm13404_vm11, %v7278_v39, %v7285_v4  ;;  %v7295_v6 = vsel %vm13404_vm11, %v7287_v24, %v7294_v9  ;;  %v4621_v53 = vmul.f32 %v13133_v31, %v4397_v44  ;;  %v7054_v46 = vadd.f32 %v13220_v3, %v6945_v50  ;;  %v14554_v4 = vld [vmem:[#allocation22_spill] sm:$0xff] }
 0x36a   : > { %v13515_v11 = vpop.f32.mrb[16].mxu0  ;;  %v7192_v34 = vmul.f32 %v13426_v33, %v13426_v33  ;;  %7424 = vst [vmem:[%s10694_s23 + $0x90] sm:$0xf] %v7286_v38  ;;  %7425 = vst [vmem:[%s10694_s23 + $0x94] sm:$0xf] %v7295_v6  ;;  %v4911_v20 = vrot.slane %v4909_v40, 7  ;;  %v4400_v62 = vadd.f32 %v13217_v55, %v4171_v30  ;;  %v4169_v60 = vadd.f32 %v9517_v54, %v13287_v1 }
 0x36b   : > { %v13523_v17 = vpop.f32.mrb[17].mxu0  ;;  %v4652_v9 = vadd.f32 %v4651_v21, %v4621_v53  ;;  %v4691_v61 = vmul.f32 %v4621_v53, %v4621_v53  ;;  %v8143_v31 = vpack.c.bf16 %v4621_v53, %v4621_v53  ;;  %v6943_v3 = vadd.f32 %v13287_v1, %v13384_v36  ;;  %v14551_v54 = vld [vmem:[#allocation45_spill] sm:$0xff] }
 0x36c   : > { %v13527_v58 = vpop.f32.mrb[18].mxu0  ;;  %v4912_v39 = vshll.u32 %v8145_v42, 16  ;;  %v13530_v51 = vmul.f32 %v13158_v26, %v4400_v62  ;;  %v13532_v59 = vmul.f32 %v7111_v63, %v7054_v46  ;;  %v4398_v55 = vadd.f32 %v13208_v23, %v4169_v60  ;;  %v14550_v42 = vld [vmem:[#allocation31_spill] sm:$0xff] }
 0x36d   : > { %v13535_v13 = vpop.f32.mrb[19].mxu0  ;;  %v4693_v21 = vmul.f32 %v13479_v48, %v13479_v48  ;;  %v4722_v24 = vadd.f32 %v4721_v2, %v4691_v61  ;;  %v4891_v44 = vshrl.u32 %v8143_v31, 16  ;;  %v4894_v50 = vshll.u32 %v8143_v31, 16 }
 0x36e   : > { %v13540_v36 = vor.u32 %v4912_v39, %v4911_v20  ;;  %v8146_v26 = vpack.c.bf16 %v13530_v51, %v13530_v51  ;;  %v4622_v40 = vmul.f32 %v14550_v42, %v4398_v55  ;;  %v7052_v23 = vadd.f32 %v14551_v54, %v6943_v3  ;;  %v7116_v42 = vpop.permute.xlu0 %7115 }
 0x36f   : > { %v4893_v30 = vrot.slane %v4891_v44, 7  ;;  %v7170_v38 = vadd.f32 %v13461_v12, %v13426_v33  ;;  %v7206_v6 = vadd.f32 %v7205_v32, %v7192_v34  ;;  %v4916_v53 = vrot.slane %v4911_v20, 4 }
 0x370   : > { %v4918_v46 = vshrl.u32 %v8146_v26, 16  ;;  %v13550_v2 = vmul.f32 %v13532_v59, %v13532_v59  ;;  %v13554_v62 = vpack.c.bf16 %v13532_v59, %v13532_v59  ;;  %v13558_v63 = vmul.f32 %v13530_v51, %v13530_v51 }
 0x371   : > { %v4896_v60 = vor.u32 %v4894_v50, %v4893_v30  ;;  %v4653_v61 = vadd.f32 %v4652_v9, %v4622_v40  ;;  %v4692_v31 = vmul.f32 %v4622_v40, %v4622_v40  ;;  %v4921_v32 = vshll.u32 %v8146_v26, 16 }
 0x372   : > { %v13560_v33 = vpop.f32.mrb[20].mxu0  ;;  %v13562_v12 = vrot.slane %v4918_v46, 7  ;;  %v8144_v34 = vpack.c.bf16 %v4622_v40, %v4622_v40  ;;  %v7157_v20 = vmul.f32 %v13446_v8, %v7052_v23  ;;  %v6946_v9 = vadd.f32 %v13387_v57, %v13287_v1 }
 0x373   : > { %v13565_v3 = vpop.f32.mrb[21].mxu0  ;;  %v4897_v39 = vsel %vm13404_vm11, %v4889_v56, %v4896_v60  ;;  %v4654_v55 = vadd.f32 %v4653_v61, %v13479_v48  ;;  %v4723_v44 = vadd.f32 %v4722_v24, %v4692_v31  ;;  %v4898_v54 = vrot.slane %v4893_v30, 4  ;;  %v14553_v31 = vld [vmem:[#allocation47_spill] sm:$0xff] }
 0x374   : > { %v13572_v50 = vpop.f32.mrb[22].mxu0  ;;  %5181 = vst [vmem:[%s10694_s23 + $0x1c] sm:$0xf] %v4897_v39  ;;  %v4923_v26 = vor.u32 %v4921_v32, %v13562_v12  ;;  %v7325_v8 = vshrl.u32 %v13554_v62, 16  ;;  %v7328_v40 = vshll.u32 %v13554_v62, 16  ;;  %v4900_v48 = vshrl.u32 %v8144_v34, 16 }
 0x375   : > { %v13578_v23 = vpop.f32.mrb[23].mxu0  ;;  %v4724_v56 = vadd.f32 %v4723_v44, %v4693_v21  ;;  %v4903_v24 = vshll.u32 %v8144_v34, 16  ;;  %v7171_v46 = vadd.f32 %v7170_v38, %v7157_v20  ;;  %v7193_v60 = vmul.f32 %v7157_v20, %v7157_v20 }
 0x376   : > { %14552 = vst [vmem:[#allocation31_spill] sm:$0xff] %v13578_v23  ;;  %v4924_v57 = vsel %vm13404_vm11, %v4916_v53, %v4923_v26  ;;  %v8175_v61 = vpack.c.bf16 %v7157_v20, %v7157_v20  ;;  %v7055_v30 = vadd.f32 %v14553_v31, %v6946_v9  ;;  %v4902_v39 = vrot.slane %v4900_v48, 7  ;;  %v14556_v26 = vld [vmem:[#allocation50_spill] sm:$0xff] }
 0x377   : > { %5184 = vst [vmem:[%s10694_s23 + $0x28] sm:$0xf] %v4924_v57  ;;  %v6944_v32 = vadd.f32 %v13287_v1, %v13397_v0  ;;  %v9518_v62 = vadd.f32 %v13413_v18, %v14554_v4  ;;  %v9519_v21 = vadd.f32 %v13416_v45, %v14555_v19  ;;  %v7327_v34 = vrot.slane %v7325_v8, 7  ;;  %v13596_v57 = vpop.permute.xlu0 %7120 }
 0x378   : > { %v7207_v38 = vadd.f32 %v7206_v6, %v7193_v60  ;;  %v7307_v44 = vshrl.u32 %v8175_v61, 16  ;;  %v13590_v23 = vmul.f32 %v7116_v42, %v7055_v30  ;;  %v4905_v53 = vor.u32 %v4903_v24, %v4902_v39  ;;  %v14557_v60 = vld [vmem:[#allocation53_spill] sm:$0xff] }
 0x379   : > { %v4907_v20 = vrot.slane %v4902_v39, 4  ;;  %v7053_v9 = vadd.f32 %v14556_v26, %v6944_v32  ;;  %v4174_v48 = vadd.f32 %v9518_v62, %v13287_v1  ;;  %v7310_v4 = vshll.u32 %v8175_v61, 16  ;;  %v14566_v61 = vld [vmem:[#allocation61_spill] sm:$0xff] }
 0x37a   : > { %v13594_v0 = vpop.f32.mrb[24].mxu0  ;;  %v7309_v18 = vrot.slane %v7307_v44, 7  ;;  %v8178_v45 = vpack.c.bf16 %v13590_v23, %v13590_v23  ;;  %v4172_v19 = vadd.f32 %v9519_v21, %v13287_v1  ;;  %v4906_v42 = vsel %vm13404_vm11, %v4898_v54, %v4905_v53 }
 0x37b   : > { %v13601_v6 = vpop.f32.mrb[25].mxu0  ;;  %v4915_v8 = vsel %vm13404_vm11, %v4907_v20, %v13540_v36  ;;  %v7158_v24 = vmul.f32 %v13485_v41, %v7053_v9  ;;  %v4403_v31 = vadd.f32 %v14557_v60, %v4174_v48  ;;  %5182 = vst [vmem:[%s10694_s23 + $0x20] sm:$0xf] %v4906_v42  ;;  %v14558_v36 = vld [vmem:[#allocation29_spill] sm:$0xff]  ;;  %v14559_v41 = vrot.slane %v13458_v10, 4  ;;  %v14560_v48 = vld [vmem:[#allocation19_spill] sm:$0xff]  ;;  %v13630_v60 = vpop.permute.xlu0 %7125 }
 0x37c   : > { %v13610_v30 = vpop.f32.mrb[26].mxu0  ;;  %5183 = vst [vmem:[%s10694_s23 + $0x24] sm:$0xf] %v4915_v8  ;;  %v7312_v39 = vor.u32 %v7310_v4, %v7309_v18  ;;  %v7334_v32 = vshrl.u32 %v8178_v45, 16  ;;  %v7337_v62 = vshll.u32 %v8178_v45, 16  ;;  %v4401_v42 = vadd.f32 %v14560_v48, %v4172_v19 }
 0x37d   : > { %v13615_v21 = vpop.f32.mrb[27].mxu0  ;;  %v7172_v54 = vadd.f32 %v7171_v46, %v7158_v24  ;;  %v7194_v44 = vmul.f32 %v7158_v24, %v7158_v24  ;;  %v8176_v53 = vpack.c.bf16 %v7158_v24, %v7158_v24  ;;  %v13618_v20 = vmul.f32 %v14558_v36, %v4403_v31 }
 0x37e   : > { %v7313_v26 = vsel %vm13404_vm11, %v14559_v41, %v7312_v39  ;;  %v13624_v9 = vrot.slane %v7334_v32, 7  ;;  %v4655_v4 = vadd.f32 %v4654_v55, %v13530_v51  ;;  %v7330_v45 = vor.u32 %v7328_v40, %v7327_v34  ;;  %v14561_v51 = vld [vmem:[#allocation21_spill] sm:$0xff] }
 0x37f   : > { %7427 = vst [vmem:[%s10694_s23 + $0x9c] sm:$0xf] %v7313_v26  ;;  %v7173_v46 = vadd.f32 %v7172_v54, %v13532_v59  ;;  %v7208_v8 = vadd.f32 %v7207_v38, %v7194_v44  ;;  %v7316_v24 = vshrl.u32 %v8176_v53, 16  ;;  %v7332_v31 = vrot.slane %v7327_v34, 4  ;;  %v14562_v44 = vld [vmem:[#allocation26_spill] sm:$0xff] }
 0x380   : > { %v7339_v10 = vor.u32 %v7337_v62, %v13624_v9  ;;  %v7319_v36 = vshll.u32 %v8176_v53, 16  ;;  %v8149_v39 = vpack.c.bf16 %v13618_v20, %v13618_v20  ;;  %v4625_v55 = vmul.f32 %v14561_v51, %v4401_v42 }
 0x381   : > { %v7209_v19 = vadd.f32 %v7208_v8, %v13550_v2  ;;  %v7318_v32 = vrot.slane %v7316_v24, 7  ;;  %v4725_v40 = vadd.f32 %v4724_v56, %v13558_v63  ;;  %v7314_v38 = vrot.slane %v7309_v18, 4 }
 0x382   : > { %v13638_v59 = vpop.f32.mrb[28].mxu0  ;;  %v7340_v54 = vsel %vm13404_vm11, %v7332_v31, %v7339_v10  ;;  %v4945_v34 = vshrl.u32 %v8149_v39, 16  ;;  %v9520_v62 = vadd.f32 %v13421_v22, %v14562_v44  ;;  %v4656_v26 = vadd.f32 %v4655_v4, %v4625_v55  ;;  %v14564_v10 = vld [vmem:[#allocation23_spill] sm:$0xff] }
 0x383   : > { %v13644_v53 = vpop.f32.mrb[29].mxu0  ;;  %7430 = vst [vmem:[%s10694_s23 + $0xa8] sm:$0xf] %v7340_v54  ;;  %v7321_v2 = vor.u32 %v7319_v36, %v7318_v32  ;;  %v7323_v41 = vrot.slane %v7318_v32, 4  ;;  %v4695_v48 = vmul.f32 %v4625_v55, %v4625_v55  ;;  %v7196_v56 = vmul.f32 %v13590_v23, %v13590_v23  ;;  %v7131_v32 = vpop.permute.xlu0 %7130 }
 0x384   : > { %v13647_v63 = vpop.f32.mrb[30].mxu0  ;;  %v8147_v18 = vpack.c.bf16 %v4625_v55, %v4625_v55  ;;  %v4175_v42 = vadd.f32 %v9520_v62, %v13287_v1  ;;  %v6949_v22 = vadd.f32 %v13429_v52, %v13287_v1  ;;  %v9521_v36 = vadd.f32 %v13431_v5, %v14564_v10  ;;  %v14565_v52 = vld [vmem:[#allocation55_spill] sm:$0xff] }
 0x385   : > { %v13654_v8 = vpop.f32.mrb[31].mxu0  ;;  %v7322_v24 = vsel %vm13404_vm11, %v7314_v38, %v7321_v2  ;;  %v7331_v4 = vsel %vm13404_vm11, %v7323_v41, %v7330_v45  ;;  %v4726_v31 = vadd.f32 %v4725_v40, %v4695_v48  ;;  %v4947_v51 = vrot.slane %v4945_v34, 7  ;;  %v14567_v34 = vld [vmem:[#allocation40_spill] sm:$0xff] }
 0x386   : > { %14563 = vst [vmem:[#allocation45_spill] sm:$0xff] %v13654_v8  ;;  %7428 = vst [vmem:[%s10694_s23 + $0xa0] sm:$0xf] %v7322_v24  ;;  %v4948_v55 = vshll.u32 %v8149_v39, 16  ;;  %v4927_v54 = vshrl.u32 %v8147_v18, 16  ;;  %v4930_v44 = vshll.u32 %v8147_v18, 16  ;;  %v4404_v62 = vadd.f32 %v14565_v52, %v4175_v42 }
 0x387   : > { %7429 = vst [vmem:[%s10694_s23 + $0xa4] sm:$0xf] %v7331_v4  ;;  %v7058_v8 = vadd.f32 %v14566_v61, %v6949_v22  ;;  %v4173_v38 = vadd.f32 %v9521_v36, %v13287_v1  ;;  %v6947_v45 = vadd.f32 %v13287_v1, %v13438_v43  ;;  %v7174_v2 = vadd.f32 %v7173_v46, %v13590_v23  ;;  %v14568_v18 = vld [vmem:[#allocation57_spill] sm:$0xff]  ;;  %v7136_v24 = vpop.permute.xlu0 %7135  ;;  %v14570_v36 = vld [vmem:[#allocation34_spill] sm:$0xff] }
 0x388   : > { %v4929_v40 = vrot.slane %v4927_v54, 7  ;;  %v7210_v5 = vadd.f32 %v7209_v19, %v7196_v56  ;;  %v6950_v41 = vadd.f32 %v13444_v7, %v13287_v1  ;;  %v13673_v39 = vmul.f32 %v14567_v34, %v4404_v62 }
 0x389   : > { %v13675_v48 = vmul.f32 %v7131_v32, %v7058_v8  ;;  %v4402_v61 = vadd.f32 %v14568_v18, %v4173_v38  ;;  %v7056_v42 = vadd.f32 %v13261_v27, %v6947_v45  ;;  %v7341_v22 = vrot.slane %v13624_v9, 4  ;;  %v14576_v9 = vld [vmem:[#allocation54_spill] sm:$0xff] }
 0x38a   : > { %v4697_v43 = vmul.f32 %v13618_v20, %v13618_v20  ;;  %v4932_v23 = vor.u32 %v4930_v44, %v4929_v40  ;;  %v7059_v46 = vadd.f32 %v13277_v47, %v6950_v41  ;;  %v4950_v19 = vor.u32 %v4948_v55, %v4947_v51 }
 0x38b   : > { %v4952_v7 = vrot.slane %v4947_v51, 4  ;;  %v8150_v56 = vpack.c.bf16 %v13673_v39, %v13673_v39  ;;  %v13687_v8 = vpack.c.bf16 %v13675_v48, %v13675_v48  ;;  %v14569_v27 = vrot.slane %v13562_v12, 4 }
 0x38c   : > { %v4934_v10 = vrot.slane %v4929_v40, 4  ;;  %v4626_v32 = vmul.f32 %v14570_v36, %v4402_v61  ;;  %v7161_v47 = vmul.f32 %v13596_v57, %v7056_v42  ;;  %v13696_v54 = vmul.f32 %v7136_v24, %v7059_v46 }
 0x38d   : > { %v4933_v4 = vsel %vm13404_vm11, %v14569_v27, %v4932_v23  ;;  %v4954_v51 = vshrl.u32 %v8150_v56, 16  ;;  %v4957_v55 = vshll.u32 %v8150_v56, 16  ;;  %v6948_v44 = vadd.f32 %v13287_v1, %v13452_v15 }
 0x38e   : > { %5185 = vst [vmem:[%s10694_s23 + $0x2c] sm:$0xf] %v4933_v4  ;;  %v4657_v52 = vadd.f32 %v4656_v26, %v4626_v32  ;;  %v4696_v62 = vmul.f32 %v4626_v32, %v4626_v32  ;;  %v8148_v38 = vpack.c.bf16 %v4626_v32, %v4626_v32  ;;  %v7175_v12 = vadd.f32 %v7174_v2, %v7161_v47 }
 0x38f   : > { %v13700_v45 = vrot.slane %v4954_v51, 7  ;;  %v7361_v40 = vshrl.u32 %v13687_v8, 16  ;;  %v7197_v41 = vmul.f32 %v7161_v47, %v7161_v47  ;;  %v8179_v34 = vpack.c.bf16 %v7161_v47, %v7161_v47 }
 0x390   : > { %v4698_v57 = vmul.f32 %v13673_v39, %v13673_v39  ;;  %v4658_v18 = vadd.f32 %v4657_v52, %v13618_v20  ;;  %v4727_v61 = vadd.f32 %v4726_v31, %v4696_v62  ;;  %v4936_v42 = vshrl.u32 %v8148_v38, 16  ;;  %v14572_v52 = vld [vmem:[#allocation24_spill] sm:$0xff]  ;;  %v14573_v62 = vld [vmem:[#allocation27_spill] sm:$0xff] }
 0x391   : > { %v4959_v15 = vor.u32 %v4957_v55, %v13700_v45  ;;  %v7199_v26 = vmul.f32 %v13675_v48, %v13675_v48  ;;  %v7364_v2 = vshll.u32 %v13687_v8, 16  ;;  %v4939_v23 = vshll.u32 %v8148_v38, 16  ;;  %v14571_v8 = vld [vmem:[#allocation44_spill] sm:$0xff] }
 0x392   : > { %v4728_v46 = vadd.f32 %v4727_v61, %v4697_v43  ;;  %v4938_v56 = vrot.slane %v4936_v42, 7  ;;  %v7211_v24 = vadd.f32 %v7210_v5, %v7197_v41  ;;  %v7343_v27 = vshrl.u32 %v8179_v34, 16 }
 0x393   : > { %v4960_v4 = vsel %vm13404_vm11, %v4952_v7, %v4959_v15  ;;  %v7363_v36 = vrot.slane %v7361_v40, 7  ;;  %v7346_v32 = vshll.u32 %v8179_v34, 16  ;;  %v8182_v20 = vpack.c.bf16 %v13696_v54, %v13696_v54  ;;  %v13723_v40 = vpop.permute.xlu0 %7140 }
 0x394   : > { %5188 = vst [vmem:[%s10694_s23 + $0x38] sm:$0xf] %v4960_v4  ;;  %v4941_v31 = vor.u32 %v4939_v23, %v4938_v56  ;;  %v4943_v47 = vrot.slane %v4938_v56, 4  ;;  %v13715_v51 = vrot.slane %v7343_v27, 7  ;;  %v7057_v43 = vadd.f32 %v14571_v8, %v6948_v44  ;;  %v14574_v56 = vld [vmem:[#allocation28_spill] sm:$0xff] }
 0x395   : > { %v4961_v5 = vrot.slane %v13700_v45, 4  ;;  %v7370_v55 = vshrl.u32 %v8182_v20, 16  ;;  %v9522_v7 = vadd.f32 %v13456_v25, %v14572_v52  ;;  %v9523_v38 = vadd.f32 %v13465_v29, %v14573_v62  ;;  %v14588_v45 = vld [vmem:[#allocation48_spill] sm:$0xff] }
 0x396   : > { %v4942_v41 = vsel %vm13404_vm11, %v4934_v10, %v4941_v31  ;;  %v4951_v34 = vsel %vm13404_vm11, %v4943_v47, %v4950_v19  ;;  %v7348_v44 = vor.u32 %v7346_v32, %v13715_v51  ;;  %v7373_v61 = vshll.u32 %v8182_v20, 16  ;;  %v14575_v47 = vld [vmem:[#allocation17_spill] sm:$0xff] }
 0x397   : > { %5186 = vst [vmem:[%s10694_s23 + $0x30] sm:$0xf] %v4942_v41  ;;  %5187 = vst [vmem:[%s10694_s23 + $0x34] sm:$0xf] %v4951_v34  ;;  %v13732_v42 = vrot.slane %v7370_v55, 7  ;;  %v7162_v25 = vmul.f32 %v13630_v60, %v7057_v43  ;;  %v4178_v29 = vadd.f32 %v9522_v7, %v13287_v1  ;;  %v4176_v15 = vadd.f32 %v9523_v38, %v13287_v1  ;;  %v13754_v55 = vpop.permute.xlu0 %7145  ;;  %v14578_v7 = vld [vmem:[#allocation38_spill] sm:$0xff] }
 0x398   : > { %v7349_v10 = vsel %vm13404_vm11, %v7341_v22, %v7348_v44  ;;  %v4659_v19 = vadd.f32 %v4658_v18, %v13673_v39  ;;  %v4729_v23 = vadd.f32 %v4728_v46, %v4698_v57  ;;  %v9524_v27 = vadd.f32 %v13472_v37, %v14574_v56  ;;  %v14577_v18 = vld [vmem:[#allocation39_spill] sm:$0xff]  ;;  %v14579_v38 = vld [vmem:[#allocation32_spill] sm:$0xff] }
 0x399   : > { %v7368_v4 = vrot.slane %v7363_v36, 4  ;;  %7431 = vst [vmem:[%s10694_s23 + $0xac] sm:$0xf] %v7349_v10  ;;  %v7375_v60 = vor.u32 %v7373_v61, %v13732_v42  ;;  %v7176_v32 = vadd.f32 %v7175_v12, %v7162_v25  ;;  %v7198_v20 = vmul.f32 %v7162_v25, %v7162_v25  ;;  %v14580_v44 = vld [vmem:[#allocation20_spill] sm:$0xff]  ;;  %v14582_v56 = vld [vmem:[#allocation35_spill] sm:$0xff] }
 0x39a   : > { %v8180_v31 = vpack.c.bf16 %v7162_v25, %v7162_v25  ;;  %v4407_v8 = vadd.f32 %v14575_v47, %v4178_v29  ;;  %v4405_v43 = vadd.f32 %v14576_v9, %v4176_v15  ;;  %v4179_v22 = vadd.f32 %v9524_v27, %v13287_v1 }
 0x39b   : > { %v7376_v39 = vsel %vm13404_vm11, %v7368_v4, %v7375_v60  ;;  %v7177_v57 = vadd.f32 %v7176_v32, %v13675_v48  ;;  %v7212_v37 = vadd.f32 %v7211_v24, %v7198_v20  ;;  %v6938_v46 = vadd.f32 %v13481_v35, %v14577_v18  ;;  %v14581_v48 = vld [vmem:[#allocation30_spill] sm:$0xff]  ;;  %v14583_v4 = vld [vmem:[#allocation59_spill] sm:$0xff]  ;;  %v7151_v9 = vpop.permute.xlu0 %7150 }
 0x39c   : > { %v7366_v12 = vor.u32 %v7364_v2, %v7363_v36  ;;  %7434 = vst [vmem:[%s10694_s23 + $0xb8] sm:$0xf] %v7376_v39  ;;  %v7352_v52 = vshrl.u32 %v8180_v31, 16  ;;  %v13758_v62 = vmul.f32 %v14578_v7, %v4407_v8  ;;  %v4629_v41 = vmul.f32 %v14579_v38, %v4405_v43 }
 0x39d   : > { %v7213_v34 = vadd.f32 %v7212_v37, %v7199_v26  ;;  %v4408_v61 = vadd.f32 %v14580_v44, %v4179_v22  ;;  %v6953_v25 = vadd.f32 %v13287_v1, %v6938_v46  ;;  %v9525_v24 = vadd.f32 %v13483_v28, %v14581_v48  ;;  %v13780_v37 = vpop.permute.xlu1 %4554 }
 0x39e   : > { %v7354_v29 = vrot.slane %v7352_v52, 7  ;;  %v7355_v35 = vshll.u32 %v8180_v31, 16  ;;  %v8153_v2 = vpack.c.bf16 %v13758_v62, %v13758_v62  ;;  %v4660_v36 = vadd.f32 %v4659_v19, %v4629_v41  ;;  %v14584_v52 = vld [vmem:[#allocation41_spill] sm:$0xff] }
 0x39f   : > { %v4699_v15 = vmul.f32 %v4629_v41, %v4629_v41  ;;  %v8151_v10 = vpack.c.bf16 %v4629_v41, %v4629_v41  ;;  %v13768_v27 = vmul.f32 %v14582_v56, %v4408_v61  ;;  %v7062_v26 = vadd.f32 %v14583_v4, %v6953_v25 }
 0x3a0   : > { %v7350_v60 = vrot.slane %v13715_v51, 4  ;;  %v7357_v32 = vor.u32 %v7355_v35, %v7354_v29  ;;  %v7359_v20 = vrot.slane %v7354_v29, 4  ;;  %v4981_v28 = vshrl.u32 %v8153_v2, 16 }
 0x3a1   : > { %v7200_v31 = vmul.f32 %v13696_v54, %v13696_v54  ;;  %v4730_v47 = vadd.f32 %v4729_v23, %v4699_v15  ;;  %v4963_v8 = vshrl.u32 %v8151_v10, 16  ;;  %v4966_v19 = vshll.u32 %v8151_v10, 16 }
 0x3a2   : > { %v7358_v43 = vsel %vm13404_vm11, %v7350_v60, %v7357_v32  ;;  %v7367_v22 = vsel %vm13404_vm11, %v7359_v20, %v7366_v12  ;;  %v4983_v39 = vrot.slane %v4981_v28, 7  ;;  %v8154_v51 = vpack.c.bf16 %v13768_v27, %v13768_v27  ;;  %v14586_v20 = vld [vmem:[#allocation49_spill] sm:$0xff] }
 0x3a3   : > { %7432 = vst [vmem:[%s10694_s23 + $0xb0] sm:$0xf] %v7358_v43  ;;  %7433 = vst [vmem:[%s10694_s23 + $0xb4] sm:$0xf] %v7367_v22  ;;  %v13784_v18 = vrot.slane %v4963_v8, 7  ;;  %v13786_v23 = vmul.f32 %v7151_v9, %v7062_v26  ;;  %v4177_v46 = vadd.f32 %v9525_v24, %v13287_v1  ;;  %v6936_v7 = vadd.f32 %v13490_v16, %v14584_v52  ;;  %v14585_v16 = vld [vmem:[#allocation56_spill] sm:$0xff] }
 0x3a4   : > { %v7377_v38 = vrot.slane %v13732_v42, 4  ;;  %v4701_v12 = vmul.f32 %v13758_v62, %v13758_v62  ;;  %v4984_v41 = vshll.u32 %v8153_v2, 16  ;;  %v4990_v44 = vshrl.u32 %v8154_v51, 16  ;;  %v14587_v8 = vld [vmem:[#allocation62_spill] sm:$0xff] }
 0x3a5   : > { %v4968_v61 = vor.u32 %v4966_v19, %v13784_v18  ;;  %v4702_v25 = vmul.f32 %v13768_v27, %v13768_v27  ;;  %v4993_v48 = vshll.u32 %v8154_v51, 16  ;;  %v13799_v24 = vpack.c.bf16 %v13786_v23, %v13786_v23 }
 0x3a6   : > { %v13801_v29 = vrot.slane %v4990_v44, 7  ;;  %v4406_v35 = vadd.f32 %v14585_v16, %v4177_v46  ;;  %v6951_v15 = vadd.f32 %v13287_v1, %v6936_v7  ;;  %v7178_v10 = vadd.f32 %v7177_v57, %v13696_v54  ;;  %v13815_v54 = vpop.permute.xlu1 %4559 }
 0x3a7   : > { %v4986_v2 = vor.u32 %v4984_v41, %v4983_v39  ;;  %v4969_v56 = vsel %vm13404_vm11, %v4961_v5, %v4968_v61  ;;  %v7397_v4 = vshrl.u32 %v13799_v24, 16  ;;  %v7214_v26 = vadd.f32 %v7213_v34, %v7200_v31  ;;  %v14589_v5 = vld [vmem:[#allocation42_spill] sm:$0xff]  ;;  %v14590_v34 = vld [vmem:[#allocation33_spill] sm:$0xff] }
 0x3a8   : > { %v4988_v60 = vrot.slane %v4983_v39, 4  ;;  %5189 = vst [vmem:[%s10694_s23 + $0x3c] sm:$0xf] %v4969_v56  ;;  %v4995_v32 = vor.u32 %v4993_v48, %v13801_v29  ;;  %v4630_v28 = vmul.f32 %v14586_v20, %v4406_v35  ;;  %v7060_v19 = vadd.f32 %v14587_v8, %v6951_v15  ;;  %v7438_v39 = vld [vmem:[%s10694_s23 + $0xc8] sm:$0x1] }
 0x3a9   : > { %v13817_v57 = vrot.slane %v7397_v4, 7  ;;  %v6937_v9 = vadd.f32 %v13503_v14, %v14588_v45  ;;  %v9526_v43 = vadd.f32 %v13515_v11, %v14589_v5  ;;  %v9527_v31 = vadd.f32 %v13523_v17, %v14590_v34  ;;  %v14594_v34 = vld [vmem:[#allocation77_spill] sm:$0xff] }
 0x3aa   : > { %v4996_v22 = vsel %vm13404_vm11, %v4988_v60, %v4995_v32  ;;  %v4661_v51 = vadd.f32 %v4660_v36, %v4630_v28  ;;  %v4700_v46 = vmul.f32 %v4630_v28, %v4630_v28  ;;  %v8152_v52 = vpack.c.bf16 %v4630_v28, %v4630_v28  ;;  %v14592_v60 = vld [vmem:[#allocation75_spill] sm:$0xff]  ;;  %v13839_v20 = vpop.permute.xlu1 %4564 }
 0x3ab   : > { %v4970_v7 = vrot.slane %v13784_v18, 4  ;;  %5192 = vst [vmem:[%s10694_s23 + $0x48] sm:$0xf] %v4996_v22  ;;  %v7404_v41 = vrot.slane %v13817_v57, 4  ;;  %v7165_v14 = vmul.f32 %v13723_v40, %v7060_v19  ;;  %v6952_v11 = vadd.f32 %v13287_v1, %v6937_v9  ;;  %v14593_v9 = vld [vmem:[#allocation76_spill] sm:$0xff] }
 0x3ac   : > { %v4662_v44 = vadd.f32 %v4661_v51, %v13758_v62  ;;  %v4731_v17 = vadd.f32 %v4730_v47, %v4700_v46  ;;  %v4972_v61 = vshrl.u32 %v8152_v52, 16  ;;  %v4975_v48 = vshll.u32 %v8152_v52, 16 }
 0x3ad   : > { %v7439_v36 = vsel %vm13113_vm7, %v7404_v41, %v7438_v39  ;;  %v7179_v35 = vadd.f32 %v7178_v10, %v7165_v14  ;;  %v7201_v15 = vmul.f32 %v7165_v14, %v7165_v14  ;;  %v8183_v56 = vpack.c.bf16 %v7165_v14, %v7165_v14  ;;  %v14595_v41 = vld [vmem:[#allocation65_spill] sm:$0xff] }
 0x3ae   : > { %7440 = vst [vmem:[%s10694_s23 + $0xc8] sm:$0x1] %v7439_v36  ;;  %v4732_v18 = vadd.f32 %v4731_v17, %v4701_v12  ;;  %v4974_v4 = vrot.slane %v4972_v61, 7  ;;  %v7061_v32 = vadd.f32 %v14592_v60, %v6952_v11  ;;  %v4182_v40 = vadd.f32 %v9526_v43, %v13287_v1  ;;  %v13863_v17 = vpop.permute.xlu1 %4569 }
 0x3af   : > { %v7215_v28 = vadd.f32 %v7214_v26, %v7201_v15  ;;  %v7379_v62 = vshrl.u32 %v8183_v56, 16  ;;  %v7382_v47 = vshll.u32 %v8183_v56, 16  ;;  %v4180_v8 = vadd.f32 %v9527_v31, %v13287_v1 }
 0x3b0   : > { %v4977_v19 = vor.u32 %v4975_v48, %v4974_v4  ;;  %v4979_v10 = vrot.slane %v4974_v4, 4  ;;  %v7166_v45 = vmul.f32 %v13754_v55, %v7061_v32  ;;  %v4411_v12 = vadd.f32 %v14593_v9, %v4182_v40 }
 0x3b1   : > { %v7381_v5 = vrot.slane %v7379_v62, 7  ;;  %v4409_v22 = vadd.f32 %v14594_v34, %v4180_v8  ;;  %v4663_v43 = vadd.f32 %v4662_v44, %v13768_v27  ;;  %v4733_v39 = vadd.f32 %v4732_v18, %v4702_v25  ;;  %v14601_v8 = vld [vmem:[#allocation18_spill] sm:$0xff] }
 0x3b2   : > { %v4978_v26 = vsel %vm13404_vm11, %v4970_v7, %v4977_v19  ;;  %v4987_v51 = vsel %vm13404_vm11, %v4979_v10, %v4986_v2  ;;  %v7180_v46 = vadd.f32 %v7179_v35, %v7166_v45  ;;  %v7202_v1 = vmul.f32 %v7166_v45, %v7166_v45  ;;  %v14596_v7 = vld [vmem:[#allocation43_spill] sm:$0xff]  ;;  %v14597_v2 = vld [vmem:[#allocation36_spill] sm:$0xff]  ;;  %v14598_v35 = vld [vmem:[#allocation46_spill] sm:$0xff] }
 0x3b3   : > { %v7203_v55 = vmul.f32 %v13786_v23, %v13786_v23  ;;  %5190 = vst [vmem:[%s10694_s23 + $0x40] sm:$0xf] %v4978_v26  ;;  %5191 = vst [vmem:[%s10694_s23 + $0x44] sm:$0xf] %v4987_v51  ;;  %v7384_v31 = vor.u32 %v7382_v47, %v7381_v5  ;;  %v8184_v52 = vpack.c.bf16 %v7166_v45, %v7166_v45  ;;  %v7400_v61 = vshll.u32 %v13799_v24, 16  ;;  %v14600_v47 = vld [vmem:[#allocation82_spill] sm:$0xff] }
 0x3b4   : > { %v13855_v14 = vmul.f32 %v14595_v41, %v4411_v12  ;;  %v13858_v27 = vadd.f32 %v7180_v46, %v13786_v23  ;;  %v7216_v25 = vadd.f32 %v7215_v28, %v7202_v1  ;;  %v4633_v11 = vmul.f32 %v14596_v7, %v4409_v22  ;;  %v14602_v26 = vld [vmem:[#allocation80_spill] sm:$0xff] }
 0x3b5   : > { %v9528_v44 = vadd.f32 %v13527_v58, %v14597_v2  ;;  %v7385_v48 = vsel %vm13404_vm11, %v7377_v38, %v7384_v31  ;;  %v7388_v36 = vshrl.u32 %v8184_v52, 16  ;;  %v14599_v15 = vunpack.c.h.bf16 %v14598_v35  ;;  %v13884_v38 = vld [vmem:[%s14183_s2] ss:$0 sm:$0xff] }
 0x3b6   : > { %7435 = vst [vmem:[%s10694_s23 + $0xbc] sm:$0xf] %v7385_v48  ;;  %v13875_v56 = vadd.f32 %v7216_v25, %v7203_v55  ;;  %v7391_v18 = vshll.u32 %v8184_v52, 16  ;;  %v8157_v58 = vpack.c.bf16 %v13855_v14, %v13855_v14  ;;  %v13879_v4 = vadd.f32 %v4663_v43, %v4633_v11  ;;  %v14603_v55 = vld [vmem:[#allocation78_spill] sm:$0xff] }
 0x3b7   : > { %v13872_v23 = vrot.slane %v14599_v15, 1  ;;  %v7390_v24 = vrot.slane %v7388_v36, 7  ;;  %v4703_v60 = vmul.f32 %v4633_v11, %v4633_v11  ;;  %v8155_v42 = vpack.c.bf16 %v4633_v11, %v4633_v11  ;;  %v14605_v48 = vld [vmem:[#allocation58_spill] sm:$0xff]  ;;  %v14606_v36 = vld [vmem:[#allocation51_spill] sm:$0xff] }
 0x3b8   : > { %v4183_v32 = vadd.f32 %v13884_v38, %v9528_v44  ;;  %v7402_v40 = vor.u32 %v7400_v61, %v13817_v57  ;;  %v7386_v28 = vrot.slane %v7381_v5, 4  ;;  %v5017_v62 = vshrl.u32 %v8157_v58, 16  ;;  %v4575_v5 = vpop.permute.xlu1 %4574  ;;  %v14604_v44 = vld [vmem:[#allocation37_spill] sm:$0xff]  ;;  %v14607_v15 = vld [vmem:[#allocation63_spill] sm:$0xff] }
 0x3b9   : > { %v4338_v19 = vsel %vm2097_vm0, %v14601_v8, %v14600_v47  ;;  %v7393_v10 = vor.u32 %v7391_v18, %v7390_v24  ;;  %v7395_v45 = vrot.slane %v7390_v24, 4  ;;  %v13891_v9 = vadd.f32 %v4733_v39, %v4703_v60  ;;  %v14609_v24 = vld [vmem:[#allocation31_spill] sm:$0xff] }
 0x3ba   : > { %v4999_v12 = vshrl.u32 %v8155_v42, 16  ;;  %v5019_v34 = vrot.slane %v5017_v62, 7  ;;  %v5020_v22 = vshll.u32 %v8157_v58, 16  ;;  %v5002_v43 = vshll.u32 %v8155_v42, 16  ;;  %v14608_v58 = vld [vmem:[#allocation52_spill] sm:$0xff] }
 0x3bb   : > { %v4344_v57 = vsel %vm2097_vm0, %v14602_v26, %v13872_v23  ;;  %v7394_v51 = vsel %vm13404_vm11, %v7386_v28, %v7393_v10  ;;  %v7403_v46 = vsel %vm13404_vm11, %v7395_v45, %v7402_v40  ;;  %v4412_v39 = vadd.f32 %v14603_v55, %v4183_v32  ;;  %v14610_v10 = vld [vmem:[#allocation81_spill] sm:$0xff] }
 0x3bc   : > { %v13900_v1 = vrot.slane %v4999_v12, 7  ;;  %v4997_v31 = vrot.slane %v13801_v29, 4  ;;  %v7182_v52 = vrot.slane %v13858_v27, 4  ;;  %7436 = vst [vmem:[%s10694_s23 + $0xc0] sm:$0xf] %v7394_v51  ;;  %v4705_v41 = vmul.f32 %v13855_v14, %v13855_v14  ;;  %v13932_v28 = vpop.permute.xlu1 %4579  ;;  %v14611_v12 = vld [vmem:[#allocation79_spill] sm:$0xff] }
 0x3bd   : > { %7437 = vst [vmem:[%s10694_s23 + $0xc4] sm:$0xf] %v7403_v46  ;;  %v13909_v25 = vor.u32 %v5020_v22, %v5019_v34  ;;  %v5024_v7 = vrot.slane %v5019_v34, 4  ;;  %v4636_v2 = vmul.f32 %v13780_v37, %v4412_v39  ;;  %v9529_v61 = vadd.f32 %v13535_v13, %v14604_v44  ;;  %v13939_v22 = vld [vmem:[%s10688_s22 + $0x70] sm:$0xff]  }
 0x3be   : > { %v5004_v11 = vor.u32 %v5002_v43, %v13900_v1  ;;  %v9530_v29 = vadd.f32 %v13560_v33, %v14605_v48  ;;  %v9531_v35 = vadd.f32 %v13565_v3, %v14606_v36  ;;  %v9532_v18 = vadd.f32 %v13572_v50, %v14607_v15  ;;  %v14612_v43 = vld [vmem:[#allocation83_spill] sm:$0xff] }
 0x3bf   : > { %v9533_v60 = vadd.f32 %v14609_v24, %v14608_v58  ;;  %v5006_v37 = vrot.slane %v13900_v1, 4  ;;  %v8158_v32 = vpack.c.bf16 %v4636_v2, %v4636_v2  ;;  %v4181_v13 = vadd.f32 %v13884_v38, %v9529_v61  ;;  %v14614_v61 = vld [vmem:[#allocation60_spill] sm:$0xff] }
 0x3c0   : > { %v5005_v42 = vsel %vm13404_vm11, %v4997_v31, %v5004_v11  ;;  %v4186_v33 = vadd.f32 %v13884_v38, %v9530_v29  ;;  %v4184_v3 = vadd.f32 %v13884_v38, %v9531_v35  ;;  %v4187_v40 = vadd.f32 %v13884_v38, %v9532_v18  ;;  %v14613_v11 = vld [vmem:[#allocation74_spill] sm:$0xff] }
 0x3c1   : > { %5193 = vst [vmem:[%s10694_s23 + $0x4c] sm:$0xf] %v5005_v42  ;;  %v4185_v50 = vadd.f32 %v13884_v38, %v9533_v60  ;;  %v4706_v62 = vmul.f32 %v4636_v2, %v4636_v2  ;;  %v5026_v8 = vshrl.u32 %v8158_v32, 16  ;;  %v4410_v45 = vadd.f32 %v14610_v10, %v4181_v13  ;;  %v13954_v42 = vpop.permute.xlu1 %4584 }
 0x3c2   : > { %v4340_v34 = vsel %vm2097_vm0, %v14600_v47, %v14611_v12  ;;  %v4415_v26 = vadd.f32 %v14612_v43, %v4186_v33  ;;  %v4413_v51 = vadd.f32 %v4338_v19, %v4184_v3  ;;  %v4416_v46 = vadd.f32 %v4344_v57, %v4187_v40 }
 0x3c3   : > { %v4414_v55 = vadd.f32 %v4340_v34, %v4185_v50  ;;  %v5028_v39 = vrot.slane %v5026_v8, 7  ;;  %v5029_v31 = vshll.u32 %v8158_v32, 16  ;;  %v4634_v44 = vmul.f32 %v14613_v11, %v4410_v45 }
 0x3c4   : > { %v13945_v48 = vadd.f32 %v13594_v0, %v14614_v61  ;;  %v4639_v29 = vmul.f32 %v13863_v17, %v4415_v26  ;;  %v4637_v36 = vmul.f32 %v13815_v54, %v4413_v51  ;;  %v13949_v47 = vmul.f32 %v4575_v5, %v4416_v46 }
 0x3c5   : > { %v8345_v35 = vunpack.c.h.bf16 %v13939_v22  ;;  %v5031_v19 = vor.u32 %v5029_v31, %v5028_v39  ;;  %v4665_v57 = vadd.f32 %v13879_v4, %v4634_v44  ;;  %v4704_v15 = vmul.f32 %v4634_v44, %v4634_v44 }
 0x3c6   : > { %v4638_v18 = vmul.f32 %v13839_v20, %v4414_v55  ;;  %v5033_v58 = vrot.slane %v5028_v39, 4  ;;  %v8156_v24 = vpack.c.bf16 %v4634_v44, %v4634_v44  ;;  %v4709_v60 = vmul.f32 %v4639_v29, %v4639_v29  ;;  %v8421_v44 = vld [vmem:[%s10688_s22 + $0x78] sm:$0xff]  }
 0x3c7   : > { %v8161_v0 = vpack.c.bf16 %v4639_v29, %v4639_v29  ;;  %v5032_v54 = vsel %vm13404_vm11, %v5024_v7, %v5031_v19  ;;  %v4666_v17 = vadd.f32 %v4665_v57, %v13855_v14  ;;  %v4735_v5 = vadd.f32 %v13891_v9, %v4704_v15 }
 0x3c8   : > { %v8159_v32 = vpack.c.bf16 %v4637_v36, %v4637_v36  ;;  %5196 = vst [vmem:[%s10694_s23 + $0x58] sm:$0xf] %v5032_v54  ;;  %v5008_v13 = vshrl.u32 %v8156_v24, 16  ;;  %v5011_v4 = vshll.u32 %v8156_v24, 16  ;;  %v4707_v3 = vmul.f32 %v4637_v36, %v4637_v36 }
 0x3c9   : > { %v5053_v33 = vshrl.u32 %v8161_v0, 16  ;;  %v4736_v20 = vadd.f32 %v4735_v5, %v4705_v41  ;;  %v5056_v40 = vshll.u32 %v8161_v0, 16  ;;  %v4667_v50 = vadd.f32 %v4666_v17, %v4636_v2  ;;  %v4590_v2 = vpop.permute.xlu1 %4589 }
 0x3ca   : > { %v5035_v8 = vshrl.u32 %v8159_v32, 16  ;;  %v5010_v10 = vrot.slane %v5008_v13, 7  ;;  %v5038_v12 = vshll.u32 %v8159_v32, 16  ;;  %v8162_v7 = vpack.c.bf16 %v13949_v47, %v13949_v47 }
 0x3cb   : > { %v5055_v45 = vrot.slane %v5053_v33, 7  ;;  %v4668_v14 = vadd.f32 %v4667_v50, %v4637_v36  ;;  %v4737_v34 = vadd.f32 %v4736_v20, %v4706_v62  ;;  %v4708_v43 = vmul.f32 %v4638_v18, %v4638_v18 }
 0x3cc   : > { %v5037_v9 = vrot.slane %v5035_v8, 7  ;;  %v5013_v26 = vor.u32 %v5011_v4, %v5010_v10  ;;  %v5015_v51 = vrot.slane %v5010_v10, 4  ;;  %v4710_v41 = vmul.f32 %v13949_v47, %v13949_v47  ;;  %v14616_v10 = vld [vmem:[#allocation66_spill] sm:$0xff] }
 0x3cd   : > { %v5058_v46 = vor.u32 %v5056_v40, %v5055_v45  ;;  %v5060_v55 = vrot.slane %v5055_v45, 4  ;;  %v4738_v39 = vadd.f32 %v4737_v34, %v4707_v3  ;;  %v5062_v11 = vshrl.u32 %v8162_v7, 16  ;;  %v4595_v20 = vpop.permute.xlu1 %4594 }
 0x3ce   : > { %v5040_v31 = vor.u32 %v5038_v12, %v5037_v9  ;;  %v5014_v62 = vsel %vm13404_vm11, %v5006_v37, %v5013_v26  ;;  %v5023_v61 = vsel %vm13404_vm11, %v5015_v51, %v13909_v25  ;;  %v5065_v36 = vshll.u32 %v8162_v7, 16  ;;  %v4227_v51 = vld [vmem:[%s10688_s22 + $0x88] sm:$0xf] }
 0x3cf   : > { %v4669_v19 = vadd.f32 %v4668_v14, %v4638_v18  ;;  %5194 = vst [vmem:[%s10694_s23 + $0x50] sm:$0xf] %v5014_v62  ;;  %5195 = vst [vmem:[%s10694_s23 + $0x54] sm:$0xf] %v5023_v61  ;;  %v13977_v15 = vrot.slane %v5062_v11, 7  ;;  %v4739_v24 = vadd.f32 %v4738_v39, %v4708_v43  ;;  %v8160_v0 = vpack.c.bf16 %v4638_v18, %v4638_v18  ;;  %v13995_v14 = vld [vmem:[%s10688_s22 + $0x80] sm:$0xff]  }
 0x3d0   : > { %v5041_v57 = vsel %vm13404_vm11, %v5033_v58, %v5040_v31  ;;  %v5042_v54 = vrot.slane %v5037_v9, 4  ;;  %v8348_v37 = vunpack.c.l.bf16 %v8421_v44  ;;  %v4347_v17 = vrot.slane %v8345_v35, 1  ;;  %v14615_v58 = vld [vmem:[#allocation64_spill] sm:$0xff]  ;;  %v14617_v9 = vld [vmem:[#allocation67_spill] sm:$0xff] }
 0x3d1   : > { %5197 = vst [vmem:[%s10694_s23 + $0x5c] sm:$0xf] %v5041_v57  ;;  %v4670_v1 = vadd.f32 %v4669_v19, %v4639_v29  ;;  %v5067_v5 = vor.u32 %v5065_v36, %v13977_v15  ;;  %v4740_v25 = vadd.f32 %v4739_v24, %v4709_v60  ;;  %v5044_v32 = vshrl.u32 %v8160_v0, 16  ;;  %v14618_v11 = vld [vmem:[#allocation68_spill] sm:$0xff]  ;;  %v14016_v62 = vpop.permute.xlu1 %4599 }
 0x3d2   : > { %v4190_v13 = vadd.f32 %v13884_v38, %v13945_v48  ;;  %v5047_v4 = vshll.u32 %v8160_v0, 16  ;;  %v4349_v33 = vrot.slane %v8348_v37, 1  ;;  %v9535_v3 = vadd.f32 %v13601_v6, %v14615_v58 }
 0x3d3   : > { %v8344_v18 = vunpack.c.l.bf16 %v13939_v22  ;;  %v5068_v29 = vsel %vm13404_vm11, %v5060_v55, %v5067_v5  ;;  %v5046_v35 = vrot.slane %v5044_v32, 7  ;;  %v4671_v40 = vadd.f32 %v4670_v1, %v13949_v47 }
 0x3d4   : > { %v4741_v60 = vadd.f32 %v4740_v25, %v4710_v41  ;;  %5200 = vst [vmem:[%s10694_s23 + $0x68] sm:$0xf] %v5068_v29  ;;  %v4350_v48 = vsel %vm2097_vm0, %v4347_v17, %v4349_v33  ;;  %v4188_v50 = vadd.f32 %v13884_v38, %v9535_v3  ;;  %v9536_v6 = vadd.f32 %v13610_v30, %v14616_v10 }
 0x3d5   : > { %v4345_v8 = vrot.slane %v8344_v18, 1  ;;  %v5049_v22 = vor.u32 %v5047_v4, %v5046_v35  ;;  %v5051_v45 = vrot.slane %v5046_v35, 4  ;;  %v4419_v12 = vadd.f32 %v4350_v48, %v4190_v13  ;;  %v14619_v4 = vld [vmem:[#allocation69_spill] sm:$0xff]  ;;  %v14031_v35 = vpop.permute.xlu1 %4604 }
 0x3d6   : > { %v8349_v7 = vunpack.c.h.bf16 %v8421_v44  ;;  %v4191_v34 = vadd.f32 %v13884_v38, %v9536_v6  ;;  %v9537_v43 = vadd.f32 %v13615_v21, %v14617_v9  ;;  %v9538_v21 = vadd.f32 %v13638_v59, %v14618_v11 }
 0x3d7   : > { %v4346_v47 = vsel %vm2097_vm0, %v13872_v23, %v4345_v8  ;;  %v4348_v26 = vsel %vm2097_vm0, %v4345_v8, %v4347_v17  ;;  %v5050_v30 = vsel %vm13404_vm11, %v5042_v54, %v5049_v22  ;;  %v5059_v41 = vsel %vm13404_vm11, %v5051_v45, %v5058_v46 }
 0x3d8   : > { %v4643_v55 = vmul.f32 %v4590_v2, %v4419_v12  ;;  %v4417_v39 = vadd.f32 %v4346_v47, %v4188_v50  ;;  %5198 = vst [vmem:[%s10694_s23 + $0x60] sm:$0xf] %v5050_v30  ;;  %5199 = vst [vmem:[%s10694_s23 + $0x64] sm:$0xf] %v5059_v41  ;;  %v14010_v31 = vrot.slane %v8349_v7, 1  ;;  %v4189_v23 = vadd.f32 %v13884_v38, %v9537_v43 }
 0x3d9   : > { %v8353_v44 = vunpack.c.h.bf16 %v13995_v14  ;;  %v5069_v61 = vrot.slane %v13977_v15, 4  ;;  %v4260_v2 = vunpack.c.l.bf16 %v4227_v51  ;;  %v4194_v0 = vadd.f32 %v13884_v38, %v9538_v21 }
 0x3da   : > { %v8165_v36 = vpack.c.bf16 %v4643_v55, %v4643_v55  ;;  %v4641_v46 = vmul.f32 %v13932_v28, %v4417_v39  ;;  %v4713_v19 = vmul.f32 %v4643_v55, %v4643_v55  ;;  %v4352_v57 = vsel %vm2097_vm0, %v4349_v33, %v14010_v31  ;;  %v4610_v39 = vpop.permute.xlu1 %4609 }
 0x3db   : > { %v4418_v24 = vadd.f32 %v4348_v26, %v4189_v23  ;;  %v14023_v37 = vrot.slane %v8353_v44, 1  ;;  %v4420_v25 = vadd.f32 %v4352_v57, %v4191_v34  ;;  %v14026_v13 = vrot.slane %v4260_v2, 1  ;;  %v14620_v57 = vld [vmem:[#allocation70_spill] sm:$0xff] }
 0x3dc   : > { %v5089_v54 = vshrl.u32 %v8165_v36, 16  ;;  %v4672_v1 = vadd.f32 %v4671_v40, %v4641_v46  ;;  %v4711_v59 = vmul.f32 %v4641_v46, %v4641_v46  ;;  %v5092_v17 = vshll.u32 %v8165_v36, 16  ;;  %v4228_v36 = vld [vmem:[%s10688_s22 + $0x8c] sm:$0x1]  ;;  %s9867_s22 = smul.u32 3456, %s10544_s13 }
 0x3dd   : > { %v8163_v5 = vpack.c.bf16 %v4641_v46, %v4641_v46  ;;  %v4642_v15 = vmul.f32 %v13954_v42, %v4418_v24  ;;  %v9539_v33 = vadd.f32 %v13644_v53, %v14619_v4  ;;  %v4644_v3 = vmul.f32 %v4595_v20, %v4420_v25 }
 0x3de   : > { %v5091_v32 = vrot.slane %v5089_v54, 7  ;;  %v4742_v28 = vadd.f32 %v4741_v60, %v4711_v59  ;;  %v8352_v29 = vunpack.c.l.bf16 %v13995_v14  ;;  %v4358_v53 = vsel %vm2097_vm0, %v14023_v37, %v14026_v13  ;;  %s14091_s11 = scalar_lea.hbm %s14189_s8, %s9867_s22 }
 0x3df   : > { %v5071_v58 = vshrl.u32 %v8163_v5, 16  ;;  %v4673_v18 = vadd.f32 %v4672_v1, %v4642_v15  ;;  %v5074_v48 = vshll.u32 %v8163_v5, 16  ;;  %v4712_v50 = vmul.f32 %v4642_v15, %v4642_v15  ;;  %v14622_v5 = vld [vmem:[#allocation45_spill] sm:$0xff] }
 0x3e0   : > { %v5094_v40 = vor.u32 %v5092_v17, %v5091_v32  ;;  %v8164_v8 = vpack.c.bf16 %v4642_v15, %v4642_v15  ;;  %v5096_v10 = vrot.slane %v5091_v32, 4  ;;  %v8166_v6 = vpack.c.bf16 %v4644_v3, %v4644_v3  ;;  %v14621_v17 = vld [vmem:[#allocation71_spill] sm:$0xff] }
 0x3e1   : > { %v5073_v42 = vrot.slane %v5071_v58, 7  ;;  %v4674_v60 = vadd.f32 %v4673_v18, %v4643_v55  ;;  %v4714_v22 = vmul.f32 %v4644_v3, %v4644_v3  ;;  %v4743_v45 = vadd.f32 %v4742_v28, %v4712_v50  ;;  %v4615_v50 = vpop.permute.xlu1 %4614 }
 0x3e2   : > { %v5080_v12 = vshrl.u32 %v8164_v8, 16  ;;  %v5098_v7 = vshrl.u32 %v8166_v6, 16  ;;  %v5101_v14 = vshll.u32 %v8166_v6, 16  ;;  %v5083_v47 = vshll.u32 %v8164_v8, 16 }
 0x3e3   : > { %v5076_v20 = vor.u32 %v5074_v48, %v5073_v42  ;;  %v4744_v34 = vadd.f32 %v4743_v45, %v4713_v19  ;;  %v4423_v43 = vadd.f32 %v4358_v53, %v4194_v0  ;;  %v4192_v26 = vadd.f32 %v13884_v38, %v9539_v33 }
 0x3e4   : > { %v5082_v9 = vrot.slane %v5080_v12, 7  ;;  %v5100_v30 = vrot.slane %v5098_v7, 7  ;;  %v4353_v41 = vrot.slane %v8352_v29, 1  ;;  %v4675_v55 = vadd.f32 %v4674_v60, %v4644_v3 }
 0x3e5   : > { %v5077_v51 = vsel %vm13404_vm11, %v5069_v61, %v5076_v20  ;;  %v5078_v23 = vrot.slane %v5073_v42, 4  ;;  %v4745_v44 = vadd.f32 %v4744_v34, %v4714_v22  ;;  %v4647_v2 = vmul.f32 %v4610_v39, %v4423_v43 }
 0x3e6   : > { %5201 = vst [vmem:[%s10694_s23 + $0x6c] sm:$0xf] %v5077_v51  ;;  %v5085_v11 = vor.u32 %v5083_v47, %v5082_v9  ;;  %v5087_v21 = vrot.slane %v5082_v9, 4  ;;  %v5103_v46 = vor.u32 %v5101_v14, %v5100_v30  ;;  %v4354_v19 = vsel %vm2097_vm0, %v14010_v31, %v4353_v41 }
 0x3e7   : > { %v9540_v61 = vadd.f32 %v13647_v63, %v14620_v57  ;;  %v4421_v1 = vadd.f32 %v4354_v19, %v4192_v26  ;;  %v4261_v59 = vunpack.c.l.bf16 %v4228_v36  ;;  %v7183_v31 = vadd.f32 %v7182_v52, %v13858_v27 }
 0x3e8   : > { %v5086_v24 = vsel %vm13404_vm11, %v5078_v23, %v5085_v11  ;;  %v5095_v0 = vsel %vm13404_vm11, %v5087_v21, %v5094_v40  ;;  %v5104_v54 = vsel %vm13404_vm11, %v5096_v10, %v5103_v46  ;;  %v9541_v25 = vadd.f32 %v14622_v5, %v14621_v17  ;;  %v5209_v21 = vld [vmem:[%s10694_s23 + $0x8c] sm:$0x1] }
 0x3e9   : > { %5202 = vst [vmem:[%s10694_s23 + $0x70] sm:$0xf] %v5086_v24  ;;  %5203 = vst [vmem:[%s10694_s23 + $0x74] sm:$0xf] %v5095_v0  ;;  %v4195_v63 = vadd.f32 %v13884_v38, %v9540_v61  ;;  %v8169_v15 = vpack.c.bf16 %v4647_v2, %v4647_v2  ;;  %v4645_v32 = vmul.f32 %v14016_v62, %v4421_v1  ;;  %v4359_v28 = vrot.slane %v4261_v59, 1 }
 0x3ea   : > { %5204 = vst [vmem:[%s10694_s23 + $0x78] sm:$0xf] %v5104_v54  ;;  %v4356_v4 = vsel %vm2097_vm0, %v4353_v41, %v14023_v37  ;;  %v7218_v33 = vrot.slane %v13875_v56, 4  ;;  %v4193_v58 = vadd.f32 %v13884_v38, %v9541_v25  ;;  %v7184_v29 = vrot.slane %v7183_v31, 2 }
 0x3eb   : > { %v4676_v3 = vadd.f32 %v4675_v55, %v4645_v32  ;;  %v4715_v18 = vmul.f32 %v4645_v32, %v4645_v32  ;;  %v8167_v27 = vpack.c.bf16 %v4645_v32, %v4645_v32  ;;  %v4360_v52 = vsel %vm2097_vm0, %v14026_v13, %v4359_v28 }
 0x3ec   : > { %v4424_v40 = vadd.f32 %v4360_v52, %v4195_v63  ;;  %v4422_v48 = vadd.f32 %v4356_v4, %v4193_v58  ;;  %v5125_v8 = vshrl.u32 %v8169_v15, 16  ;;  %v7219_v6 = vadd.f32 %v7218_v33, %v13875_v56 }
 0x3ed   : > { %v4746_v62 = vadd.f32 %v4745_v44, %v4715_v18  ;;  %v5107_v10 = vshrl.u32 %v8167_v27, 16  ;;  %v5110_v38 = vshll.u32 %v8167_v27, 16  ;;  %v7185_v22 = vadd.f32 %v7184_v29, %v7183_v31  ;;  %v14623_v29 = vld [vmem:[#allocation84_spill] sm:$0xff] }
 0x3ee   : > { %v4648_v42 = vmul.f32 %v4615_v50, %v4424_v40  ;;  %v4646_v37 = vmul.f32 %v14031_v35, %v4422_v48  ;;  %v5105_v13 = vrot.slane %v5100_v30, 4  ;;  %v5127_v20 = vrot.slane %v5125_v8, 7 }
 0x3ef   : > { %v5109_v60 = vrot.slane %v5107_v10, 7  ;;  %v4717_v47 = vmul.f32 %v4647_v2, %v4647_v2  ;;  %v7220_v26 = vrot.slane %v7219_v6, 2  ;;  %v5128_v30 = vshll.u32 %v8169_v15, 16 }
 0x3f0   : > { %v8170_v45 = vpack.c.bf16 %v4648_v42, %v4648_v42  ;;  %v4677_v12 = vadd.f32 %v4676_v3, %v4646_v37  ;;  %v4716_v53 = vmul.f32 %v4646_v37, %v4646_v37  ;;  %v8168_v14 = vpack.c.bf16 %v4646_v37, %v4646_v37 }
 0x3f1   : > { %v5112_v7 = vor.u32 %v5110_v38, %v5109_v60  ;;  %v4718_v35 = vmul.f32 %v4648_v42, %v4648_v42  ;;  %v5132_v11 = vrot.slane %v5127_v20, 4  ;;  %v5130_v61 = vor.u32 %v5128_v30, %v5127_v20 }
 0x3f2   : > { %v5134_v34 = vshrl.u32 %v8170_v45, 16  ;;  %v4678_v9 = vadd.f32 %v4677_v12, %v4647_v2  ;;  %v4747_v43 = vadd.f32 %v4746_v62, %v4716_v53  ;;  %v5116_v51 = vshrl.u32 %v8168_v14, 16 }
 0x3f3   : > { %v5113_v56 = vsel %vm13404_vm11, %v5105_v13, %v5112_v7  ;;  %v5137_v55 = vshll.u32 %v8170_v45, 16  ;;  %v5119_v36 = vshll.u32 %v8168_v14, 16  ;;  %v5114_v24 = vrot.slane %v5109_v60, 4 }
 0x3f4   : > { %5205 = vst [vmem:[%s10694_s23 + $0x7c] sm:$0xf] %v5113_v56  ;;  %v5136_v41 = vrot.slane %v5134_v34, 7  ;;  %v4679_v39 = vadd.f32 %v4678_v9, %v4648_v42  ;;  %v4748_v23 = vadd.f32 %v4747_v43, %v4717_v47  ;;  %v5118_v44 = vrot.slane %v5116_v51, 7 }
 0x3f5   : > { %v7221_v32 = vadd.f32 %v7220_v26, %v7219_v6  ;;  %v7186_v4 = vrot.slane %v7185_v22, 1 }
 0x3f6   : > { %v5139_v46 = vor.u32 %v5137_v55, %v5136_v41  ;;  %v5141_v2 = vrot.slane %v5136_v41, 4  ;;  %v4680_v19 = vrot.slane %v4679_v39, 4  ;;  %v4749_v57 = vadd.f32 %v4748_v23, %v4718_v35 }
 0x3f7   : > { %v5121_v0 = vor.u32 %v5119_v36, %v5118_v44  ;;  %v5123_v54 = vrot.slane %v5118_v44, 4  ;;  %v7222_v3 = vrot.slane %v7221_v32, 1  ;;  %v7187_v52 = vadd.f32 %v7186_v4, %v7185_v22 }
 0x3f8   : > { %v5140_v1 = vsel %vm13404_vm11, %v5132_v11, %v5139_v46  ;;  %v5210_v59 = vsel %vm13113_vm7, %v5141_v2, %v5209_v21  ;;  %v4681_v31 = vadd.f32 %v4680_v19, %v4679_v39  ;;  %v4750_v63 = vrot.slane %v4749_v57, 4 }
 0x3f9   : > { %5208 = vst [vmem:[%s10694_s23 + $0x88] sm:$0xf] %v5140_v1  ;;  %5211 = vst [vmem:[%s10694_s23 + $0x8c] sm:$0x1] %v5210_v59  ;;  %v5122_v17 = vsel %vm13404_vm11, %v5114_v24, %v5121_v0  ;;  %v5131_v5 = vsel %vm13404_vm11, %v5123_v54, %v5130_v61  ;;  %v7223_v62 = vadd.f32 %v7222_v3, %v7221_v32 }
 0x3fa   : > { %v4682_v25 = vrot.slane %v4681_v31, 2  ;;  %v4751_v15 = vadd.f32 %v4750_v63, %v4749_v57  ;;  %5206 = vst [vmem:[%s10694_s23 + $0x80] sm:$0xf] %v5122_v17  ;;  %5207 = vst [vmem:[%s10694_s23 + $0x84] sm:$0xf] %v5131_v5 }
 0x3fc   : > { %v4683_v16 = vadd.f32 %v4682_v25, %v4681_v31  ;;  %v4752_v28 = vrot.slane %v4751_v15, 2 }
 0x3fe   : > { %v4684_v33 = vrot.slane %v4683_v16, 1  ;;  %v4753_v58 = vadd.f32 %v4752_v28, %v4751_v15 }
 0x400   : > { %v7421_v49 = vld [vmem:[%s10694_s23 + $0x8c] sm:$0xf]  ;;  %v4685_v18 = vadd.f32 %v4684_v33, %v4683_v16  ;;  %v4754_v27 = vrot.slane %v4753_v58, 1 }
 0x401   : > { %v7422_v48 = vsel %vm13121_vm9, %v14623_v29, %v7421_v49 }
 0x402   : > { %7423 = vst [vmem:[%s10694_s23 + $0x8c] sm:$0xf] %v7422_v48  ;;  %v4755_v50 = vadd.f32 %v4754_v27, %v4753_v58  ;;  %v7188_v8 = vadd.f32 %v7187_v52, %v4685_v18 }
 0x403   : > { %10373 = shalt.err (!%p10370_p3)
}
 0x404   : > { %s10374_s23 = scalar_lea.hbm %s14091_s11, 3456  ;;  %s10378_s19 = scalar_lea.hbm %s14189_s8, 6912 }
 0x405   : > { %p10375_p8 = scmp.ne.s32.totalorder %s14091_s11, %s10374_s23  ;;  %p10379_p4 = scmp.lt.u32.totalorder %s14091_s11, %s14189_s8 }
 0x406   : > { %p10380_p6 = scmp.lt.u32.totalorder %s10378_s19, %s10374_s23  ;;  %p10382_p1 = scmp.lt.u32.totalorder %s10374_s23, %s14091_s11 }
 0x407   : > { %p10376_p0 = pnand %p10375_p8, %p14625_p12 }
 0x408   : > { %p10381_p13 = por %p10380_p6, %p10379_p4 }
 0x409   : > { %p10377_p2 = pneg %p10376_p0 }
 0x40a   : > { %p10383_p10 = por %p10382_p1, %p10381_p13 }
 0x40c   : > { %p10384_p5 = pnand %p10383_p10, %p10377_p2 }
 0x40e   : > { %10387 = shalt.err (!%p10384_p5)
}
 0x40f   : > { %s10470_s15 = smov 64   ;;  %s10471_s18 = smov 4   ;;  %v7224_v10 = vadd.f32 %v7223_v62, %v4755_v50  ;;  %v7441_v42 = vmul.f32 0.00390625, %v7188_v8 }
 0x410   : > { %9872 = dma.vmem_to_hbm [thread:$0]  (%p14625_p12), %s14094_s17, 3456, %s14091_s11, %s7446_s0, %s10470_s15, %s10470_s15, %s10471_s18  }
 0x411   : > { %7442 = vst [vmem:[%s14101_s16] sm:$0x1] %v7441_v42  ;;  %v7443_v37 = vmul.f32 0.00390625, %v7224_v10  ;;  %s14134_s22 = scalar_lea.hbm %s14190_s9, %s8136_s14  ;;  %s7451_s26 = scalar_lea.sflag [#allocation9], %s10677_s25 }
 0x412   : > { %s10388_s19 = scalar_lea.vmem %s14138_s27, 32  ;;  %s10472_s17 = smov [#allocation8]  }
 0x413   : > { %7444 = vst [vmem:[%s14101_s16 + $0x1] sm:$0x1] %v7443_v37  ;;  %p10389_p7 = scmp.ne.s32.totalorder %s14138_s27, %s10388_s19  ;;  %s10392_s13 = sshll.u32 %s10472_s17, 4  ;;  %s10393_s13 = int_to_ptr.vmem [resolvable:$false] %s10392_s13 }
 0x414   : > { %s10394_s11 = scalar_lea.vmem %s10393_s13, 64  ;;  %p10395_p3 = scmp.lt.s32.totalorder %s14138_s27, %s10393_s13 }
 0x415   : > { %p10390_p9 = pnand %p10389_p7, %p14625_p12  ;;  %p10396_p8 = scmp.lt.s32.totalorder %s10394_s11, %s10388_s19 }
 0x417   : > { %p10391_p11 = pneg %p10390_p9  ;;  %p10397_p0 = por %p10396_p8, %p10395_p3 }
 0x419   : > { %p10398_p2 = pnand %p10397_p0, %p10391_p11 }
 0x41b   : > { %10401 = shalt.err (!%p10398_p2)
}
 0x41c   : > { %s10402_s25 = scalar_lea.hbm %s14134_s22, 32  ;;  %s10406_s0 = scalar_lea.hbm %s14190_s9, 64 }
 0x41d   : > { %p10403_p4 = scmp.ne.s32.totalorder %s14134_s22, %s10402_s25  ;;  %p10407_p1 = scmp.lt.u32.totalorder %s14134_s22, %s14190_s9 }
 0x41e   : > { %p10408_p10 = scmp.lt.u32.totalorder %s10406_s0, %s10402_s25  ;;  %p10410_p7 = scmp.lt.u32.totalorder %s10402_s25, %s14134_s22 }
 0x41f   : > { %p10404_p6 = pnand %p10403_p4, %p14625_p12 }
 0x420   : > { %p10409_p5 = por %p10408_p10, %p10407_p1 }
 0x421   : > { %p10405_p13 = pneg %p10404_p6 }
 0x422   : > { %p10411_p9 = por %p10410_p7, %p10409_p5 }
 0x424   : > { %p10412_p11 = pnand %p10411_p9, %p10405_p13 }
 0x426   : > { %10415 = shalt.err (!%p10412_p11)
}
 0x427   : > { %9873 = dma.vmem_to_hbm [thread:$0]  (%p14625_p12), %s14138_s27, 32, %s14134_s22, %s7451_s26  }
 0x428 PF: > { %s7492_s15 = sand.u32 1, %s10450_s30   ;;  %p14626_p3 = scmp.ne.s32.totalorder %s14293_s21, 0 }
 0x429   : > { %p14627_p8 = scmp.ge.s32.totalorder %s10462_s12, 2  ;;  %s7493_s18 = scalar_lea.sflag [#allocation4], %s7492_s15 }
 0x42b   : > { %p9884_p0 = pnand %p14627_p8, %p14626_p3 }
 0x42d   : > { %10441 = dma.done.wait (!%p9884_p0), %s7493_s18, 3456  }
 0x42e   : > { %10443 = vsyncadd (!%p9884_p0), %s7493_s18, 4294963840  ;;  %s7502_s29 = scalar_lea.sflag [#allocation9], %s7492_s15 }
 0x42f   : > { %10445 = dma.done.wait (!%p9884_p0), %s7502_s29, 32  }
 0x430   : > { %10447 = vsyncadd (!%p9884_p0), %s7502_s29, 4294967264  ;;  %s14628_s12 = sld [smem:[#allocation15_spill]]  ;;  %s14629_s20 = sld [smem:[#allocation14_spill]] }
 0x431   : > { %s14630_s11 = sld [smem:[#allocation16_spill]]  ;;  %s14631_s30 = smov %s10454_s10 }
 0x436   : > { %p29_p12 = scmp.ge.s32.totalorder %s14628_s12, 4   ;;  %s14632_s10 = smov %s14629_s20 }
 0x438   :  { %31 = sbr.rel (!%p29_p12) target bundleno = 11 (0xb), region = 141 }
 0x43f   :  { %7507 = vsyncpa [#allocation3], 1 }
 0x440   :  { %7509 = vsyncpa [#allocation3 + $0x1], 1 }
 0x441   :  { %7510 = vsyncpa [#allocation6], 1 }
 0x442   :  { %7512 = vsyncpa [#allocation6 + $0x1], 1 }
 0x443   :  { %7513 = vsyncpa [#allocation4], 1 }
 0x444   :  { %7515 = vsyncpa [#allocation4 + $0x1], 1 }
 0x445   :  { %7516 = vsyncpa [#allocation9], 1 }
 0x446   :  { %7518 = vsyncpa [#allocation9 + $0x1], 1 }

</bundles_post_ra>
